<compile_context>
chip_gen: v5e
topology: v5e:2x2
jax: 0.10.0
libtpu: 0.0.40
codegen_flags: <defaults>
</compile_context>

<pallas_src>
import functools

import jax
import jax.numpy as jnp
from jax.experimental import pallas as pl

# ----------------------- small synthetic CLIP text config ---------------------
VOCAB = 64     # vocab size (EOT token = VOCAB - 1, the highest id)
T = 8          # max_length (context length)
D = 32         # transformer width (d_model)
H = 4          # attention heads
HD = D // H    # head dim
LAYERS = 2     # transformer layers
EMBED = 32     # text_projection output dim
B = 2          # batch

SCALE = HD ** -0.5
NEG_BIG = -1e9            # finite "masked" score
LN_EPS = 1e-5
L2_EPS = 1e-12


# ------------------------------ in-kernel helpers ------------------------------
def _mm(a, w_bf16):
    """MXU matmul: bf16 operands, f32 accumulate (weights pre-stored as bf16)."""
    return jnp.dot(a.astype(jnp.bfloat16), w_bf16,
                   preferred_element_type=jnp.float32)


def _ln(x, g, b):
    """LayerNorm over the last dim on f32 values. g/b: [1, D]."""
    mu = jnp.mean(x, axis=-1, keepdims=True)
    xc = x - mu
    var = jnp.mean(xc * xc, axis=-1, keepdims=True)
    return xc * jax.lax.rsqrt(var + LN_EPS) * g + b


# --------------------------------- fused kernel --------------------------------
def _clip_text_kernel(
    x0_ref, sel_ref,
    ln1_g_ref, ln1_b_ref,
    w_q_ref, w_k_ref, w_v_ref, b_q_ref, b_k_ref, b_v_ref,
    w_o_ref, b_o_ref,
    ln2_g_ref, ln2_b_ref, w_fc_ref, b_fc_ref, w_proj_ref, b_proj_ref,
    lnf_g_ref, lnf_b_ref, text_proj_ref,
    z_ref,
    *, batch, normalize,
):
    # causal text mask [T, T] (query index i attends to key index j <= i)
    row = jax.lax.broadcasted_iota(jnp.int32, (T, T), 0)
    col = jax.lax.broadcasted_iota(jnp.int32, (T, T), 1)
    causal = col <= row

    # f32 residual stream for the whole batch, kept as a value in vregs
    x = x0_ref[...].astype(jnp.float32)                           # [B*T, D]

    for l in range(LAYERS):
        # ---- multi-head causal self-attention (pre-LN) ----
        xn = _ln(x, ln1_g_ref[l], ln1_b_ref[l])                   # [B*T, D]
        xnb = xn.astype(jnp.bfloat16)                             # cast once, reuse 3x
        q_all = (jnp.dot(xnb, w_q_ref[l], preferred_element_type=jnp.float32)
                 + b_q_ref[l]) * SCALE                            # [B*T, D]
        k_all = jnp.dot(xnb, w_k_ref[l],
                        preferred_element_type=jnp.float32) + b_k_ref[l]
        v_all = jnp.dot(xnb, w_v_ref[l],
                        preferred_element_type=jnp.float32) + b_v_ref[l]

        # only scores / softmax / PV are per-sequence (per-head, in vregs)
        attn_rows = []
        for b in range(batch):
            q = q_all[b * T:(b + 1) * T, :]                       # [T, D]
            k = k_all[b * T:(b + 1) * T, :]
            v = v_all[b * T:(b + 1) * T, :]
            o_heads = []
            for h in range(H):
                qh = q[:, h * HD:(h + 1) * HD]                    # [T, HD]
                kh = k[:, h * HD:(h + 1) * HD]
                vh = v[:, h * HD:(h + 1) * HD]
                # scores without explicit transpose: contract on the head dim
                s = jax.lax.dot_general(qh, kh, (((1,), (1,)), ((), ())),
                                        preferred_element_type=jnp.float32)
                s = jnp.where(causal, s, NEG_BIG)
                p = jnp.exp(s - jnp.max(s, axis=-1, keepdims=True))
                p = p / jnp.sum(p, axis=-1, keepdims=True)        # exact softmax
                o_heads.append(jnp.dot(p, vh,
                                       preferred_element_type=jnp.float32))
            attn_rows.append(jnp.concatenate(o_heads, axis=-1))   # [T, D]
        attn = jnp.concatenate(attn_rows, axis=0)                 # [B*T, D]
        # single batched output projection (one K=D MXU push), bf16 weight
        x = x + _mm(attn, w_o_ref[l]) + b_o_ref[l]

        # ---- MLP (pre-LN, quickGELU), batched over B*T ----
        xn = _ln(x, ln2_g_ref[l], ln2_b_ref[l])
        hdn = _mm(xn, w_fc_ref[l]) + b_fc_ref[l]                  # [B*T, 4D]
        hdn = hdn * jax.nn.sigmoid(1.702 * hdn)                   # quickGELU
        x = x + _mm(hdn, w_proj_ref[l]) + b_proj_ref[l]

    # ---- fused tail: final LN, block-one-hot EOT pooling, projection, L2 norm ----
    xf = _ln(x, lnf_g_ref[...], lnf_b_ref[...])                   # [B*T, D]
    pooled = jnp.dot(sel_ref[...], xf,
                     preferred_element_type=jnp.float32)          # [B, D]
    z = _mm(pooled, text_proj_ref[...])                           # [B, EMBED]
    if normalize:
        ss = jnp.sum(z * z, axis=-1, keepdims=True)
        z = z * jax.lax.rsqrt(jnp.maximum(ss, L2_EPS))
    z_ref[...] = z.astype(z_ref.dtype)                            # single store


# ------------------------------- parameters -----------------------------------
def init_params(key):
    def nrm(k, shape, scale, dtype=jnp.float32):
        return (scale * jax.random.normal(k, shape, jnp.float32)).astype(dtype)

    ks = jax.random.split(key, 10)
    return {
        "tok_emb": nrm(ks[0], (VOCAB, D), 0.02),
        "pos_emb": nrm(ks[1], (T, D), 0.01),
        "ln1_g": jnp.ones((LAYERS, 1, D), jnp.float32),
        "ln1_b": jnp.zeros((LAYERS, 1, D), jnp.float32),
        # pre-split QKV weights/biases (no [D,3D] lane-offset slicing in-kernel)
        "w_q": nrm(ks[2], (LAYERS, D, D), D ** -0.5, jnp.bfloat16),
        "w_k": nrm(ks[3], (LAYERS, D, D), D ** -0.5, jnp.bfloat16),
        "w_v": nrm(ks[4], (LAYERS, D, D), D ** -0.5, jnp.bfloat16),
        "b_q": jnp.zeros((LAYERS, 1, D), jnp.float32),
        "b_k": jnp.zeros((LAYERS, 1, D), jnp.float32),
        "b_v": jnp.zeros((LAYERS, 1, D), jnp.float32),
        "w_o": nrm(ks[5], (LAYERS, D, D), D ** -0.5, jnp.bfloat16),   # bf16 (was f32)
        "b_o": jnp.zeros((LAYERS, 1, D), jnp.float32),
        "ln2_g": jnp.ones((LAYERS, 1, D), jnp.float32),
        "ln2_b": jnp.zeros((LAYERS, 1, D), jnp.float32),
        "w_fc": nrm(ks[6], (LAYERS, D, 4 * D), D ** -0.5, jnp.bfloat16),
        "b_fc": jnp.zeros((LAYERS, 1, 4 * D), jnp.float32),
        "w_proj": nrm(ks[7], (LAYERS, 4 * D, D), (4 * D) ** -0.5, jnp.bfloat16),
        "b_proj": jnp.zeros((LAYERS, 1, D), jnp.float32),
        "lnf_g": jnp.ones((1, D), jnp.float32),
        "lnf_b": jnp.zeros((1, D), jnp.float32),
        "text_proj": nrm(ks[8], (D, EMBED), D ** -0.5, jnp.bfloat16),  # no bias in CLIP
    }


# ------------------------------ forward pass -----------------------------------
@functools.partial(jax.jit, static_argnames=("normalize",))
def frozen_clip_text_embedder(params, tokens, normalize=True):
    """Equivalent of FrozenCLIPTextEmbedder.forward, on precomputed token ids."""
    bsz = tokens.shape[0]

    # glue (outside the kernel): embedding gather + positional add, and the
    # [B, B*T] block-one-hot EOT selector. NOTE: assumes the EOT id is the
    # unique maximum token id per sequence (as in CLIP's tokenizer).
    x0 = jnp.take(params["tok_emb"], tokens, axis=0).astype(jnp.float32)
    x0 = (x0 + params["pos_emb"][None, :, :]).reshape(bsz * T, D)
    eot_idx = jnp.argmax(tokens, axis=-1)                          # [B]
    sel = jax.nn.one_hot(jnp.arange(bsz) * T + eot_idx, bsz * T,
                         dtype=jnp.float32)                        # [B, B*T]

    kernel = functools.partial(_clip_text_kernel, batch=bsz, normalize=normalize)
    z = pl.pallas_call(
        kernel,
        out_shape=jax.ShapeDtypeStruct((bsz, EMBED), jnp.float32),
    )(
        x0, sel,
        params["ln1_g"], params["ln1_b"],
        params["w_q"], params["w_k"], params["w_v"],
        params["b_q"], params["b_k"], params["b_v"],
        params["w_o"], params["b_o"],
        params["ln2_g"], params["ln2_b"], params["w_fc"], params["b_fc"],
        params["w_proj"], params["b_proj"],
        params["lnf_g"], params["lnf_b"], params["text_proj"],
    )
    return z                                                       # [B, EMBED]


# ---------------------------------- main ---------------------------------------
if __name__ == "__main__":
    key = jax.random.PRNGKey(0)
    params = init_params(key)

    # synthetic "tokenized" text: random ids with an explicit EOT (= VOCAB-1)
    tok_key = jax.random.fold_in(key, 123)
    tokens = jax.random.randint(tok_key, (B, T), 1, VOCAB - 2, dtype=jnp.int32)
    eot_pos = jnp.array([T - 2, T - 1], dtype=jnp.int32)
    tokens = tokens.at[jnp.arange(B), eot_pos].set(VOCAB - 1)

    z = frozen_clip_text_embedder(params, tokens, normalize=True)
    z = jax.block_until_ready(z)

    assert z.shape == (B, EMBED), z.shape
    assert bool(jnp.all(jnp.isfinite(z)))
    norms = jnp.linalg.norm(z, axis=1)
    assert bool(jnp.all(jnp.abs(norms - 1.0) < 1e-3)), norms
    print("KERNEL_OK")
</pallas_src>

<mosaic_0001>
module attributes {stable_mosaic.version = 11 : i64} {
  func.func @_clip_text_kernel(%arg0: memref<16x32xf32, #tpu.memory_space<vmem>>, %arg1: memref<2x16xf32, #tpu.memory_space<vmem>>, %arg2: memref<2x1x32xf32, #tpu.memory_space<vmem>>, %arg3: memref<2x1x32xf32, #tpu.memory_space<vmem>>, %arg4: memref<2x32x32xbf16, #tpu.memory_space<vmem>>, %arg5: memref<2x32x32xbf16, #tpu.memory_space<vmem>>, %arg6: memref<2x32x32xbf16, #tpu.memory_space<vmem>>, %arg7: memref<2x1x32xf32, #tpu.memory_space<vmem>>, %arg8: memref<2x1x32xf32, #tpu.memory_space<vmem>>, %arg9: memref<2x1x32xf32, #tpu.memory_space<vmem>>, %arg10: memref<2x32x32xbf16, #tpu.memory_space<vmem>>, %arg11: memref<2x1x32xf32, #tpu.memory_space<vmem>>, %arg12: memref<2x1x32xf32, #tpu.memory_space<vmem>>, %arg13: memref<2x1x32xf32, #tpu.memory_space<vmem>>, %arg14: memref<2x32x128xbf16, #tpu.memory_space<vmem>>, %arg15: memref<2x1x128xf32, #tpu.memory_space<vmem>>, %arg16: memref<2x128x32xbf16, #tpu.memory_space<vmem>>, %arg17: memref<2x1x32xf32, #tpu.memory_space<vmem>>, %arg18: memref<1x32xf32, #tpu.memory_space<vmem>>, %arg19: memref<1x32xf32, #tpu.memory_space<vmem>>, %arg20: memref<32x32xbf16, #tpu.memory_space<vmem>>, %arg21: memref<2x32xf32, #tpu.memory_space<vmem>>) attributes {dimension_semantics = [], scalar_prefetch = 0 : i64, scratch_operands = 0 : i64, tpu.core_type = #tpu.core_type<tc>} {
    %0 = tpu.iota {dimensions = array<i32: 0>} : vector<8x8xi32>
    %1 = tpu.iota {dimensions = array<i32: 1>} : vector<8x8xi32>
    %2 = arith.cmpi sle, %1, %0 : vector<8x8xi32>
    %c0 = arith.constant 0 : index
    %c0_0 = arith.constant 0 : index
    %3 = vector.load %arg0[%c0, %c0_0] : memref<16x32xf32, #tpu.memory_space<vmem>>, vector<16x32xf32>
    %c0_1 = arith.constant 0 : index
    %c0_2 = arith.constant 0 : index
    %c0_3 = arith.constant 0 : index
    %4 = vector.load %arg2[%c0_1, %c0_2, %c0_3] : memref<2x1x32xf32, #tpu.memory_space<vmem>>, vector<1x1x32xf32>
    %5 = vector.shape_cast %4 : vector<1x1x32xf32> to vector<1x32xf32>
    %c0_4 = arith.constant 0 : index
    %c0_5 = arith.constant 0 : index
    %c0_6 = arith.constant 0 : index
    %6 = vector.load %arg3[%c0_4, %c0_5, %c0_6] : memref<2x1x32xf32, #tpu.memory_space<vmem>>, vector<1x1x32xf32>
    %7 = vector.shape_cast %6 : vector<1x1x32xf32> to vector<1x32xf32>
    %cst = arith.constant dense<0.000000e+00> : vector<16xf32>
    %8 = vector.multi_reduction <add>, %3, %cst [1] : vector<16x32xf32> to vector<16xf32>
    %9 = vector.shape_cast %8 : vector<16xf32> to vector<16x1xf32>
    %cst_7 = arith.constant 3.200000e+01 : f32
    %10 = vector.broadcast %cst_7 : f32 to vector<16x1xf32>
    %11 = arith.divf %9, %10 : vector<16x1xf32>
    %12 = vector.broadcast %11 : vector<16x1xf32> to vector<16x32xf32>
    %13 = arith.subf %3, %12 : vector<16x32xf32>
    %14 = arith.mulf %13, %13 : vector<16x32xf32>
    %cst_8 = arith.constant dense<0.000000e+00> : vector<16xf32>
    %15 = vector.multi_reduction <add>, %14, %cst_8 [1] : vector<16x32xf32> to vector<16xf32>
    %16 = vector.shape_cast %15 : vector<16xf32> to vector<16x1xf32>
    %cst_9 = arith.constant 3.200000e+01 : f32
    %17 = vector.broadcast %cst_9 : f32 to vector<16x1xf32>
    %18 = arith.divf %16, %17 : vector<16x1xf32>
    %cst_10 = arith.constant 9.99999974E-6 : f32
    %19 = vector.broadcast %cst_10 : f32 to vector<16x1xf32>
    %20 = arith.addf %18, %19 : vector<16x1xf32>
    %21 = math.rsqrt %20 : vector<16x1xf32>
    %22 = vector.broadcast %21 : vector<16x1xf32> to vector<16x32xf32>
    %23 = arith.mulf %13, %22 : vector<16x32xf32>
    %24 = vector.broadcast %5 : vector<1x32xf32> to vector<16x32xf32>
    %25 = arith.mulf %23, %24 : vector<16x32xf32>
    %26 = vector.broadcast %7 : vector<1x32xf32> to vector<16x32xf32>
    %27 = arith.addf %25, %26 : vector<16x32xf32>
    %28 = arith.truncf %27 : vector<16x32xf32> to vector<16x32xbf16>
    %c0_11 = arith.constant 0 : index
    %c0_12 = arith.constant 0 : index
    %c0_13 = arith.constant 0 : index
    %29 = vector.load %arg4[%c0_11, %c0_12, %c0_13] : memref<2x32x32xbf16, #tpu.memory_space<vmem>>, vector<1x32x32xbf16>
    %30 = vector.shape_cast %29 : vector<1x32x32xbf16> to vector<32x32xbf16>
    %cst_14 = arith.constant dense<0.000000e+00> : vector<16x32xf32>
    %31 = tpu.matmul %28, %30, %cst_14 {dimension_numbers = #tpu.dot_dimension_numbers<[1], [0], [0], [1], [0, 0, 1, 1], [], []>} : vector<16x32xbf16>, vector<32x32xbf16>, vector<16x32xf32> -> vector<16x32xf32>
    %c0_15 = arith.constant 0 : index
    %c0_16 = arith.constant 0 : index
    %c0_17 = arith.constant 0 : index
    %32 = vector.load %arg7[%c0_15, %c0_16, %c0_17] : memref<2x1x32xf32, #tpu.memory_space<vmem>>, vector<1x1x32xf32>
    %33 = vector.shape_cast %32 : vector<1x1x32xf32> to vector<1x32xf32>
    %34 = vector.broadcast %33 : vector<1x32xf32> to vector<16x32xf32>
    %35 = arith.addf %31, %34 : vector<16x32xf32>
    %cst_18 = arith.constant 0.353553385 : f32
    %36 = vector.broadcast %cst_18 : f32 to vector<16x32xf32>
    %37 = arith.mulf %35, %36 : vector<16x32xf32>
    %c0_19 = arith.constant 0 : index
    %c0_20 = arith.constant 0 : index
    %c0_21 = arith.constant 0 : index
    %38 = vector.load %arg5[%c0_19, %c0_20, %c0_21] : memref<2x32x32xbf16, #tpu.memory_space<vmem>>, vector<1x32x32xbf16>
    %39 = vector.shape_cast %38 : vector<1x32x32xbf16> to vector<32x32xbf16>
    %cst_22 = arith.constant dense<0.000000e+00> : vector<16x32xf32>
    %40 = tpu.matmul %28, %39, %cst_22 {dimension_numbers = #tpu.dot_dimension_numbers<[1], [0], [0], [1], [0, 0, 1, 1], [], []>} : vector<16x32xbf16>, vector<32x32xbf16>, vector<16x32xf32> -> vector<16x32xf32>
    %c0_23 = arith.constant 0 : index
    %c0_24 = arith.constant 0 : index
    %c0_25 = arith.constant 0 : index
    %41 = vector.load %arg8[%c0_23, %c0_24, %c0_25] : memref<2x1x32xf32, #tpu.memory_space<vmem>>, vector<1x1x32xf32>
    %42 = vector.shape_cast %41 : vector<1x1x32xf32> to vector<1x32xf32>
    %43 = vector.broadcast %42 : vector<1x32xf32> to vector<16x32xf32>
    %44 = arith.addf %40, %43 : vector<16x32xf32>
    %c0_26 = arith.constant 0 : index
    %c0_27 = arith.constant 0 : index
    %c0_28 = arith.constant 0 : index
    %45 = vector.load %arg6[%c0_26, %c0_27, %c0_28] : memref<2x32x32xbf16, #tpu.memory_space<vmem>>, vector<1x32x32xbf16>
    %46 = vector.shape_cast %45 : vector<1x32x32xbf16> to vector<32x32xbf16>
    %cst_29 = arith.constant dense<0.000000e+00> : vector<16x32xf32>
    %47 = tpu.matmul %28, %46, %cst_29 {dimension_numbers = #tpu.dot_dimension_numbers<[1], [0], [0], [1], [0, 0, 1, 1], [], []>} : vector<16x32xbf16>, vector<32x32xbf16>, vector<16x32xf32> -> vector<16x32xf32>
    %c0_30 = arith.constant 0 : index
    %c0_31 = arith.constant 0 : index
    %c0_32 = arith.constant 0 : index
    %48 = vector.load %arg9[%c0_30, %c0_31, %c0_32] : memref<2x1x32xf32, #tpu.memory_space<vmem>>, vector<1x1x32xf32>
    %49 = vector.shape_cast %48 : vector<1x1x32xf32> to vector<1x32xf32>
    %50 = vector.broadcast %49 : vector<1x32xf32> to vector<16x32xf32>
    %51 = arith.addf %47, %50 : vector<16x32xf32>
    %52 = vector.extract_strided_slice %37 {offsets = [0, 0], sizes = [8, 32], strides = [1, 1]} : vector<16x32xf32> to vector<8x32xf32>
    %53 = vector.extract_strided_slice %44 {offsets = [0, 0], sizes = [8, 32], strides = [1, 1]} : vector<16x32xf32> to vector<8x32xf32>
    %54 = vector.extract_strided_slice %51 {offsets = [0, 0], sizes = [8, 32], strides = [1, 1]} : vector<16x32xf32> to vector<8x32xf32>
    %55 = vector.extract_strided_slice %52 {offsets = [0, 0], sizes = [8, 8], strides = [1, 1]} : vector<8x32xf32> to vector<8x8xf32>
    %56 = vector.extract_strided_slice %53 {offsets = [0, 0], sizes = [8, 8], strides = [1, 1]} : vector<8x32xf32> to vector<8x8xf32>
    %57 = vector.extract_strided_slice %54 {offsets = [0, 0], sizes = [8, 8], strides = [1, 1]} : vector<8x32xf32> to vector<8x8xf32>
    %cst_33 = arith.constant dense<0.000000e+00> : vector<8x8xf32>
    %58 = tpu.matmul %55, %56, %cst_33 {dimension_numbers = #tpu.dot_dimension_numbers<[1], [1], [0], [0], [0, 0, 1, 0], [], []>} : vector<8x8xf32>, vector<8x8xf32>, vector<8x8xf32> -> vector<8x8xf32>
    %cst_34 = arith.constant -1.000000e+09 : f32
    %59 = vector.broadcast %cst_34 : f32 to vector<8x8xf32>
    %60 = arith.select %2, %58, %59 : vector<8x8xi1>, vector<8x8xf32>
    %cst_35 = arith.constant dense<0xFF800000> : vector<8xf32>
    %61 = vector.multi_reduction <maximumf>, %60, %cst_35 [1] : vector<8x8xf32> to vector<8xf32>
    %62 = vector.shape_cast %61 : vector<8xf32> to vector<8x1xf32>
    %63 = vector.broadcast %62 : vector<8x1xf32> to vector<8x8xf32>
    %64 = arith.subf %60, %63 : vector<8x8xf32>
    %65 = math.exp %64 : vector<8x8xf32>
    %cst_36 = arith.constant dense<0.000000e+00> : vector<8xf32>
    %66 = vector.multi_reduction <add>, %65, %cst_36 [1] : vector<8x8xf32> to vector<8xf32>
    %67 = vector.shape_cast %66 : vector<8xf32> to vector<8x1xf32>
    %68 = vector.broadcast %67 : vector<8x1xf32> to vector<8x8xf32>
    %69 = arith.divf %65, %68 : vector<8x8xf32>
    %cst_37 = arith.constant dense<0.000000e+00> : vector<8x8xf32>
    %70 = tpu.matmul %69, %57, %cst_37 {dimension_numbers = #tpu.dot_dimension_numbers<[1], [0], [0], [1], [0, 0, 1, 1], [], []>} : vector<8x8xf32>, vector<8x8xf32>, vector<8x8xf32> -> vector<8x8xf32>
    %71 = vector.extract_strided_slice %52 {offsets = [0, 8], sizes = [8, 8], strides = [1, 1]} : vector<8x32xf32> to vector<8x8xf32>
    %72 = vector.extract_strided_slice %53 {offsets = [0, 8], sizes = [8, 8], strides = [1, 1]} : vector<8x32xf32> to vector<8x8xf32>
    %73 = vector.extract_strided_slice %54 {offsets = [0, 8], sizes = [8, 8], strides = [1, 1]} : vector<8x32xf32> to vector<8x8xf32>
    %cst_38 = arith.constant dense<0.000000e+00> : vector<8x8xf32>
    %74 = tpu.matmul %71, %72, %cst_38 {dimension_numbers = #tpu.dot_dimension_numbers<[1], [1], [0], [0], [0, 0, 1, 0], [], []>} : vector<8x8xf32>, vector<8x8xf32>, vector<8x8xf32> -> vector<8x8xf32>
    %cst_39 = arith.constant -1.000000e+09 : f32
    %75 = vector.broadcast %cst_39 : f32 to vector<8x8xf32>
    %76 = arith.select %2, %74, %75 : vector<8x8xi1>, vector<8x8xf32>
    %cst_40 = arith.constant dense<0xFF800000> : vector<8xf32>
    %77 = vector.multi_reduction <maximumf>, %76, %cst_40 [1] : vector<8x8xf32> to vector<8xf32>
    %78 = vector.shape_cast %77 : vector<8xf32> to vector<8x1xf32>
    %79 = vector.broadcast %78 : vector<8x1xf32> to vector<8x8xf32>
    %80 = arith.subf %76, %79 : vector<8x8xf32>
    %81 = math.exp %80 : vector<8x8xf32>
    %cst_41 = arith.constant dense<0.000000e+00> : vector<8xf32>
    %82 = vector.multi_reduction <add>, %81, %cst_41 [1] : vector<8x8xf32> to vector<8xf32>
    %83 = vector.shape_cast %82 : vector<8xf32> to vector<8x1xf32>
    %84 = vector.broadcast %83 : vector<8x1xf32> to vector<8x8xf32>
    %85 = arith.divf %81, %84 : vector<8x8xf32>
    %cst_42 = arith.constant dense<0.000000e+00> : vector<8x8xf32>
    %86 = tpu.matmul %85, %73, %cst_42 {dimension_numbers = #tpu.dot_dimension_numbers<[1], [0], [0], [1], [0, 0, 1, 1], [], []>} : vector<8x8xf32>, vector<8x8xf32>, vector<8x8xf32> -> vector<8x8xf32>
    %87 = vector.extract_strided_slice %52 {offsets = [0, 16], sizes = [8, 8], strides = [1, 1]} : vector<8x32xf32> to vector<8x8xf32>
    %88 = vector.extract_strided_slice %53 {offsets = [0, 16], sizes = [8, 8], strides = [1, 1]} : vector<8x32xf32> to vector<8x8xf32>
    %89 = vector.extract_strided_slice %54 {offsets = [0, 16], sizes = [8, 8], strides = [1, 1]} : vector<8x32xf32> to vector<8x8xf32>
    %cst_43 = arith.constant dense<0.000000e+00> : vector<8x8xf32>
    %90 = tpu.matmul %87, %88, %cst_43 {dimension_numbers = #tpu.dot_dimension_numbers<[1], [1], [0], [0], [0, 0, 1, 0], [], []>} : vector<8x8xf32>, vector<8x8xf32>, vector<8x8xf32> -> vector<8x8xf32>
    %cst_44 = arith.constant -1.000000e+09 : f32
    %91 = vector.broadcast %cst_44 : f32 to vector<8x8xf32>
    %92 = arith.select %2, %90, %91 : vector<8x8xi1>, vector<8x8xf32>
    %cst_45 = arith.constant dense<0xFF800000> : vector<8xf32>
    %93 = vector.multi_reduction <maximumf>, %92, %cst_45 [1] : vector<8x8xf32> to vector<8xf32>
    %94 = vector.shape_cast %93 : vector<8xf32> to vector<8x1xf32>
    %95 = vector.broadcast %94 : vector<8x1xf32> to vector<8x8xf32>
    %96 = arith.subf %92, %95 : vector<8x8xf32>
    %97 = math.exp %96 : vector<8x8xf32>
    %cst_46 = arith.constant dense<0.000000e+00> : vector<8xf32>
    %98 = vector.multi_reduction <add>, %97, %cst_46 [1] : vector<8x8xf32> to vector<8xf32>
    %99 = vector.shape_cast %98 : vector<8xf32> to vector<8x1xf32>
    %100 = vector.broadcast %99 : vector<8x1xf32> to vector<8x8xf32>
    %101 = arith.divf %97, %100 : vector<8x8xf32>
    %cst_47 = arith.constant dense<0.000000e+00> : vector<8x8xf32>
    %102 = tpu.matmul %101, %89, %cst_47 {dimension_numbers = #tpu.dot_dimension_numbers<[1], [0], [0], [1], [0, 0, 1, 1], [], []>} : vector<8x8xf32>, vector<8x8xf32>, vector<8x8xf32> -> vector<8x8xf32>
    %103 = vector.extract_strided_slice %52 {offsets = [0, 24], sizes = [8, 8], strides = [1, 1]} : vector<8x32xf32> to vector<8x8xf32>
    %104 = vector.extract_strided_slice %53 {offsets = [0, 24], sizes = [8, 8], strides = [1, 1]} : vector<8x32xf32> to vector<8x8xf32>
    %105 = vector.extract_strided_slice %54 {offsets = [0, 24], sizes = [8, 8], strides = [1, 1]} : vector<8x32xf32> to vector<8x8xf32>
    %cst_48 = arith.constant dense<0.000000e+00> : vector<8x8xf32>
    %106 = tpu.matmul %103, %104, %cst_48 {dimension_numbers = #tpu.dot_dimension_numbers<[1], [1], [0], [0], [0, 0, 1, 0], [], []>} : vector<8x8xf32>, vector<8x8xf32>, vector<8x8xf32> -> vector<8x8xf32>
    %cst_49 = arith.constant -1.000000e+09 : f32
    %107 = vector.broadcast %cst_49 : f32 to vector<8x8xf32>
    %108 = arith.select %2, %106, %107 : vector<8x8xi1>, vector<8x8xf32>
    %cst_50 = arith.constant dense<0xFF800000> : vector<8xf32>
    %109 = vector.multi_reduction <maximumf>, %108, %cst_50 [1] : vector<8x8xf32> to vector<8xf32>
    %110 = vector.shape_cast %109 : vector<8xf32> to vector<8x1xf32>
    %111 = vector.broadcast %110 : vector<8x1xf32> to vector<8x8xf32>
    %112 = arith.subf %108, %111 : vector<8x8xf32>
    %113 = math.exp %112 : vector<8x8xf32>
    %cst_51 = arith.constant dense<0.000000e+00> : vector<8xf32>
    %114 = vector.multi_reduction <add>, %113, %cst_51 [1] : vector<8x8xf32> to vector<8xf32>
    %115 = vector.shape_cast %114 : vector<8xf32> to vector<8x1xf32>
    %116 = vector.broadcast %115 : vector<8x1xf32> to vector<8x8xf32>
    %117 = arith.divf %113, %116 : vector<8x8xf32>
    %cst_52 = arith.constant dense<0.000000e+00> : vector<8x8xf32>
    %118 = tpu.matmul %117, %105, %cst_52 {dimension_numbers = #tpu.dot_dimension_numbers<[1], [0], [0], [1], [0, 0, 1, 1], [], []>} : vector<8x8xf32>, vector<8x8xf32>, vector<8x8xf32> -> vector<8x8xf32>
    %119 = tpu.concatenate %70, %86, %102, %118 in 1 : vector<8x8xf32>, vector<8x8xf32>, vector<8x8xf32>, vector<8x8xf32> -> vector<8x32xf32>
    %120 = vector.extract_strided_slice %37 {offsets = [8, 0], sizes = [8, 32], strides = [1, 1]} : vector<16x32xf32> to vector<8x32xf32>
    %121 = vector.extract_strided_slice %44 {offsets = [8, 0], sizes = [8, 32], strides = [1, 1]} : vector<16x32xf32> to vector<8x32xf32>
    %122 = vector.extract_strided_slice %51 {offsets = [8, 0], sizes = [8, 32], strides = [1, 1]} : vector<16x32xf32> to vector<8x32xf32>
    %123 = vector.extract_strided_slice %120 {offsets = [0, 0], sizes = [8, 8], strides = [1, 1]} : vector<8x32xf32> to vector<8x8xf32>
    %124 = vector.extract_strided_slice %121 {offsets = [0, 0], sizes = [8, 8], strides = [1, 1]} : vector<8x32xf32> to vector<8x8xf32>
    %125 = vector.extract_strided_slice %122 {offsets = [0, 0], sizes = [8, 8], strides = [1, 1]} : vector<8x32xf32> to vector<8x8xf32>
    %cst_53 = arith.constant dense<0.000000e+00> : vector<8x8xf32>
    %126 = tpu.matmul %123, %124, %cst_53 {dimension_numbers = #tpu.dot_dimension_numbers<[1], [1], [0], [0], [0, 0, 1, 0], [], []>} : vector<8x8xf32>, vector<8x8xf32>, vector<8x8xf32> -> vector<8x8xf32>
    %cst_54 = arith.constant -1.000000e+09 : f32
    %127 = vector.broadcast %cst_54 : f32 to vector<8x8xf32>
    %128 = arith.select %2, %126, %127 : vector<8x8xi1>, vector<8x8xf32>
    %cst_55 = arith.constant dense<0xFF800000> : vector<8xf32>
    %129 = vector.multi_reduction <maximumf>, %128, %cst_55 [1] : vector<8x8xf32> to vector<8xf32>
    %130 = vector.shape_cast %129 : vector<8xf32> to vector<8x1xf32>
    %131 = vector.broadcast %130 : vector<8x1xf32> to vector<8x8xf32>
    %132 = arith.subf %128, %131 : vector<8x8xf32>
    %133 = math.exp %132 : vector<8x8xf32>
    %cst_56 = arith.constant dense<0.000000e+00> : vector<8xf32>
    %134 = vector.multi_reduction <add>, %133, %cst_56 [1] : vector<8x8xf32> to vector<8xf32>
    %135 = vector.shape_cast %134 : vector<8xf32> to vector<8x1xf32>
    %136 = vector.broadcast %135 : vector<8x1xf32> to vector<8x8xf32>
    %137 = arith.divf %133, %136 : vector<8x8xf32>
    %cst_57 = arith.constant dense<0.000000e+00> : vector<8x8xf32>
    %138 = tpu.matmul %137, %125, %cst_57 {dimension_numbers = #tpu.dot_dimension_numbers<[1], [0], [0], [1], [0, 0, 1, 1], [], []>} : vector<8x8xf32>, vector<8x8xf32>, vector<8x8xf32> -> vector<8x8xf32>
    %139 = vector.extract_strided_slice %120 {offsets = [0, 8], sizes = [8, 8], strides = [1, 1]} : vector<8x32xf32> to vector<8x8xf32>
    %140 = vector.extract_strided_slice %121 {offsets = [0, 8], sizes = [8, 8], strides = [1, 1]} : vector<8x32xf32> to vector<8x8xf32>
    %141 = vector.extract_strided_slice %122 {offsets = [0, 8], sizes = [8, 8], strides = [1, 1]} : vector<8x32xf32> to vector<8x8xf32>
    %cst_58 = arith.constant dense<0.000000e+00> : vector<8x8xf32>
    %142 = tpu.matmul %139, %140, %cst_58 {dimension_numbers = #tpu.dot_dimension_numbers<[1], [1], [0], [0], [0, 0, 1, 0], [], []>} : vector<8x8xf32>, vector<8x8xf32>, vector<8x8xf32> -> vector<8x8xf32>
    %cst_59 = arith.constant -1.000000e+09 : f32
    %143 = vector.broadcast %cst_59 : f32 to vector<8x8xf32>
    %144 = arith.select %2, %142, %143 : vector<8x8xi1>, vector<8x8xf32>
    %cst_60 = arith.constant dense<0xFF800000> : vector<8xf32>
    %145 = vector.multi_reduction <maximumf>, %144, %cst_60 [1] : vector<8x8xf32> to vector<8xf32>
    %146 = vector.shape_cast %145 : vector<8xf32> to vector<8x1xf32>
    %147 = vector.broadcast %146 : vector<8x1xf32> to vector<8x8xf32>
    %148 = arith.subf %144, %147 : vector<8x8xf32>
    %149 = math.exp %148 : vector<8x8xf32>
    %cst_61 = arith.constant dense<0.000000e+00> : vector<8xf32>
    %150 = vector.multi_reduction <add>, %149, %cst_61 [1] : vector<8x8xf32> to vector<8xf32>
    %151 = vector.shape_cast %150 : vector<8xf32> to vector<8x1xf32>
    %152 = vector.broadcast %151 : vector<8x1xf32> to vector<8x8xf32>
    %153 = arith.divf %149, %152 : vector<8x8xf32>
    %cst_62 = arith.constant dense<0.000000e+00> : vector<8x8xf32>
    %154 = tpu.matmul %153, %141, %cst_62 {dimension_numbers = #tpu.dot_dimension_numbers<[1], [0], [0], [1], [0, 0, 1, 1], [], []>} : vector<8x8xf32>, vector<8x8xf32>, vector<8x8xf32> -> vector<8x8xf32>
    %155 = vector.extract_strided_slice %120 {offsets = [0, 16], sizes = [8, 8], strides = [1, 1]} : vector<8x32xf32> to vector<8x8xf32>
    %156 = vector.extract_strided_slice %121 {offsets = [0, 16], sizes = [8, 8], strides = [1, 1]} : vector<8x32xf32> to vector<8x8xf32>
    %157 = vector.extract_strided_slice %122 {offsets = [0, 16], sizes = [8, 8], strides = [1, 1]} : vector<8x32xf32> to vector<8x8xf32>
    %cst_63 = arith.constant dense<0.000000e+00> : vector<8x8xf32>
    %158 = tpu.matmul %155, %156, %cst_63 {dimension_numbers = #tpu.dot_dimension_numbers<[1], [1], [0], [0], [0, 0, 1, 0], [], []>} : vector<8x8xf32>, vector<8x8xf32>, vector<8x8xf32> -> vector<8x8xf32>
    %cst_64 = arith.constant -1.000000e+09 : f32
    %159 = vector.broadcast %cst_64 : f32 to vector<8x8xf32>
    %160 = arith.select %2, %158, %159 : vector<8x8xi1>, vector<8x8xf32>
    %cst_65 = arith.constant dense<0xFF800000> : vector<8xf32>
    %161 = vector.multi_reduction <maximumf>, %160, %cst_65 [1] : vector<8x8xf32> to vector<8xf32>
    %162 = vector.shape_cast %161 : vector<8xf32> to vector<8x1xf32>
    %163 = vector.broadcast %162 : vector<8x1xf32> to vector<8x8xf32>
    %164 = arith.subf %160, %163 : vector<8x8xf32>
    %165 = math.exp %164 : vector<8x8xf32>
    %cst_66 = arith.constant dense<0.000000e+00> : vector<8xf32>
    %166 = vector.multi_reduction <add>, %165, %cst_66 [1] : vector<8x8xf32> to vector<8xf32>
    %167 = vector.shape_cast %166 : vector<8xf32> to vector<8x1xf32>
    %168 = vector.broadcast %167 : vector<8x1xf32> to vector<8x8xf32>
    %169 = arith.divf %165, %168 : vector<8x8xf32>
    %cst_67 = arith.constant dense<0.000000e+00> : vector<8x8xf32>
    %170 = tpu.matmul %169, %157, %cst_67 {dimension_numbers = #tpu.dot_dimension_numbers<[1], [0], [0], [1], [0, 0, 1, 1], [], []>} : vector<8x8xf32>, vector<8x8xf32>, vector<8x8xf32> -> vector<8x8xf32>
    %171 = vector.extract_strided_slice %120 {offsets = [0, 24], sizes = [8, 8], strides = [1, 1]} : vector<8x32xf32> to vector<8x8xf32>
    %172 = vector.extract_strided_slice %121 {offsets = [0, 24], sizes = [8, 8], strides = [1, 1]} : vector<8x32xf32> to vector<8x8xf32>
    %173 = vector.extract_strided_slice %122 {offsets = [0, 24], sizes = [8, 8], strides = [1, 1]} : vector<8x32xf32> to vector<8x8xf32>
    %cst_68 = arith.constant dense<0.000000e+00> : vector<8x8xf32>
    %174 = tpu.matmul %171, %172, %cst_68 {dimension_numbers = #tpu.dot_dimension_numbers<[1], [1], [0], [0], [0, 0, 1, 0], [], []>} : vector<8x8xf32>, vector<8x8xf32>, vector<8x8xf32> -> vector<8x8xf32>
    %cst_69 = arith.constant -1.000000e+09 : f32
    %175 = vector.broadcast %cst_69 : f32 to vector<8x8xf32>
    %176 = arith.select %2, %174, %175 : vector<8x8xi1>, vector<8x8xf32>
    %cst_70 = arith.constant dense<0xFF800000> : vector<8xf32>
    %177 = vector.multi_reduction <maximumf>, %176, %cst_70 [1] : vector<8x8xf32> to vector<8xf32>
    %178 = vector.shape_cast %177 : vector<8xf32> to vector<8x1xf32>
    %179 = vector.broadcast %178 : vector<8x1xf32> to vector<8x8xf32>
    %180 = arith.subf %176, %179 : vector<8x8xf32>
    %181 = math.exp %180 : vector<8x8xf32>
    %cst_71 = arith.constant dense<0.000000e+00> : vector<8xf32>
    %182 = vector.multi_reduction <add>, %181, %cst_71 [1] : vector<8x8xf32> to vector<8xf32>
    %183 = vector.shape_cast %182 : vector<8xf32> to vector<8x1xf32>
    %184 = vector.broadcast %183 : vector<8x1xf32> to vector<8x8xf32>
    %185 = arith.divf %181, %184 : vector<8x8xf32>
    %cst_72 = arith.constant dense<0.000000e+00> : vector<8x8xf32>
    %186 = tpu.matmul %185, %173, %cst_72 {dimension_numbers = #tpu.dot_dimension_numbers<[1], [0], [0], [1], [0, 0, 1, 1], [], []>} : vector<8x8xf32>, vector<8x8xf32>, vector<8x8xf32> -> vector<8x8xf32>
    %187 = tpu.concatenate %138, %154, %170, %186 in 1 : vector<8x8xf32>, vector<8x8xf32>, vector<8x8xf32>, vector<8x8xf32> -> vector<8x32xf32>
    %188 = tpu.concatenate %119, %187 in 0 : vector<8x32xf32>, vector<8x32xf32> -> vector<16x32xf32>
    %c0_73 = arith.constant 0 : index
    %c0_74 = arith.constant 0 : index
    %c0_75 = arith.constant 0 : index
    %189 = vector.load %arg10[%c0_73, %c0_74, %c0_75] : memref<2x32x32xbf16, #tpu.memory_space<vmem>>, vector<1x32x32xbf16>
    %190 = vector.shape_cast %189 : vector<1x32x32xbf16> to vector<32x32xbf16>
    %191 = arith.truncf %188 : vector<16x32xf32> to vector<16x32xbf16>
    %cst_76 = arith.constant dense<0.000000e+00> : vector<16x32xf32>
    %192 = tpu.matmul %191, %190, %cst_76 {dimension_numbers = #tpu.dot_dimension_numbers<[1], [0], [0], [1], [0, 0, 1, 1], [], []>} : vector<16x32xbf16>, vector<32x32xbf16>, vector<16x32xf32> -> vector<16x32xf32>
    %193 = arith.addf %3, %192 : vector<16x32xf32>
    %c0_77 = arith.constant 0 : index
    %c0_78 = arith.constant 0 : index
    %c0_79 = arith.constant 0 : index
    %194 = vector.load %arg11[%c0_77, %c0_78, %c0_79] : memref<2x1x32xf32, #tpu.memory_space<vmem>>, vector<1x1x32xf32>
    %195 = vector.shape_cast %194 : vector<1x1x32xf32> to vector<1x32xf32>
    %196 = vector.broadcast %195 : vector<1x32xf32> to vector<16x32xf32>
    %197 = arith.addf %193, %196 : vector<16x32xf32>
    %c0_80 = arith.constant 0 : index
    %c0_81 = arith.constant 0 : index
    %c0_82 = arith.constant 0 : index
    %198 = vector.load %arg12[%c0_80, %c0_81, %c0_82] : memref<2x1x32xf32, #tpu.memory_space<vmem>>, vector<1x1x32xf32>
    %199 = vector.shape_cast %198 : vector<1x1x32xf32> to vector<1x32xf32>
    %c0_83 = arith.constant 0 : index
    %c0_84 = arith.constant 0 : index
    %c0_85 = arith.constant 0 : index
    %200 = vector.load %arg13[%c0_83, %c0_84, %c0_85] : memref<2x1x32xf32, #tpu.memory_space<vmem>>, vector<1x1x32xf32>
    %201 = vector.shape_cast %200 : vector<1x1x32xf32> to vector<1x32xf32>
    %cst_86 = arith.constant dense<0.000000e+00> : vector<16xf32>
    %202 = vector.multi_reduction <add>, %197, %cst_86 [1] : vector<16x32xf32> to vector<16xf32>
    %203 = vector.shape_cast %202 : vector<16xf32> to vector<16x1xf32>
    %cst_87 = arith.constant 3.200000e+01 : f32
    %204 = vector.broadcast %cst_87 : f32 to vector<16x1xf32>
    %205 = arith.divf %203, %204 : vector<16x1xf32>
    %206 = vector.broadcast %205 : vector<16x1xf32> to vector<16x32xf32>
    %207 = arith.subf %197, %206 : vector<16x32xf32>
    %208 = arith.mulf %207, %207 : vector<16x32xf32>
    %cst_88 = arith.constant dense<0.000000e+00> : vector<16xf32>
    %209 = vector.multi_reduction <add>, %208, %cst_88 [1] : vector<16x32xf32> to vector<16xf32>
    %210 = vector.shape_cast %209 : vector<16xf32> to vector<16x1xf32>
    %cst_89 = arith.constant 3.200000e+01 : f32
    %211 = vector.broadcast %cst_89 : f32 to vector<16x1xf32>
    %212 = arith.divf %210, %211 : vector<16x1xf32>
    %cst_90 = arith.constant 9.99999974E-6 : f32
    %213 = vector.broadcast %cst_90 : f32 to vector<16x1xf32>
    %214 = arith.addf %212, %213 : vector<16x1xf32>
    %215 = math.rsqrt %214 : vector<16x1xf32>
    %216 = vector.broadcast %215 : vector<16x1xf32> to vector<16x32xf32>
    %217 = arith.mulf %207, %216 : vector<16x32xf32>
    %218 = vector.broadcast %199 : vector<1x32xf32> to vector<16x32xf32>
    %219 = arith.mulf %217, %218 : vector<16x32xf32>
    %220 = vector.broadcast %201 : vector<1x32xf32> to vector<16x32xf32>
    %221 = arith.addf %219, %220 : vector<16x32xf32>
    %c0_91 = arith.constant 0 : index
    %c0_92 = arith.constant 0 : index
    %c0_93 = arith.constant 0 : index
    %222 = vector.load %arg14[%c0_91, %c0_92, %c0_93] : memref<2x32x128xbf16, #tpu.memory_space<vmem>>, vector<1x32x128xbf16>
    %223 = vector.shape_cast %222 : vector<1x32x128xbf16> to vector<32x128xbf16>
    %224 = arith.truncf %221 : vector<16x32xf32> to vector<16x32xbf16>
    %cst_94 = arith.constant dense<0.000000e+00> : vector<16x128xf32>
    %225 = tpu.matmul %224, %223, %cst_94 {dimension_numbers = #tpu.dot_dimension_numbers<[1], [0], [0], [1], [0, 0, 1, 1], [], []>} : vector<16x32xbf16>, vector<32x128xbf16>, vector<16x128xf32> -> vector<16x128xf32>
    %c0_95 = arith.constant 0 : index
    %c0_96 = arith.constant 0 : index
    %c0_97 = arith.constant 0 : index
    %226 = vector.load %arg15[%c0_95, %c0_96, %c0_97] : memref<2x1x128xf32, #tpu.memory_space<vmem>>, vector<1x1x128xf32>
    %227 = vector.shape_cast %226 : vector<1x1x128xf32> to vector<1x128xf32>
    %228 = vector.broadcast %227 : vector<1x128xf32> to vector<16x128xf32>
    %229 = arith.addf %225, %228 : vector<16x128xf32>
    %cst_98 = arith.constant 1.702000e+00 : f32
    %230 = vector.broadcast %cst_98 : f32 to vector<16x128xf32>
    %231 = arith.mulf %230, %229 : vector<16x128xf32>
    %232 = arith.negf %231 : vector<16x128xf32>
    %233 = math.exp %232 : vector<16x128xf32>
    %cst_99 = arith.constant 1.000000e+00 : f32
    %234 = vector.broadcast %cst_99 : f32 to vector<16x128xf32>
    %235 = arith.addf %234, %233 : vector<16x128xf32>
    %236 = arith.divf %234, %235 : vector<16x128xf32>
    %237 = arith.mulf %229, %236 : vector<16x128xf32>
    %c0_100 = arith.constant 0 : index
    %c0_101 = arith.constant 0 : index
    %c0_102 = arith.constant 0 : index
    %238 = vector.load %arg16[%c0_100, %c0_101, %c0_102] : memref<2x128x32xbf16, #tpu.memory_space<vmem>>, vector<1x128x32xbf16>
    %239 = vector.shape_cast %238 : vector<1x128x32xbf16> to vector<128x32xbf16>
    %240 = arith.truncf %237 : vector<16x128xf32> to vector<16x128xbf16>
    %cst_103 = arith.constant dense<0.000000e+00> : vector<16x32xf32>
    %241 = tpu.matmul %240, %239, %cst_103 {dimension_numbers = #tpu.dot_dimension_numbers<[1], [0], [0], [1], [0, 0, 1, 1], [], []>} : vector<16x128xbf16>, vector<128x32xbf16>, vector<16x32xf32> -> vector<16x32xf32>
    %242 = arith.addf %197, %241 : vector<16x32xf32>
    %c0_104 = arith.constant 0 : index
    %c0_105 = arith.constant 0 : index
    %c0_106 = arith.constant 0 : index
    %243 = vector.load %arg17[%c0_104, %c0_105, %c0_106] : memref<2x1x32xf32, #tpu.memory_space<vmem>>, vector<1x1x32xf32>
    %244 = vector.shape_cast %243 : vector<1x1x32xf32> to vector<1x32xf32>
    %245 = vector.broadcast %244 : vector<1x32xf32> to vector<16x32xf32>
    %246 = arith.addf %242, %245 : vector<16x32xf32>
    %c1 = arith.constant 1 : index
    %c0_107 = arith.constant 0 : index
    %c0_108 = arith.constant 0 : index
    %247 = vector.load %arg2[%c1, %c0_107, %c0_108] : memref<2x1x32xf32, #tpu.memory_space<vmem>>, vector<1x1x32xf32>
    %248 = vector.shape_cast %247 : vector<1x1x32xf32> to vector<1x32xf32>
    %c1_109 = arith.constant 1 : index
    %c0_110 = arith.constant 0 : index
    %c0_111 = arith.constant 0 : index
    %249 = vector.load %arg3[%c1_109, %c0_110, %c0_111] : memref<2x1x32xf32, #tpu.memory_space<vmem>>, vector<1x1x32xf32>
    %250 = vector.shape_cast %249 : vector<1x1x32xf32> to vector<1x32xf32>
    %cst_112 = arith.constant dense<0.000000e+00> : vector<16xf32>
    %251 = vector.multi_reduction <add>, %246, %cst_112 [1] : vector<16x32xf32> to vector<16xf32>
    %252 = vector.shape_cast %251 : vector<16xf32> to vector<16x1xf32>
    %cst_113 = arith.constant 3.200000e+01 : f32
    %253 = vector.broadcast %cst_113 : f32 to vector<16x1xf32>
    %254 = arith.divf %252, %253 : vector<16x1xf32>
    %255 = vector.broadcast %254 : vector<16x1xf32> to vector<16x32xf32>
    %256 = arith.subf %246, %255 : vector<16x32xf32>
    %257 = arith.mulf %256, %256 : vector<16x32xf32>
    %cst_114 = arith.constant dense<0.000000e+00> : vector<16xf32>
    %258 = vector.multi_reduction <add>, %257, %cst_114 [1] : vector<16x32xf32> to vector<16xf32>
    %259 = vector.shape_cast %258 : vector<16xf32> to vector<16x1xf32>
    %cst_115 = arith.constant 3.200000e+01 : f32
    %260 = vector.broadcast %cst_115 : f32 to vector<16x1xf32>
    %261 = arith.divf %259, %260 : vector<16x1xf32>
    %cst_116 = arith.constant 9.99999974E-6 : f32
    %262 = vector.broadcast %cst_116 : f32 to vector<16x1xf32>
    %263 = arith.addf %261, %262 : vector<16x1xf32>
    %264 = math.rsqrt %263 : vector<16x1xf32>
    %265 = vector.broadcast %264 : vector<16x1xf32> to vector<16x32xf32>
    %266 = arith.mulf %256, %265 : vector<16x32xf32>
    %267 = vector.broadcast %248 : vector<1x32xf32> to vector<16x32xf32>
    %268 = arith.mulf %266, %267 : vector<16x32xf32>
    %269 = vector.broadcast %250 : vector<1x32xf32> to vector<16x32xf32>
    %270 = arith.addf %268, %269 : vector<16x32xf32>
    %271 = arith.truncf %270 : vector<16x32xf32> to vector<16x32xbf16>
    %c1_117 = arith.constant 1 : index
    %c0_118 = arith.constant 0 : index
    %c0_119 = arith.constant 0 : index
    %272 = vector.load %arg4[%c1_117, %c0_118, %c0_119] : memref<2x32x32xbf16, #tpu.memory_space<vmem>>, vector<1x32x32xbf16>
    %273 = vector.shape_cast %272 : vector<1x32x32xbf16> to vector<32x32xbf16>
    %cst_120 = arith.constant dense<0.000000e+00> : vector<16x32xf32>
    %274 = tpu.matmul %271, %273, %cst_120 {dimension_numbers = #tpu.dot_dimension_numbers<[1], [0], [0], [1], [0, 0, 1, 1], [], []>} : vector<16x32xbf16>, vector<32x32xbf16>, vector<16x32xf32> -> vector<16x32xf32>
    %c1_121 = arith.constant 1 : index
    %c0_122 = arith.constant 0 : index
    %c0_123 = arith.constant 0 : index
    %275 = vector.load %arg7[%c1_121, %c0_122, %c0_123] : memref<2x1x32xf32, #tpu.memory_space<vmem>>, vector<1x1x32xf32>
    %276 = vector.shape_cast %275 : vector<1x1x32xf32> to vector<1x32xf32>
    %277 = vector.broadcast %276 : vector<1x32xf32> to vector<16x32xf32>
    %278 = arith.addf %274, %277 : vector<16x32xf32>
    %cst_124 = arith.constant 0.353553385 : f32
    %279 = vector.broadcast %cst_124 : f32 to vector<16x32xf32>
    %280 = arith.mulf %278, %279 : vector<16x32xf32>
    %c1_125 = arith.constant 1 : index
    %c0_126 = arith.constant 0 : index
    %c0_127 = arith.constant 0 : index
    %281 = vector.load %arg5[%c1_125, %c0_126, %c0_127] : memref<2x32x32xbf16, #tpu.memory_space<vmem>>, vector<1x32x32xbf16>
    %282 = vector.shape_cast %281 : vector<1x32x32xbf16> to vector<32x32xbf16>
    %cst_128 = arith.constant dense<0.000000e+00> : vector<16x32xf32>
    %283 = tpu.matmul %271, %282, %cst_128 {dimension_numbers = #tpu.dot_dimension_numbers<[1], [0], [0], [1], [0, 0, 1, 1], [], []>} : vector<16x32xbf16>, vector<32x32xbf16>, vector<16x32xf32> -> vector<16x32xf32>
    %c1_129 = arith.constant 1 : index
    %c0_130 = arith.constant 0 : index
    %c0_131 = arith.constant 0 : index
    %284 = vector.load %arg8[%c1_129, %c0_130, %c0_131] : memref<2x1x32xf32, #tpu.memory_space<vmem>>, vector<1x1x32xf32>
    %285 = vector.shape_cast %284 : vector<1x1x32xf32> to vector<1x32xf32>
    %286 = vector.broadcast %285 : vector<1x32xf32> to vector<16x32xf32>
    %287 = arith.addf %283, %286 : vector<16x32xf32>
    %c1_132 = arith.constant 1 : index
    %c0_133 = arith.constant 0 : index
    %c0_134 = arith.constant 0 : index
    %288 = vector.load %arg6[%c1_132, %c0_133, %c0_134] : memref<2x32x32xbf16, #tpu.memory_space<vmem>>, vector<1x32x32xbf16>
    %289 = vector.shape_cast %288 : vector<1x32x32xbf16> to vector<32x32xbf16>
    %cst_135 = arith.constant dense<0.000000e+00> : vector<16x32xf32>
    %290 = tpu.matmul %271, %289, %cst_135 {dimension_numbers = #tpu.dot_dimension_numbers<[1], [0], [0], [1], [0, 0, 1, 1], [], []>} : vector<16x32xbf16>, vector<32x32xbf16>, vector<16x32xf32> -> vector<16x32xf32>
    %c1_136 = arith.constant 1 : index
    %c0_137 = arith.constant 0 : index
    %c0_138 = arith.constant 0 : index
    %291 = vector.load %arg9[%c1_136, %c0_137, %c0_138] : memref<2x1x32xf32, #tpu.memory_space<vmem>>, vector<1x1x32xf32>
    %292 = vector.shape_cast %291 : vector<1x1x32xf32> to vector<1x32xf32>
    %293 = vector.broadcast %292 : vector<1x32xf32> to vector<16x32xf32>
    %294 = arith.addf %290, %293 : vector<16x32xf32>
    %295 = vector.extract_strided_slice %280 {offsets = [0, 0], sizes = [8, 32], strides = [1, 1]} : vector<16x32xf32> to vector<8x32xf32>
    %296 = vector.extract_strided_slice %287 {offsets = [0, 0], sizes = [8, 32], strides = [1, 1]} : vector<16x32xf32> to vector<8x32xf32>
    %297 = vector.extract_strided_slice %294 {offsets = [0, 0], sizes = [8, 32], strides = [1, 1]} : vector<16x32xf32> to vector<8x32xf32>
    %298 = vector.extract_strided_slice %295 {offsets = [0, 0], sizes = [8, 8], strides = [1, 1]} : vector<8x32xf32> to vector<8x8xf32>
    %299 = vector.extract_strided_slice %296 {offsets = [0, 0], sizes = [8, 8], strides = [1, 1]} : vector<8x32xf32> to vector<8x8xf32>
    %300 = vector.extract_strided_slice %297 {offsets = [0, 0], sizes = [8, 8], strides = [1, 1]} : vector<8x32xf32> to vector<8x8xf32>
    %cst_139 = arith.constant dense<0.000000e+00> : vector<8x8xf32>
    %301 = tpu.matmul %298, %299, %cst_139 {dimension_numbers = #tpu.dot_dimension_numbers<[1], [1], [0], [0], [0, 0, 1, 0], [], []>} : vector<8x8xf32>, vector<8x8xf32>, vector<8x8xf32> -> vector<8x8xf32>
    %cst_140 = arith.constant -1.000000e+09 : f32
    %302 = vector.broadcast %cst_140 : f32 to vector<8x8xf32>
    %303 = arith.select %2, %301, %302 : vector<8x8xi1>, vector<8x8xf32>
    %cst_141 = arith.constant dense<0xFF800000> : vector<8xf32>
    %304 = vector.multi_reduction <maximumf>, %303, %cst_141 [1] : vector<8x8xf32> to vector<8xf32>
    %305 = vector.shape_cast %304 : vector<8xf32> to vector<8x1xf32>
    %306 = vector.broadcast %305 : vector<8x1xf32> to vector<8x8xf32>
    %307 = arith.subf %303, %306 : vector<8x8xf32>
    %308 = math.exp %307 : vector<8x8xf32>
    %cst_142 = arith.constant dense<0.000000e+00> : vector<8xf32>
    %309 = vector.multi_reduction <add>, %308, %cst_142 [1] : vector<8x8xf32> to vector<8xf32>
    %310 = vector.shape_cast %309 : vector<8xf32> to vector<8x1xf32>
    %311 = vector.broadcast %310 : vector<8x1xf32> to vector<8x8xf32>
    %312 = arith.divf %308, %311 : vector<8x8xf32>
    %cst_143 = arith.constant dense<0.000000e+00> : vector<8x8xf32>
    %313 = tpu.matmul %312, %300, %cst_143 {dimension_numbers = #tpu.dot_dimension_numbers<[1], [0], [0], [1], [0, 0, 1, 1], [], []>} : vector<8x8xf32>, vector<8x8xf32>, vector<8x8xf32> -> vector<8x8xf32>
    %314 = vector.extract_strided_slice %295 {offsets = [0, 8], sizes = [8, 8], strides = [1, 1]} : vector<8x32xf32> to vector<8x8xf32>
    %315 = vector.extract_strided_slice %296 {offsets = [0, 8], sizes = [8, 8], strides = [1, 1]} : vector<8x32xf32> to vector<8x8xf32>
    %316 = vector.extract_strided_slice %297 {offsets = [0, 8], sizes = [8, 8], strides = [1, 1]} : vector<8x32xf32> to vector<8x8xf32>
    %cst_144 = arith.constant dense<0.000000e+00> : vector<8x8xf32>
    %317 = tpu.matmul %314, %315, %cst_144 {dimension_numbers = #tpu.dot_dimension_numbers<[1], [1], [0], [0], [0, 0, 1, 0], [], []>} : vector<8x8xf32>, vector<8x8xf32>, vector<8x8xf32> -> vector<8x8xf32>
    %cst_145 = arith.constant -1.000000e+09 : f32
    %318 = vector.broadcast %cst_145 : f32 to vector<8x8xf32>
    %319 = arith.select %2, %317, %318 : vector<8x8xi1>, vector<8x8xf32>
    %cst_146 = arith.constant dense<0xFF800000> : vector<8xf32>
    %320 = vector.multi_reduction <maximumf>, %319, %cst_146 [1] : vector<8x8xf32> to vector<8xf32>
    %321 = vector.shape_cast %320 : vector<8xf32> to vector<8x1xf32>
    %322 = vector.broadcast %321 : vector<8x1xf32> to vector<8x8xf32>
    %323 = arith.subf %319, %322 : vector<8x8xf32>
    %324 = math.exp %323 : vector<8x8xf32>
    %cst_147 = arith.constant dense<0.000000e+00> : vector<8xf32>
    %325 = vector.multi_reduction <add>, %324, %cst_147 [1] : vector<8x8xf32> to vector<8xf32>
    %326 = vector.shape_cast %325 : vector<8xf32> to vector<8x1xf32>
    %327 = vector.broadcast %326 : vector<8x1xf32> to vector<8x8xf32>
    %328 = arith.divf %324, %327 : vector<8x8xf32>
    %cst_148 = arith.constant dense<0.000000e+00> : vector<8x8xf32>
    %329 = tpu.matmul %328, %316, %cst_148 {dimension_numbers = #tpu.dot_dimension_numbers<[1], [0], [0], [1], [0, 0, 1, 1], [], []>} : vector<8x8xf32>, vector<8x8xf32>, vector<8x8xf32> -> vector<8x8xf32>
    %330 = vector.extract_strided_slice %295 {offsets = [0, 16], sizes = [8, 8], strides = [1, 1]} : vector<8x32xf32> to vector<8x8xf32>
    %331 = vector.extract_strided_slice %296 {offsets = [0, 16], sizes = [8, 8], strides = [1, 1]} : vector<8x32xf32> to vector<8x8xf32>
    %332 = vector.extract_strided_slice %297 {offsets = [0, 16], sizes = [8, 8], strides = [1, 1]} : vector<8x32xf32> to vector<8x8xf32>
    %cst_149 = arith.constant dense<0.000000e+00> : vector<8x8xf32>
    %333 = tpu.matmul %330, %331, %cst_149 {dimension_numbers = #tpu.dot_dimension_numbers<[1], [1], [0], [0], [0, 0, 1, 0], [], []>} : vector<8x8xf32>, vector<8x8xf32>, vector<8x8xf32> -> vector<8x8xf32>
    %cst_150 = arith.constant -1.000000e+09 : f32
    %334 = vector.broadcast %cst_150 : f32 to vector<8x8xf32>
    %335 = arith.select %2, %333, %334 : vector<8x8xi1>, vector<8x8xf32>
    %cst_151 = arith.constant dense<0xFF800000> : vector<8xf32>
    %336 = vector.multi_reduction <maximumf>, %335, %cst_151 [1] : vector<8x8xf32> to vector<8xf32>
    %337 = vector.shape_cast %336 : vector<8xf32> to vector<8x1xf32>
    %338 = vector.broadcast %337 : vector<8x1xf32> to vector<8x8xf32>
    %339 = arith.subf %335, %338 : vector<8x8xf32>
    %340 = math.exp %339 : vector<8x8xf32>
    %cst_152 = arith.constant dense<0.000000e+00> : vector<8xf32>
    %341 = vector.multi_reduction <add>, %340, %cst_152 [1] : vector<8x8xf32> to vector<8xf32>
    %342 = vector.shape_cast %341 : vector<8xf32> to vector<8x1xf32>
    %343 = vector.broadcast %342 : vector<8x1xf32> to vector<8x8xf32>
    %344 = arith.divf %340, %343 : vector<8x8xf32>
    %cst_153 = arith.constant dense<0.000000e+00> : vector<8x8xf32>
    %345 = tpu.matmul %344, %332, %cst_153 {dimension_numbers = #tpu.dot_dimension_numbers<[1], [0], [0], [1], [0, 0, 1, 1], [], []>} : vector<8x8xf32>, vector<8x8xf32>, vector<8x8xf32> -> vector<8x8xf32>
    %346 = vector.extract_strided_slice %295 {offsets = [0, 24], sizes = [8, 8], strides = [1, 1]} : vector<8x32xf32> to vector<8x8xf32>
    %347 = vector.extract_strided_slice %296 {offsets = [0, 24], sizes = [8, 8], strides = [1, 1]} : vector<8x32xf32> to vector<8x8xf32>
    %348 = vector.extract_strided_slice %297 {offsets = [0, 24], sizes = [8, 8], strides = [1, 1]} : vector<8x32xf32> to vector<8x8xf32>
    %cst_154 = arith.constant dense<0.000000e+00> : vector<8x8xf32>
    %349 = tpu.matmul %346, %347, %cst_154 {dimension_numbers = #tpu.dot_dimension_numbers<[1], [1], [0], [0], [0, 0, 1, 0], [], []>} : vector<8x8xf32>, vector<8x8xf32>, vector<8x8xf32> -> vector<8x8xf32>
    %cst_155 = arith.constant -1.000000e+09 : f32
    %350 = vector.broadcast %cst_155 : f32 to vector<8x8xf32>
    %351 = arith.select %2, %349, %350 : vector<8x8xi1>, vector<8x8xf32>
    %cst_156 = arith.constant dense<0xFF800000> : vector<8xf32>
    %352 = vector.multi_reduction <maximumf>, %351, %cst_156 [1] : vector<8x8xf32> to vector<8xf32>
    %353 = vector.shape_cast %352 : vector<8xf32> to vector<8x1xf32>
    %354 = vector.broadcast %353 : vector<8x1xf32> to vector<8x8xf32>
    %355 = arith.subf %351, %354 : vector<8x8xf32>
    %356 = math.exp %355 : vector<8x8xf32>
    %cst_157 = arith.constant dense<0.000000e+00> : vector<8xf32>
    %357 = vector.multi_reduction <add>, %356, %cst_157 [1] : vector<8x8xf32> to vector<8xf32>
    %358 = vector.shape_cast %357 : vector<8xf32> to vector<8x1xf32>
    %359 = vector.broadcast %358 : vector<8x1xf32> to vector<8x8xf32>
    %360 = arith.divf %356, %359 : vector<8x8xf32>
    %cst_158 = arith.constant dense<0.000000e+00> : vector<8x8xf32>
    %361 = tpu.matmul %360, %348, %cst_158 {dimension_numbers = #tpu.dot_dimension_numbers<[1], [0], [0], [1], [0, 0, 1, 1], [], []>} : vector<8x8xf32>, vector<8x8xf32>, vector<8x8xf32> -> vector<8x8xf32>
    %362 = tpu.concatenate %313, %329, %345, %361 in 1 : vector<8x8xf32>, vector<8x8xf32>, vector<8x8xf32>, vector<8x8xf32> -> vector<8x32xf32>
    %363 = vector.extract_strided_slice %280 {offsets = [8, 0], sizes = [8, 32], strides = [1, 1]} : vector<16x32xf32> to vector<8x32xf32>
    %364 = vector.extract_strided_slice %287 {offsets = [8, 0], sizes = [8, 32], strides = [1, 1]} : vector<16x32xf32> to vector<8x32xf32>
    %365 = vector.extract_strided_slice %294 {offsets = [8, 0], sizes = [8, 32], strides = [1, 1]} : vector<16x32xf32> to vector<8x32xf32>
    %366 = vector.extract_strided_slice %363 {offsets = [0, 0], sizes = [8, 8], strides = [1, 1]} : vector<8x32xf32> to vector<8x8xf32>
    %367 = vector.extract_strided_slice %364 {offsets = [0, 0], sizes = [8, 8], strides = [1, 1]} : vector<8x32xf32> to vector<8x8xf32>
    %368 = vector.extract_strided_slice %365 {offsets = [0, 0], sizes = [8, 8], strides = [1, 1]} : vector<8x32xf32> to vector<8x8xf32>
    %cst_159 = arith.constant dense<0.000000e+00> : vector<8x8xf32>
    %369 = tpu.matmul %366, %367, %cst_159 {dimension_numbers = #tpu.dot_dimension_numbers<[1], [1], [0], [0], [0, 0, 1, 0], [], []>} : vector<8x8xf32>, vector<8x8xf32>, vector<8x8xf32> -> vector<8x8xf32>
    %cst_160 = arith.constant -1.000000e+09 : f32
    %370 = vector.broadcast %cst_160 : f32 to vector<8x8xf32>
    %371 = arith.select %2, %369, %370 : vector<8x8xi1>, vector<8x8xf32>
    %cst_161 = arith.constant dense<0xFF800000> : vector<8xf32>
    %372 = vector.multi_reduction <maximumf>, %371, %cst_161 [1] : vector<8x8xf32> to vector<8xf32>
    %373 = vector.shape_cast %372 : vector<8xf32> to vector<8x1xf32>
    %374 = vector.broadcast %373 : vector<8x1xf32> to vector<8x8xf32>
    %375 = arith.subf %371, %374 : vector<8x8xf32>
    %376 = math.exp %375 : vector<8x8xf32>
    %cst_162 = arith.constant dense<0.000000e+00> : vector<8xf32>
    %377 = vector.multi_reduction <add>, %376, %cst_162 [1] : vector<8x8xf32> to vector<8xf32>
    %378 = vector.shape_cast %377 : vector<8xf32> to vector<8x1xf32>
    %379 = vector.broadcast %378 : vector<8x1xf32> to vector<8x8xf32>
    %380 = arith.divf %376, %379 : vector<8x8xf32>
    %cst_163 = arith.constant dense<0.000000e+00> : vector<8x8xf32>
    %381 = tpu.matmul %380, %368, %cst_163 {dimension_numbers = #tpu.dot_dimension_numbers<[1], [0], [0], [1], [0, 0, 1, 1], [], []>} : vector<8x8xf32>, vector<8x8xf32>, vector<8x8xf32> -> vector<8x8xf32>
    %382 = vector.extract_strided_slice %363 {offsets = [0, 8], sizes = [8, 8], strides = [1, 1]} : vector<8x32xf32> to vector<8x8xf32>
    %383 = vector.extract_strided_slice %364 {offsets = [0, 8], sizes = [8, 8], strides = [1, 1]} : vector<8x32xf32> to vector<8x8xf32>
    %384 = vector.extract_strided_slice %365 {offsets = [0, 8], sizes = [8, 8], strides = [1, 1]} : vector<8x32xf32> to vector<8x8xf32>
    %cst_164 = arith.constant dense<0.000000e+00> : vector<8x8xf32>
    %385 = tpu.matmul %382, %383, %cst_164 {dimension_numbers = #tpu.dot_dimension_numbers<[1], [1], [0], [0], [0, 0, 1, 0], [], []>} : vector<8x8xf32>, vector<8x8xf32>, vector<8x8xf32> -> vector<8x8xf32>
    %cst_165 = arith.constant -1.000000e+09 : f32
    %386 = vector.broadcast %cst_165 : f32 to vector<8x8xf32>
    %387 = arith.select %2, %385, %386 : vector<8x8xi1>, vector<8x8xf32>
    %cst_166 = arith.constant dense<0xFF800000> : vector<8xf32>
    %388 = vector.multi_reduction <maximumf>, %387, %cst_166 [1] : vector<8x8xf32> to vector<8xf32>
    %389 = vector.shape_cast %388 : vector<8xf32> to vector<8x1xf32>
    %390 = vector.broadcast %389 : vector<8x1xf32> to vector<8x8xf32>
    %391 = arith.subf %387, %390 : vector<8x8xf32>
    %392 = math.exp %391 : vector<8x8xf32>
    %cst_167 = arith.constant dense<0.000000e+00> : vector<8xf32>
    %393 = vector.multi_reduction <add>, %392, %cst_167 [1] : vector<8x8xf32> to vector<8xf32>
    %394 = vector.shape_cast %393 : vector<8xf32> to vector<8x1xf32>
    %395 = vector.broadcast %394 : vector<8x1xf32> to vector<8x8xf32>
    %396 = arith.divf %392, %395 : vector<8x8xf32>
    %cst_168 = arith.constant dense<0.000000e+00> : vector<8x8xf32>
    %397 = tpu.matmul %396, %384, %cst_168 {dimension_numbers = #tpu.dot_dimension_numbers<[1], [0], [0], [1], [0, 0, 1, 1], [], []>} : vector<8x8xf32>, vector<8x8xf32>, vector<8x8xf32> -> vector<8x8xf32>
    %398 = vector.extract_strided_slice %363 {offsets = [0, 16], sizes = [8, 8], strides = [1, 1]} : vector<8x32xf32> to vector<8x8xf32>
    %399 = vector.extract_strided_slice %364 {offsets = [0, 16], sizes = [8, 8], strides = [1, 1]} : vector<8x32xf32> to vector<8x8xf32>
    %400 = vector.extract_strided_slice %365 {offsets = [0, 16], sizes = [8, 8], strides = [1, 1]} : vector<8x32xf32> to vector<8x8xf32>
    %cst_169 = arith.constant dense<0.000000e+00> : vector<8x8xf32>
    %401 = tpu.matmul %398, %399, %cst_169 {dimension_numbers = #tpu.dot_dimension_numbers<[1], [1], [0], [0], [0, 0, 1, 0], [], []>} : vector<8x8xf32>, vector<8x8xf32>, vector<8x8xf32> -> vector<8x8xf32>
    %cst_170 = arith.constant -1.000000e+09 : f32
    %402 = vector.broadcast %cst_170 : f32 to vector<8x8xf32>
    %403 = arith.select %2, %401, %402 : vector<8x8xi1>, vector<8x8xf32>
    %cst_171 = arith.constant dense<0xFF800000> : vector<8xf32>
    %404 = vector.multi_reduction <maximumf>, %403, %cst_171 [1] : vector<8x8xf32> to vector<8xf32>
    %405 = vector.shape_cast %404 : vector<8xf32> to vector<8x1xf32>
    %406 = vector.broadcast %405 : vector<8x1xf32> to vector<8x8xf32>
    %407 = arith.subf %403, %406 : vector<8x8xf32>
    %408 = math.exp %407 : vector<8x8xf32>
    %cst_172 = arith.constant dense<0.000000e+00> : vector<8xf32>
    %409 = vector.multi_reduction <add>, %408, %cst_172 [1] : vector<8x8xf32> to vector<8xf32>
    %410 = vector.shape_cast %409 : vector<8xf32> to vector<8x1xf32>
    %411 = vector.broadcast %410 : vector<8x1xf32> to vector<8x8xf32>
    %412 = arith.divf %408, %411 : vector<8x8xf32>
    %cst_173 = arith.constant dense<0.000000e+00> : vector<8x8xf32>
    %413 = tpu.matmul %412, %400, %cst_173 {dimension_numbers = #tpu.dot_dimension_numbers<[1], [0], [0], [1], [0, 0, 1, 1], [], []>} : vector<8x8xf32>, vector<8x8xf32>, vector<8x8xf32> -> vector<8x8xf32>
    %414 = vector.extract_strided_slice %363 {offsets = [0, 24], sizes = [8, 8], strides = [1, 1]} : vector<8x32xf32> to vector<8x8xf32>
    %415 = vector.extract_strided_slice %364 {offsets = [0, 24], sizes = [8, 8], strides = [1, 1]} : vector<8x32xf32> to vector<8x8xf32>
    %416 = vector.extract_strided_slice %365 {offsets = [0, 24], sizes = [8, 8], strides = [1, 1]} : vector<8x32xf32> to vector<8x8xf32>
    %cst_174 = arith.constant dense<0.000000e+00> : vector<8x8xf32>
    %417 = tpu.matmul %414, %415, %cst_174 {dimension_numbers = #tpu.dot_dimension_numbers<[1], [1], [0], [0], [0, 0, 1, 0], [], []>} : vector<8x8xf32>, vector<8x8xf32>, vector<8x8xf32> -> vector<8x8xf32>
    %cst_175 = arith.constant -1.000000e+09 : f32
    %418 = vector.broadcast %cst_175 : f32 to vector<8x8xf32>
    %419 = arith.select %2, %417, %418 : vector<8x8xi1>, vector<8x8xf32>
    %cst_176 = arith.constant dense<0xFF800000> : vector<8xf32>
    %420 = vector.multi_reduction <maximumf>, %419, %cst_176 [1] : vector<8x8xf32> to vector<8xf32>
    %421 = vector.shape_cast %420 : vector<8xf32> to vector<8x1xf32>
    %422 = vector.broadcast %421 : vector<8x1xf32> to vector<8x8xf32>
    %423 = arith.subf %419, %422 : vector<8x8xf32>
    %424 = math.exp %423 : vector<8x8xf32>
    %cst_177 = arith.constant dense<0.000000e+00> : vector<8xf32>
    %425 = vector.multi_reduction <add>, %424, %cst_177 [1] : vector<8x8xf32> to vector<8xf32>
    %426 = vector.shape_cast %425 : vector<8xf32> to vector<8x1xf32>
    %427 = vector.broadcast %426 : vector<8x1xf32> to vector<8x8xf32>
    %428 = arith.divf %424, %427 : vector<8x8xf32>
    %cst_178 = arith.constant dense<0.000000e+00> : vector<8x8xf32>
    %429 = tpu.matmul %428, %416, %cst_178 {dimension_numbers = #tpu.dot_dimension_numbers<[1], [0], [0], [1], [0, 0, 1, 1], [], []>} : vector<8x8xf32>, vector<8x8xf32>, vector<8x8xf32> -> vector<8x8xf32>
    %430 = tpu.concatenate %381, %397, %413, %429 in 1 : vector<8x8xf32>, vector<8x8xf32>, vector<8x8xf32>, vector<8x8xf32> -> vector<8x32xf32>
    %431 = tpu.concatenate %362, %430 in 0 : vector<8x32xf32>, vector<8x32xf32> -> vector<16x32xf32>
    %c1_179 = arith.constant 1 : index
    %c0_180 = arith.constant 0 : index
    %c0_181 = arith.constant 0 : index
    %432 = vector.load %arg10[%c1_179, %c0_180, %c0_181] : memref<2x32x32xbf16, #tpu.memory_space<vmem>>, vector<1x32x32xbf16>
    %433 = vector.shape_cast %432 : vector<1x32x32xbf16> to vector<32x32xbf16>
    %434 = arith.truncf %431 : vector<16x32xf32> to vector<16x32xbf16>
    %cst_182 = arith.constant dense<0.000000e+00> : vector<16x32xf32>
    %435 = tpu.matmul %434, %433, %cst_182 {dimension_numbers = #tpu.dot_dimension_numbers<[1], [0], [0], [1], [0, 0, 1, 1], [], []>} : vector<16x32xbf16>, vector<32x32xbf16>, vector<16x32xf32> -> vector<16x32xf32>
    %436 = arith.addf %246, %435 : vector<16x32xf32>
    %c1_183 = arith.constant 1 : index
    %c0_184 = arith.constant 0 : index
    %c0_185 = arith.constant 0 : index
    %437 = vector.load %arg11[%c1_183, %c0_184, %c0_185] : memref<2x1x32xf32, #tpu.memory_space<vmem>>, vector<1x1x32xf32>
    %438 = vector.shape_cast %437 : vector<1x1x32xf32> to vector<1x32xf32>
    %439 = vector.broadcast %438 : vector<1x32xf32> to vector<16x32xf32>
    %440 = arith.addf %436, %439 : vector<16x32xf32>
    %c1_186 = arith.constant 1 : index
    %c0_187 = arith.constant 0 : index
    %c0_188 = arith.constant 0 : index
    %441 = vector.load %arg12[%c1_186, %c0_187, %c0_188] : memref<2x1x32xf32, #tpu.memory_space<vmem>>, vector<1x1x32xf32>
    %442 = vector.shape_cast %441 : vector<1x1x32xf32> to vector<1x32xf32>
    %c1_189 = arith.constant 1 : index
    %c0_190 = arith.constant 0 : index
    %c0_191 = arith.constant 0 : index
    %443 = vector.load %arg13[%c1_189, %c0_190, %c0_191] : memref<2x1x32xf32, #tpu.memory_space<vmem>>, vector<1x1x32xf32>
    %444 = vector.shape_cast %443 : vector<1x1x32xf32> to vector<1x32xf32>
    %cst_192 = arith.constant dense<0.000000e+00> : vector<16xf32>
    %445 = vector.multi_reduction <add>, %440, %cst_192 [1] : vector<16x32xf32> to vector<16xf32>
    %446 = vector.shape_cast %445 : vector<16xf32> to vector<16x1xf32>
    %cst_193 = arith.constant 3.200000e+01 : f32
    %447 = vector.broadcast %cst_193 : f32 to vector<16x1xf32>
    %448 = arith.divf %446, %447 : vector<16x1xf32>
    %449 = vector.broadcast %448 : vector<16x1xf32> to vector<16x32xf32>
    %450 = arith.subf %440, %449 : vector<16x32xf32>
    %451 = arith.mulf %450, %450 : vector<16x32xf32>
    %cst_194 = arith.constant dense<0.000000e+00> : vector<16xf32>
    %452 = vector.multi_reduction <add>, %451, %cst_194 [1] : vector<16x32xf32> to vector<16xf32>
    %453 = vector.shape_cast %452 : vector<16xf32> to vector<16x1xf32>
    %cst_195 = arith.constant 3.200000e+01 : f32
    %454 = vector.broadcast %cst_195 : f32 to vector<16x1xf32>
    %455 = arith.divf %453, %454 : vector<16x1xf32>
    %cst_196 = arith.constant 9.99999974E-6 : f32
    %456 = vector.broadcast %cst_196 : f32 to vector<16x1xf32>
    %457 = arith.addf %455, %456 : vector<16x1xf32>
    %458 = math.rsqrt %457 : vector<16x1xf32>
    %459 = vector.broadcast %458 : vector<16x1xf32> to vector<16x32xf32>
    %460 = arith.mulf %450, %459 : vector<16x32xf32>
    %461 = vector.broadcast %442 : vector<1x32xf32> to vector<16x32xf32>
    %462 = arith.mulf %460, %461 : vector<16x32xf32>
    %463 = vector.broadcast %444 : vector<1x32xf32> to vector<16x32xf32>
    %464 = arith.addf %462, %463 : vector<16x32xf32>
    %c1_197 = arith.constant 1 : index
    %c0_198 = arith.constant 0 : index
    %c0_199 = arith.constant 0 : index
    %465 = vector.load %arg14[%c1_197, %c0_198, %c0_199] : memref<2x32x128xbf16, #tpu.memory_space<vmem>>, vector<1x32x128xbf16>
    %466 = vector.shape_cast %465 : vector<1x32x128xbf16> to vector<32x128xbf16>
    %467 = arith.truncf %464 : vector<16x32xf32> to vector<16x32xbf16>
    %cst_200 = arith.constant dense<0.000000e+00> : vector<16x128xf32>
    %468 = tpu.matmul %467, %466, %cst_200 {dimension_numbers = #tpu.dot_dimension_numbers<[1], [0], [0], [1], [0, 0, 1, 1], [], []>} : vector<16x32xbf16>, vector<32x128xbf16>, vector<16x128xf32> -> vector<16x128xf32>
    %c1_201 = arith.constant 1 : index
    %c0_202 = arith.constant 0 : index
    %c0_203 = arith.constant 0 : index
    %469 = vector.load %arg15[%c1_201, %c0_202, %c0_203] : memref<2x1x128xf32, #tpu.memory_space<vmem>>, vector<1x1x128xf32>
    %470 = vector.shape_cast %469 : vector<1x1x128xf32> to vector<1x128xf32>
    %471 = vector.broadcast %470 : vector<1x128xf32> to vector<16x128xf32>
    %472 = arith.addf %468, %471 : vector<16x128xf32>
    %cst_204 = arith.constant 1.702000e+00 : f32
    %473 = vector.broadcast %cst_204 : f32 to vector<16x128xf32>
    %474 = arith.mulf %473, %472 : vector<16x128xf32>
    %475 = arith.negf %474 : vector<16x128xf32>
    %476 = math.exp %475 : vector<16x128xf32>
    %cst_205 = arith.constant 1.000000e+00 : f32
    %477 = vector.broadcast %cst_205 : f32 to vector<16x128xf32>
    %478 = arith.addf %477, %476 : vector<16x128xf32>
    %479 = arith.divf %477, %478 : vector<16x128xf32>
    %480 = arith.mulf %472, %479 : vector<16x128xf32>
    %c1_206 = arith.constant 1 : index
    %c0_207 = arith.constant 0 : index
    %c0_208 = arith.constant 0 : index
    %481 = vector.load %arg16[%c1_206, %c0_207, %c0_208] : memref<2x128x32xbf16, #tpu.memory_space<vmem>>, vector<1x128x32xbf16>
    %482 = vector.shape_cast %481 : vector<1x128x32xbf16> to vector<128x32xbf16>
    %483 = arith.truncf %480 : vector<16x128xf32> to vector<16x128xbf16>
    %cst_209 = arith.constant dense<0.000000e+00> : vector<16x32xf32>
    %484 = tpu.matmul %483, %482, %cst_209 {dimension_numbers = #tpu.dot_dimension_numbers<[1], [0], [0], [1], [0, 0, 1, 1], [], []>} : vector<16x128xbf16>, vector<128x32xbf16>, vector<16x32xf32> -> vector<16x32xf32>
    %485 = arith.addf %440, %484 : vector<16x32xf32>
    %c1_210 = arith.constant 1 : index
    %c0_211 = arith.constant 0 : index
    %c0_212 = arith.constant 0 : index
    %486 = vector.load %arg17[%c1_210, %c0_211, %c0_212] : memref<2x1x32xf32, #tpu.memory_space<vmem>>, vector<1x1x32xf32>
    %487 = vector.shape_cast %486 : vector<1x1x32xf32> to vector<1x32xf32>
    %488 = vector.broadcast %487 : vector<1x32xf32> to vector<16x32xf32>
    %489 = arith.addf %485, %488 : vector<16x32xf32>
    %c0_213 = arith.constant 0 : index
    %c0_214 = arith.constant 0 : index
    %490 = vector.load %arg18[%c0_213, %c0_214] : memref<1x32xf32, #tpu.memory_space<vmem>>, vector<1x32xf32>
    %c0_215 = arith.constant 0 : index
    %c0_216 = arith.constant 0 : index
    %491 = vector.load %arg19[%c0_215, %c0_216] : memref<1x32xf32, #tpu.memory_space<vmem>>, vector<1x32xf32>
    %cst_217 = arith.constant dense<0.000000e+00> : vector<16xf32>
    %492 = vector.multi_reduction <add>, %489, %cst_217 [1] : vector<16x32xf32> to vector<16xf32>
    %493 = vector.shape_cast %492 : vector<16xf32> to vector<16x1xf32>
    %cst_218 = arith.constant 3.200000e+01 : f32
    %494 = vector.broadcast %cst_218 : f32 to vector<16x1xf32>
    %495 = arith.divf %493, %494 : vector<16x1xf32>
    %496 = vector.broadcast %495 : vector<16x1xf32> to vector<16x32xf32>
    %497 = arith.subf %489, %496 : vector<16x32xf32>
    %498 = arith.mulf %497, %497 : vector<16x32xf32>
    %cst_219 = arith.constant dense<0.000000e+00> : vector<16xf32>
    %499 = vector.multi_reduction <add>, %498, %cst_219 [1] : vector<16x32xf32> to vector<16xf32>
    %500 = vector.shape_cast %499 : vector<16xf32> to vector<16x1xf32>
    %cst_220 = arith.constant 3.200000e+01 : f32
    %501 = vector.broadcast %cst_220 : f32 to vector<16x1xf32>
    %502 = arith.divf %500, %501 : vector<16x1xf32>
    %cst_221 = arith.constant 9.99999974E-6 : f32
    %503 = vector.broadcast %cst_221 : f32 to vector<16x1xf32>
    %504 = arith.addf %502, %503 : vector<16x1xf32>
    %505 = math.rsqrt %504 : vector<16x1xf32>
    %506 = vector.broadcast %505 : vector<16x1xf32> to vector<16x32xf32>
    %507 = arith.mulf %497, %506 : vector<16x32xf32>
    %508 = vector.broadcast %490 : vector<1x32xf32> to vector<16x32xf32>
    %509 = arith.mulf %507, %508 : vector<16x32xf32>
    %510 = vector.broadcast %491 : vector<1x32xf32> to vector<16x32xf32>
    %511 = arith.addf %509, %510 : vector<16x32xf32>
    %c0_222 = arith.constant 0 : index
    %c0_223 = arith.constant 0 : index
    %512 = vector.load %arg1[%c0_222, %c0_223] : memref<2x16xf32, #tpu.memory_space<vmem>>, vector<2x16xf32>
    %cst_224 = arith.constant dense<0.000000e+00> : vector<2x32xf32>
    %513 = tpu.matmul %512, %511, %cst_224 {dimension_numbers = #tpu.dot_dimension_numbers<[1], [0], [0], [1], [0, 0, 1, 1], [], []>} : vector<2x16xf32>, vector<16x32xf32>, vector<2x32xf32> -> vector<2x32xf32>
    %c0_225 = arith.constant 0 : index
    %c0_226 = arith.constant 0 : index
    %514 = vector.load %arg20[%c0_225, %c0_226] : memref<32x32xbf16, #tpu.memory_space<vmem>>, vector<32x32xbf16>
    %515 = arith.truncf %513 : vector<2x32xf32> to vector<2x32xbf16>
    %cst_227 = arith.constant dense<0.000000e+00> : vector<2x32xf32>
    %516 = tpu.matmul %515, %514, %cst_227 {dimension_numbers = #tpu.dot_dimension_numbers<[1], [0], [0], [1], [0, 0, 1, 1], [], []>} : vector<2x32xbf16>, vector<32x32xbf16>, vector<2x32xf32> -> vector<2x32xf32>
    %517 = arith.mulf %516, %516 : vector<2x32xf32>
    %cst_228 = arith.constant dense<0.000000e+00> : vector<2xf32>
    %518 = vector.multi_reduction <add>, %517, %cst_228 [1] : vector<2x32xf32> to vector<2xf32>
    %519 = vector.shape_cast %518 : vector<2xf32> to vector<2x1xf32>
    %cst_229 = arith.constant 9.99999996E-13 : f32
    %520 = vector.broadcast %cst_229 : f32 to vector<2x1xf32>
    %521 = arith.maximumf %519, %520 : vector<2x1xf32>
    %522 = math.rsqrt %521 : vector<2x1xf32>
    %523 = vector.broadcast %522 : vector<2x1xf32> to vector<2x32xf32>
    %524 = arith.mulf %516, %523 : vector<2x32xf32>
    %c0_230 = arith.constant 0 : index
    %c0_231 = arith.constant 0 : index
    %525 = vector.load %arg21[%c0_230, %c0_231] : memref<2x32xf32, #tpu.memory_space<vmem>>, vector<2x32xf32>
    tpu.vector_store %arg21[%c0_230, %c0_231], %524 {strides = array<i32>} : memref<2x32xf32, #tpu.memory_space<vmem>>, vector<2x32xf32>,
    return
  }
}

</mosaic_0001>

<bundles_post_ra>
// kernel: frozen_clip_text_embedder.1
= control target key start
LH: loop header
LB: loop body
LE: loop exit
PB: predicated region body
PF: predicated region fallthrough
CT: control target
= control target key end

     0   :  { %s3660_s0 = inlined_call_operand.vmem [shape: f32[16,32], index: 0, kind: input, shape index: {}]   ;;  %s3661_s1 = inlined_call_operand.vmem [shape: f32[2,16], index: 1, kind: input, shape index: {}]   ;;  %s3662_s2 = inlined_call_operand.vmem [shape: f32[2,1,32], index: 2, kind: input, shape index: {}]   ;;  %s3663_s3 = inlined_call_operand.vmem [shape: f32[2,1,32], index: 3, kind: input, shape index: {}]   ;;  %s3664_s4 = inlined_call_operand.vmem [shape: bf16[2,32,32], index: 4, kind: input, shape index: {}]   ;;  %s3665_s5 = inlined_call_operand.vmem [shape: bf16[2,32,32], index: 5, kind: input, shape index: {}]   ;;  %s3666_s6 = inlined_call_operand.vmem [shape: bf16[2,32,32], index: 6, kind: input, shape index: {}]   ;;  %s3667_s7 = inlined_call_operand.vmem [shape: f32[2,1,32], index: 7, kind: input, shape index: {}]   ;;  %s3668_s8 = inlined_call_operand.vmem [shape: f32[2,1,32], index: 8, kind: input, shape index: {}]   ;;  %s3669_s9 = inlined_call_operand.vmem [shape: f32[2,1,32], index: 9, kind: input, shape index: {}]   ;;  %s3670_s10 = inlined_call_operand.vmem [shape: bf16[2,32,32], index: 10, kind: input, shape index: {}]   ;;  %s3671_s11 = inlined_call_operand.vmem [shape: f32[2,1,32], index: 11, kind: input, shape index: {}]   ;;  %s3672_s12 = inlined_call_operand.vmem [shape: f32[2,1,32], index: 12, kind: input, shape index: {}]   ;;  %s3673_s13 = inlined_call_operand.vmem [shape: f32[2,1,32], index: 13, kind: input, shape index: {}]   ;;  %s3674_s14 = inlined_call_operand.vmem [shape: bf16[2,32,128], index: 14, kind: input, shape index: {}]   ;;  %s3675_s15 = inlined_call_operand.vmem [shape: f32[2,1,128], index: 15, kind: input, shape index: {}]   ;;  %s3676_s16 = inlined_call_operand.vmem [shape: bf16[2,128,32], index: 16, kind: input, shape index: {}]   ;;  %s3677_s17 = inlined_call_operand.vmem [shape: f32[2,1,32], index: 17, kind: input, shape index: {}]   ;;  %s3678_s18 = inlined_call_operand.vmem [shape: f32[1,32], index: 18, kind: input, shape index: {}]   ;;  %s3679_s19 = inlined_call_operand.vmem [shape: f32[1,32], index: 19, kind: input, shape index: {}]   ;;  %s3680_s20 = inlined_call_operand.vmem [shape: bf16[32,32], index: 20, kind: input, shape index: {}]   ;;  %s3681_s21 = inlined_call_operand.hbm [shape: f32[2,32], index: 21, kind: output, shape index: {}]  }
   0x1   :  { %3694 = sst [smem:[#allocation5_spill]] %s3660_s0 }
   0x2   :  { %3695 = sst [smem:[#allocation6_spill]] %s3661_s1 }
   0x3   :  { %3696 = sst [smem:[#allocation7_spill]] %s3662_s2 }
   0x4   :  { %3697 = sst [smem:[#allocation8_spill]] %s3663_s3 }
   0x5   :  { %3698 = sst [smem:[#allocation9_spill]] %s3664_s4 }
   0x6   :  { %3699 = sst [smem:[#allocation10_spill]] %s3665_s5 }
   0x7   :  { %s3700_s26 = sld [smem:[#allocation5_spill]]  ;;  %vm79_vm0 = vcmask 261120  }
   0xd   :  { %v3028_v0 = vld [vmem:[%s3700_s26] sm:$0xff]  ;;  %v3033_v1 = vld [vmem:[%s3700_s26 + $0x8] sm:$0xff] }
   0xe   :  { %v80_v2 = vsel %vm79_vm0, %v3028_v0, 0.0  ;;  %v83_v3 = vsel %vm79_vm0, %v3033_v1, 0.0 }
   0xf   :  { %81 = vadd.xlane.f32.xlu0 %v80_v2 }
  0x10   :  { %26 = vsyncpa [#allocation3], 0  ;;  %v2907_v4 = vmov 32.0   ;;  %s3701_s0 = sld [smem:[#allocation9_spill]]  ;;  %v2684_v28 = vld [vmem:[%s3666_s6 + $0x8] sm:$0xff]  ;;  %v2683_v31 = vld [vmem:[%s3666_s6] sm:$0xff] }
  0x11   :  { %2777 = vrcp.f32 %v2907_v4  ;;  %s3702_s5 = sld [smem:[#allocation10_spill]]  ;;  %v2757_v56 = vld [vmem:[%s3667_s7] ss:$0 sm:$0xff]  ;;  %vm249_vm8 = vcmask 64512   ;;  %s2908_s25 = smov 104  }
  0x12   :  { %s3703_s29 = sld [smem:[#allocation7_spill]]  ;;  %v2758_v57 = vld [vmem:[%s3668_s8] ss:$0 sm:$0xff]  ;;  %s3692_s26 = smov 120  }
  0x13   :  { %s3704_s22 = sld [smem:[#allocation8_spill]]  ;;  %v3090_v2 = vld [vmem:[%s3669_s9] ss:$0 sm:$0xff]  ;;  %s3690_s28 = smov 112  }
  0x14   :  { %s3689_s4 = smov 8   ;;  %s3687_s30 = smov 24  }
  0x15   :  { %s3688_s23 = smov 16  }
  0x16   :  { %v2680_v21 = vld [vmem:[%s3701_s0 + $0x8] sm:$0xff]  ;;  %v2679_v24 = vld [vmem:[%s3701_s0] sm:$0xff] }
  0x17   :  { %84 = vadd.xlane.f32.xlu0 %v83_v3  ;;  %v2778_v5 = vpop.eup %2777  ;;  %v2682_v22 = vld [vmem:[%s3702_s5 + $0x8] sm:$0xff]  ;;  %171 = vmatpush.bf16.msra.mxu0 %v2680_v21  ;;  %v2681_v25 = vld [vmem:[%s3702_s5] sm:$0xff] }
  0x18   :  { %v87_v6 = vmul.f32 32.0, %v2778_v5  ;;  %vm91_vm1 = vweird.f32 %v2778_v5  ;;  %207 = vmatpush.bf16.msra.mxu1 %v2682_v22  ;;  %v2755_v46 = vld [vmem:[%s3703_s29] ss:$0 sm:$0xff] }
  0x19   :  { %v2756_v51 = vld [vmem:[%s3704_s22] ss:$0 sm:$0xff] }
  0x1a   :  { %v88_v7 = vsub.f32 1.0, %v87_v6 }
  0x1b   :  { %172 = vmatpush.bf16.msra.mxu0 %v2679_v24 }
  0x1c   :  { %v89_v8 = vmul.f32 %v2778_v5, %v88_v7  ;;  %208 = vmatpush.bf16.msra.mxu1 %v2681_v25 }
  0x1e   :  { %v90_v9 = vadd.f32 %v2778_v5, %v89_v8 }
  0x1f   :  { %241 = vmatpush.bf16.msrb.mxu0 %v2684_v28 }
  0x20   :  { %v3039_v10 = vsel %vm91_vm1, %v2778_v5, %v90_v9 }
  0x23   :  { %242 = vmatpush.bf16.msrb.mxu0 %v2683_v31 }
  0x82   :  { %v82_v11 = vpop.xlane.xlu0 %81 }
  0x83   :  { %v93_v12 = vmul.f32 %v3039_v10, %v82_v11 }
  0x85   :  { %v95_v13 = vsub.f32 %v3028_v0, %v93_v12 }
  0x87   :  { %v97_v14 = vmul.f32 %v95_v13, %v95_v13 }
  0x89   :  { %v99_v15 = vsel %vm79_vm0, %v97_v14, 0.0 }
  0x8a   :  { %100 = vadd.xlane.f32.xlu1 %v99_v15  ;;  %v85_v16 = vpop.xlane.xlu0 %84 }
  0x8b   :  { %v94_v17 = vmul.f32 %v3039_v10, %v85_v16 }
  0x8d   :  { %v96_v18 = vsub.f32 %v3033_v1, %v94_v17  ;;  %v70_v17 = vlaneseq }
  0x8f   :  { %v98_v19 = vmul.f32 %v96_v18, %v96_v18 }
  0x91   :  { %v102_v20 = vsel %vm79_vm0, %v98_v19, 0.0  ;;  %v71_v19 = vshrl.u32 %v70_v17, 7 }
  0x92   :  { %103 = vadd.xlane.f32.xlu1 %v102_v20  ;;  %v73_v20 = vand.u32 127, %v70_v17 }
  0x94   :  { %vm3115_vm9 = vcmp.le.s32.totalorder %v73_v20, %v71_v19 }
  0xfd   :  { %v101_v23 = vpop.xlane.xlu1 %100 }
  0xfe   :  { %v105_v26 = vmul.f32 %v101_v23, %v3039_v10 }
 0x100   :  { %v107_v27 = vadd.f32 1e-05, %v105_v26 }
 0x102   :  { %2779 = vrsqrt.f32 %v107_v27  ;;  %vm115_vm3 = vweird.f32 %v107_v27 }
 0x105   :  { %v104_v29 = vpop.xlane.xlu1 %103 }
 0x106   :  { %v106_v30 = vmul.f32 %v104_v29, %v3039_v10 }
 0x108   :  { %v2780_v32 = vpop.eup %2779  ;;  %v108_v33 = vadd.f32 1e-05, %v106_v30 }
 0x109   :  { %v110_v34 = vmul.f32 %v2780_v32, %v107_v27  ;;  %vm116_vm2 = vweird.f32 %v2780_v32 }
 0x10a   :  { %2781 = vrsqrt.f32 %v108_v33  ;;  %vm117_vm4 = vmor %vm115_vm3, %vm116_vm2  ;;  %vm125_vm6 = vweird.f32 %v108_v33 }
 0x10b   :  { %v111_v35 = vmul.f32 %v2780_v32, %v110_v34 }
 0x10d   :  { %v112_v36 = vmul.f32 0.5, %v111_v35 }
 0x10f   :  { %v113_v37 = vsub.f32 1.5, %v112_v36 }
 0x110   :  { %v2782_v38 = vpop.eup %2781 }
 0x111   :  { %v114_v39 = vmul.f32 %v2780_v32, %v113_v37  ;;  %v120_v40 = vmul.f32 %v2782_v38, %v108_v33  ;;  %vm126_vm5 = vweird.f32 %v2782_v38 }
 0x112   :  { %vm127_vm7 = vmor %vm125_vm6, %vm126_vm5 }
 0x113   :  { %v121_v41 = vmul.f32 %v2782_v38, %v120_v40  ;;  %v118_v42 = vsel %vm117_vm4, %v2780_v32, %v114_v39 }
 0x114   :  { %v129_v45 = vmul.f32 %v118_v42, %v95_v13 }
 0x115   :  { %v122_v43 = vmul.f32 0.5, %v121_v41 }
 0x116   :  { %v134_v50 = vmul.f32 %v2755_v46, %v129_v45 }
 0x117   :  { %v123_v44 = vsub.f32 1.5, %v122_v43 }
 0x118   :  { %v139_v53 = vadd.f32 %v2756_v51, %v134_v50 }
 0x119   :  { %v124_v47 = vmul.f32 %v2782_v38, %v123_v44 }
 0x11b   :  { %v128_v48 = vsel %vm127_vm7, %v2782_v38, %v124_v47 }
 0x11c   :  { %v130_v49 = vmul.f32 %v128_v48, %v96_v18 }
 0x11e   :  { %v135_v52 = vmul.f32 %v2755_v46, %v130_v49 }
 0x120   :  { %v140_v54 = vadd.f32 %v2756_v51, %v135_v52 }
 0x122   :  { %v141_v55 = vpack.c.bf16 %v140_v54, %v139_v53 }
 0x124   :  { %2425 = vmatmul.msk.bf16.vlgmr.msra.gmra.mxu0 %vm79_vm0, %v141_v55  ;;  %2434 = vmatmul.msk.bf16.vlgmr.msra.gmra.mxu1 %vm79_vm0, %v141_v55 }
 0x134   :  { %2443 = vmatmul.msk.bf16.vlgmr.msrb.gmra.mxu0 %vm79_vm0, %v141_v55 }
 0x1a1   :  { %v174_v58 = vpop.f32.mrf.mxu0  ;;  %v210_v59 = vpop.f32.mrf.mxu1 }
 0x1a2   :  { %v175_v60 = vadd.f32 %v2757_v56, %v174_v58  ;;  %v211_v61 = vadd.f32 %v2758_v57, %v210_v59 }
 0x1a4   :  { %v179_v62 = vmul.f32 0.35355338, %v175_v60  ;;  %485 = vrot.lane.b32.xlu1 %v211_v61, %s2908_s25  ;;  %326 = vrot.lane.b32.xlu2 %v211_v61, %s3692_s26 }
 0x1a5   :  { %2444 = vmatpush.xpose.msk.msra.mxu3 %vm249_vm8, %v211_v61 }
 0x1a8   :  { %2445 = vmatmul.msk.f32.vlgmr.msra.gmra.mxu3 %vm249_vm8, %v179_v62 }
 0x1a9   :  { %v176_v63 = vpop.f32.mrf.mxu0  ;;  %v212_v5 = vpop.f32.mrf.mxu1 }
 0x1aa   :  { %v3100_v6 = vadd.f32 %v2758_v57, %v212_v5  ;;  %v177_v7 = vadd.f32 %v2757_v56, %v176_v63 }
 0x1ac   :  { %324 = vrot.lane.b32.xlu2 %v179_v62, %s3692_s26  ;;  %v3106_v8 = vmul.f32 0.35355338, %v177_v7 }
 0x1b1   :  { %v244_v3 = vpop.f32.mrf.mxu0 }
 0x1b2   :  { %v3093_v4 = vadd.f32 %v3090_v2, %v244_v3 }
 0x1b4   :  { %319 = vmatpush.msra.mxu2 %v3093_v4  ;;  %378 = vrot.lane.b32.xlu2 %v3093_v4, %s3692_s26 }
 0x1bc   :  { %404 = vrot.lane.b32.xlu2 %v179_v62, %s3690_s28 }
 0x1c4   :  { %483 = vrot.lane.b32.xlu2 %v179_v62, %s2908_s25 }
 0x1cc   :  { %655 = vrot.lane.b32.xlu2 %v3100_v6, %s3692_s26 }
 0x1d4   :  { %735 = vrot.lane.b32.xlu2 %v3100_v6, %s3690_s28 }
 0x1dc   :  { %812 = vrot.lane.b32.xlu2 %v3106_v8, %s2908_s25 }
 0x1fe   :  { %v327_v9 = vpop.permute.xlu2 %326 }
 0x1ff   :  { %2447 = vmatpush.xpose.msk.msrb.mxu3 %vm249_vm8, %v327_v9 }
 0x206   :  { %v325_v11 = vpop.permute.xlu2 %324 }
 0x207   :  { %2448 = vmatmul.msk.f32.vlgmr.msrb.gmra.mxu3 %vm249_vm8, %v325_v11 }
 0x20e   :  { %v379_v12 = vpop.permute.xlu2 %378 }
 0x20f   :  { %399 = vmatpush.msrb.mxu1 %v379_v12 }
 0x216   :  { %v486_v13 = vpop.permute.xlu1 %485  ;;  %v405_v14 = vpop.permute.xlu2 %404 }
 0x217   :  { %2453 = vmatpush.xpose.msk.msra.mxu3 %vm249_vm8, %v486_v13 }
 0x21e   :  { %v484_v15 = vpop.permute.xlu2 %483 }
 0x21f   :  { %2454 = vmatmul.msk.f32.vlgmr.msra.gmra.mxu3 %vm249_vm8, %v484_v15 }
 0x226   :  { %v656_v16 = vpop.permute.xlu2 %655 }
 0x227   :  { %2459 = vmatpush.xpose.msk.msrb.mxu3 %vm249_vm8, %v656_v16 }
 0x22b   :  { %v273_v18 = vpop.f32.mrf.mxu3 }
 0x22c   :  { %v276_v35 = vsel %vm3115_vm9, %v273_v18, -1e+09 }
 0x22d   :  { %v277_v36 = vsel %vm249_vm8, %v276_v35, -inf }
 0x22e   :  { %v736_v47 = vpop.permute.xlu2 %735 }
 0x236   :  { %v813_v51 = vpop.permute.xlu2 %812 }
 0x28a   :  { %v349_v22 = vpop.f32.mrf.mxu3 }
 0x28b   :  { %v352_v23 = vsel %vm3115_vm9, %v349_v22, -1e+09 }
 0x28c   :  { %v353_v24 = vsel %vm249_vm8, %v352_v23, -inf }
 0x28d   :  { %354 = vmax.xlane.f32.xlu0 %v353_v24 }
 0x2a1   :  { %406 = vrot.lane.b32.xlu0 %v211_v61, %s3690_s28 }
 0x2a2   :  { %v508_v25 = vpop.f32.mrf.mxu3 }
 0x2a3   :  { %v3125_v26 = vsel %vm3115_vm9, %v508_v25, -1e+09 }
 0x2a4   :  { %v512_v27 = vsel %vm249_vm8, %v3125_v26, -inf }
 0x2a5   :  { %513 = vmax.xlane.f32.xlu2 %v512_v27 }
 0x2a9   :  { %653 = vrot.lane.b32.xlu0 %v3106_v8, %s3692_s26 }
 0x2b1   :  { %733 = vrot.lane.b32.xlu0 %v3106_v8, %s3690_s28 }
 0x300   :  { %v355_v28 = vpop.xlane.xlu0 %354 }
 0x301   :  { %v356_v29 = vsub.f32 %v352_v23, %v355_v28 }
 0x303   :  { %v357_v30 = vmul.f32 1.442695, %v356_v29 }
 0x305   :  { %2783 = vpow2.f32 %v357_v30 }
 0x30b   :  { %v2784_v31 = vpop.eup %2783 }
 0x30c   :  { %v359_v32 = vsel %vm249_vm8, %v2784_v31, 0.0 }
 0x30d   :  { %360 = vadd.xlane.f32.xlu1 %v359_v32 }
 0x313   :  { %v407_v33 = vpop.permute.xlu0 %406 }
 0x314   :  { %2450 = vmatpush.xpose.msk.msra.mxu1 %vm249_vm8, %v407_v33 }
 0x318   :  { %v514_v60 = vpop.xlane.xlu2 %513 }
 0x319   :  { %v515_v3 = vsub.f32 %v3125_v26, %v514_v60 }
 0x31b   :  { %v654_v34 = vpop.permute.xlu0 %653  ;;  %v516_v9 = vmul.f32 1.442695, %v515_v3 }
 0x31c   :  { %2460 = vmatmul.msk.f32.vlgmr.msrb.gmra.mxu3 %vm249_vm8, %v654_v34 }
 0x323   :  { %v734_v52 = vpop.permute.xlu0 %733 }
 0x326   :  { %814 = vrot.lane.b32.xlu1 %v3100_v6, %s2908_s25 }
 0x350   :  { %278 = vmax.xlane.f32.xlu1 %v277_v36 }
 0x380   :  { %v361_v37 = vpop.xlane.xlu1 %360 }
 0x381   :  { %2785 = vrcp.f32 %v361_v37  ;;  %v373_v41 = vand.u32 2147483648, %v361_v37  ;;  %v371_v43 = vand.u32 2147483647, %v361_v37  ;;  %vm367_vm11 = vweird.f32 %v361_v37 }
 0x383   :  { %v374_v45 = vor.u32 1.1754944e-38, %v373_v41  ;;  %vm372_vm13 = vcmp.eq.f32.partialorder %v371_v43, 8.507059e+37 }
 0x387   :  { %v2786_v38 = vpop.eup %2785 }
 0x388   :  { %v363_v39 = vmul.f32 %v2786_v38, %v361_v37  ;;  %vm368_vm10 = vweird.f32 %v2786_v38 }
 0x389   :  { %vm369_vm12 = vmor %vm367_vm11, %vm368_vm10 }
 0x38a   :  { %v364_v40 = vsub.f32 1.0, %v363_v39 }
 0x38c   :  { %v365_v42 = vmul.f32 %v2786_v38, %v364_v40 }
 0x38e   :  { %v366_v44 = vadd.f32 %v2786_v38, %v365_v42 }
 0x390   :  { %v370_v46 = vsel %vm369_vm12, %v2786_v38, %v366_v44 }
 0x391   :  { %v375_v48 = vsel %vm372_vm13, %v374_v45, %v370_v46 }
 0x392   :  { %v376_v49 = vmul.f32 %v2784_v31, %v375_v48 }
 0x394   :  { %2449 = vmatmul.msk.f32.vlgmr.msrb.gmra.mxu1 %vm249_vm8, %v376_v49 }
 0x395   :  { %2456 = vmatpush.xpose.msk.msrb.mxu1 %vm249_vm8, %v3100_v6 }
 0x398   :  { %v815_v50 = vpop.permute.xlu1 %814 }
 0x399   :  { %2465 = vmatpush.xpose.msk.msra.mxu3 %vm249_vm8, %v815_v50 }
 0x39c   :  { %2451 = vmatmul.msk.f32.vlgmr.msra.gmra.mxu1 %vm249_vm8, %v405_v14  ;;  %2466 = vmatmul.msk.f32.vlgmr.msra.gmra.mxu3 %vm249_vm8, %v813_v51 }
 0x39d   :  { %2462 = vmatpush.xpose.msk.msra.mxu1 %vm249_vm8, %v736_v47 }
 0x39f   :  { %v678_v59 = vpop.f32.mrf.mxu3 }
 0x3a0   :  { %v681_v62 = vsel %vm3115_vm9, %v678_v59, -1e+09 }
 0x3a1   :  { %v682_v6 = vsel %vm249_vm8, %v681_v62, -inf }
 0x3a4   :  { %2457 = vmatmul.msk.f32.vlgmr.msrb.gmra.mxu1 %vm249_vm8, %v3106_v8 }
 0x3ac   :  { %2463 = vmatmul.msk.f32.vlgmr.msra.gmra.mxu1 %vm249_vm8, %v734_v52 }
 0x3c3   :  { %v279_v54 = vpop.xlane.xlu1 %278 }
 0x3c4   :  { %v280_v57 = vsub.f32 %v276_v35, %v279_v54 }
 0x3c6   :  { %v281_v61 = vmul.f32 1.442695, %v280_v57 }
 0x3c8   :  { %2787 = vpow2.f32 %v281_v61 }
 0x3c9   :  { %2789 = vpow2.f32 %v516_v9 }
 0x3ce   :  { %v3165_v12 = vpop.eup %2787 }
 0x3cf   :  { %v283_v17 = vsel %vm249_vm8, %v3165_v12, 0.0  ;;  %v3173_v18 = vpop.eup %2789 }
 0x3d0   :  { %v518_v19 = vsel %vm249_vm8, %v3173_v18, 0.0 }
 0x411   :  { %v3151_v53 = vpop.f32.mrf.mxu1 }
 0x419   :  { %v429_v55 = vpop.f32.mrf.mxu1 }
 0x41a   :  { %v432_v56 = vsel %vm3115_vm9, %v429_v55, -1e+09 }
 0x41b   :  { %v433_v58 = vsel %vm249_vm8, %v432_v56, -inf }
 0x41c   :  { %434 = vmax.xlane.f32.xlu0 %v433_v58 }
 0x41f   :  { %v837_v8 = vpop.f32.mrf.mxu3 }
 0x420   :  { %v840_v11 = vsel %vm3115_vm9, %v837_v8, -1e+09 }
 0x421   :  { %v602_v63 = vpop.f32.mrf.mxu1  ;;  %v841_v16 = vsel %vm249_vm8, %v840_v11, -inf }
 0x422   :  { %v605_v5 = vsel %vm3115_vm9, %v602_v63, -1e+09 }
 0x423   :  { %v606_v7 = vsel %vm249_vm8, %v605_v5, -inf }
 0x424   :  { %683 = vmax.xlane.f32.xlu0 %v682_v6  ;;  %607 = vmax.xlane.f32.xlu1 %v606_v7 }
 0x429   :  { %v758_v13 = vpop.f32.mrf.mxu1 }
 0x42a   :  { %v761_v14 = vsel %vm3115_vm9, %v758_v13, -1e+09 }
 0x42b   :  { %v762_v15 = vsel %vm249_vm8, %v761_v14, -inf }
 0x42c   :  { %763 = vmax.xlane.f32.xlu2 %v762_v15  ;;  %842 = vmax.xlane.f32.xlu1 %v841_v16 }
 0x42d   :  { %284 = vadd.xlane.f32.xlu0 %v283_v17 }
 0x434   :  { %519 = vadd.xlane.f32.xlu1 %v518_v19 }
 0x441   :  { %457 = vrot.lane.b32.xlu0 %v3093_v4, %s3690_s28 }
 0x48f   :  { %v435_v20 = vpop.xlane.xlu0 %434 }
 0x490   :  { %v436_v37 = vsub.f32 %v432_v56, %v435_v20  ;;  %v246_v56 = vpop.f32.mrf.mxu0 }
 0x491   :  { %v247_v60 = vadd.f32 %v3090_v2, %v246_v56 }
 0x492   :  { %v437_v41 = vmul.f32 1.442695, %v436_v37 }
 0x497   :  { %v684_v22 = vpop.xlane.xlu0 %683  ;;  %v608_v23 = vpop.xlane.xlu1 %607 }
 0x498   :  { %v685_v24 = vsub.f32 %v681_v62, %v684_v22  ;;  %v609_v25 = vsub.f32 %v605_v5, %v608_v23 }
 0x49a   :  { %v686_v26 = vmul.f32 1.442695, %v685_v24  ;;  %v610_v27 = vmul.f32 1.442695, %v609_v25 }
 0x49c   :  { %2791 = vpow2.f32 %v686_v26 }
 0x49d   :  { %2793 = vpow2.f32 %v610_v27 }
 0x49f   :  { %v764_v28 = vpop.xlane.xlu2 %763  ;;  %v843_v29 = vpop.xlane.xlu1 %842 }
 0x4a0   :  { %v765_v30 = vsub.f32 %v761_v14, %v764_v28  ;;  %v285_v31 = vpop.xlane.xlu0 %284  ;;  %v844_v32 = vsub.f32 %v840_v11, %v843_v29 }
 0x4a1   :  { %2795 = vrcp.f32 %v285_v31  ;;  %v297_v46 = vand.u32 2147483648, %v285_v31  ;;  %v295_v50 = vand.u32 2147483647, %v285_v31  ;;  %vm291_vm15 = vweird.f32 %v285_v31 }
 0x4a2   :  { %v3179_v33 = vpop.eup %2791  ;;  %v766_v34 = vmul.f32 1.442695, %v765_v30  ;;  %v845_v35 = vmul.f32 1.442695, %v844_v32 }
 0x4a3   :  { %v3181_v36 = vpop.eup %2793  ;;  %v688_v38 = vsel %vm249_vm8, %v3179_v33, 0.0  ;;  %v298_v52 = vor.u32 1.1754944e-38, %v297_v46  ;;  %vm296_vm2 = vcmp.eq.f32.partialorder %v295_v50, 8.507059e+37 }
 0x4a4   :  { %2797 = vpow2.f32 %v766_v34  ;;  %689 = vadd.xlane.f32.xlu2 %v688_v38  ;;  %v612_v39 = vsel %vm249_vm8, %v3181_v36, 0.0 }
 0x4a5   :  { %2799 = vpow2.f32 %v845_v35  ;;  %613 = vadd.xlane.f32.xlu0 %v612_v39 }
 0x4a6   :  { %2801 = vpow2.f32 %v437_v41 }
 0x4a7   :  { %v2796_v40 = vpop.eup %2795  ;;  %v520_v62 = vpop.xlane.xlu1 %519 }
 0x4a8   :  { %v287_v42 = vmul.f32 %v2796_v40, %v285_v31  ;;  %vm292_vm14 = vweird.f32 %v2796_v40  ;;  %2803 = vrcp.f32 %v520_v62  ;;  %v532_v16 = vand.u32 2147483648, %v520_v62 }
 0x4a9   :  { %vm293_vm1 = vmor %vm291_vm15, %vm292_vm14  ;;  %vm526_vm4 = vweird.f32 %v520_v62  ;;  %v530_v20 = vand.u32 2147483647, %v520_v62 }
 0x4aa   :  { %v3187_v43 = vpop.eup %2797  ;;  %v288_v44 = vsub.f32 1.0, %v287_v42  ;;  %v533_v28 = vor.u32 1.1754944e-38, %v532_v16 }
 0x4ab   :  { %v3189_v45 = vpop.eup %2799  ;;  %v768_v47 = vsel %vm249_vm8, %v3187_v43, 0.0  ;;  %vm531_vm6 = vcmp.eq.f32.partialorder %v530_v20, 8.507059e+37 }
 0x4ac   :  { %v289_v48 = vmul.f32 %v2796_v40, %v288_v44  ;;  %769 = vadd.xlane.f32.xlu1 %v768_v47  ;;  %v847_v49 = vsel %vm249_vm8, %v3189_v45, 0.0  ;;  %v3195_v55 = vpop.eup %2801 }
 0x4ad   :  { %848 = vadd.xlane.f32.xlu2 %v847_v49  ;;  %v439_v61 = vsel %vm249_vm8, %v3195_v55, 0.0 }
 0x4ae   :  { %v290_v51 = vadd.f32 %v2796_v40, %v289_v48  ;;  %v2804_v63 = vpop.eup %2803 }
 0x4af   :  { %v522_v5 = vmul.f32 %v2804_v63, %v520_v62  ;;  %vm527_vm3 = vweird.f32 %v2804_v63 }
 0x4b0   :  { %v294_v54 = vsel %vm293_vm1, %v2796_v40, %v290_v51  ;;  %vm528_vm5 = vmor %vm526_vm4, %vm527_vm3 }
 0x4b1   :  { %v299_v57 = vsel %vm296_vm2, %v298_v52, %v294_v54  ;;  %v523_v7 = vsub.f32 1.0, %v522_v5 }
 0x4b2   :  { %v300_v58 = vmul.f32 %v3165_v12, %v299_v57 }
 0x4b3   :  { %v458_v59 = vpop.permute.xlu0 %457  ;;  %v524_v9 = vmul.f32 %v2804_v63, %v523_v7 }
 0x4b4   :  { %2446 = vmatmul.msk.f32.vlgmr.msra.gmra.mxu2 %vm249_vm8, %v300_v58 }
 0x4b5   :  { %478 = vmatpush.msrb.mxu2 %v458_v59  ;;  %440 = vadd.xlane.f32.xlu2 %v439_v61  ;;  %v525_v15 = vadd.f32 %v2804_v63, %v524_v9 }
 0x4b7   :  { %648 = vmatpush.msra.mxu2 %v247_v60  ;;  %v529_v24 = vsel %vm528_vm5, %v2804_v63, %v525_v15 }
 0x4b8   :  { %v534_v32 = vsel %vm531_vm6, %v533_v28, %v529_v24 }
 0x4b9   :  { %786 = vrot.lane.b32.xlu0 %v247_v60, %s3690_s28  ;;  %v535_v46 = vmul.f32 %v3173_v18, %v534_v32 }
 0x4c1   :  { %865 = vrot.lane.b32.xlu0 %v247_v60, %s2908_s25 }
 0x4c5   :  { %536 = vrot.lane.b32.xlu1 %v3093_v4, %s2908_s25 }
 0x4cd   :  { %707 = vrot.lane.b32.xlu2 %v247_v60, %s3692_s26 }
 0x517   :  { %v3207_v2 = vpop.xlane.xlu2 %689 }
 0x518   :  { %v3209_v3 = vpop.xlane.xlu0 %613  ;;  %2805 = vrcp.f32 %v3207_v2  ;;  %v702_v42 = vand.u32 2147483648, %v3207_v2  ;;  %vm696_vm12 = vweird.f32 %v3207_v2  ;;  %v700_v47 = vand.u32 2147483647, %v3207_v2 }
 0x519   :  { %2807 = vrcp.f32 %v3209_v3  ;;  %v626_v56 = vand.u32 2147483648, %v3209_v3  ;;  %vm620_vm2 = vweird.f32 %v3209_v3  ;;  %v624_v61 = vand.u32 2147483647, %v3209_v3 }
 0x51a   :  { %v703_v60 = vor.u32 1.1754944e-38, %v702_v42  ;;  %vm701_vm3 = vcmp.eq.f32.partialorder %v700_v47, 8.507059e+37 }
 0x51b   :  { %vm625_vm6 = vcmp.eq.f32.partialorder %v624_v61, 8.507059e+37 }
 0x51e   :  { %v3215_v8 = vpop.eup %2805 }
 0x51f   :  { %v3217_v4 = vpop.eup %2807  ;;  %v3220_v11 = vpop.xlane.xlu1 %769  ;;  %v692_v13 = vmul.f32 %v3215_v8, %v3207_v2  ;;  %vm697_vm10 = vweird.f32 %v3215_v8 }
 0x520   :  { %v3212_v6 = vpop.xlane.xlu2 %848  ;;  %v616_v14 = vmul.f32 %v3217_v4, %v3209_v3  ;;  %vm621_vm13 = vweird.f32 %v3217_v4  ;;  %vm3244_vm15 = vmor %vm696_vm12, %vm697_vm10  ;;  %v782_v15 = vand.u32 2147483648, %v3220_v11  ;;  %vm776_vm12 = vweird.f32 %v3220_v11 }
 0x521   :  { %2809 = vrcp.f32 %v3212_v6  ;;  %v693_v17 = vsub.f32 1.0, %v692_v13  ;;  %vm622_vm4 = vmor %vm620_vm2, %vm621_vm13  ;;  %vm577_vm2 = vcmask 195584  }
 0x522   :  { %v617_v23 = vsub.f32 1.0, %v616_v14 }
 0x523   :  { %v694_v29 = vmul.f32 %v3215_v8, %v693_v17  ;;  %v780_v17 = vand.u32 2147483647, %v3220_v11 }
 0x524   :  { %v618_v34 = vmul.f32 %v3217_v4, %v617_v23 }
 0x525   :  { %v695_v40 = vadd.f32 %v3215_v8, %v694_v29 }
 0x526   :  { %v619_v51 = vadd.f32 %v3217_v4, %v618_v34 }
 0x527   :  { %v3227_v19 = vpop.eup %2809  ;;  %v699_v18 = vsel %vm3244_vm15, %v3215_v8, %v695_v40  ;;  %v627_v8 = vor.u32 1.1754944e-38, %v626_v56  ;;  %vm781_vm15 = vcmp.eq.f32.partialorder %v780_v17, 8.507059e+37 }
 0x528   :  { %v441_v12 = vpop.xlane.xlu2 %440  ;;  %v851_v30 = vmul.f32 %v3227_v19, %v3212_v6  ;;  %v704_v63 = vsel %vm701_vm3, %v703_v60, %v699_v18  ;;  %v623_v5 = vsel %vm622_vm4, %v3217_v4, %v619_v51  ;;  %vm856_vm5 = vweird.f32 %v3227_v19 }
 0x529   :  { %2811 = vrcp.f32 %v441_v12  ;;  %v453_v35 = vand.u32 2147483648, %v441_v12  ;;  %v451_v39 = vand.u32 2147483647, %v441_v12  ;;  %vm447_vm11 = vweird.f32 %v441_v12 }
 0x52a   :  { %2813 = vrcp.f32 %v3220_v11  ;;  %v852_v41 = vsub.f32 1.0, %v851_v30  ;;  %v628_v3 = vsel %vm625_vm6, %v627_v8, %v623_v5  ;;  %v705_v4 = vmul.f32 %v3179_v33, %v704_v63 }
 0x52b   :  { %v787_v26 = vpop.permute.xlu0 %786  ;;  %v454_v48 = vor.u32 1.1754944e-38, %v453_v35  ;;  %vm452_vm1 = vcmp.eq.f32.partialorder %v451_v39, 8.507059e+37 }
 0x52c   :  { %v853_v57 = vmul.f32 %v3227_v19, %v852_v41 }
 0x52e   :  { %v854_v9 = vadd.f32 %v3227_v19, %v853_v57 }
 0x52f   :  { %v2812_v22 = vpop.eup %2811 }
 0x530   :  { %v443_v25 = vmul.f32 %v2812_v22, %v441_v12  ;;  %v3229_v27 = vpop.eup %2813  ;;  %vm448_vm7 = vweird.f32 %v2812_v22  ;;  %v708_v58 = vpop.permute.xlu2 %707  ;;  %v859_v12 = vand.u32 2147483647, %v3212_v6 }
 0x531   :  { %v772_v37 = vmul.f32 %v3229_v27, %v3220_v11  ;;  %vm449_vm14 = vmor %vm447_vm11, %vm448_vm7  ;;  %vm855_vm7 = vweird.f32 %v3212_v6  ;;  %vm777_vm11 = vweird.f32 %v3229_v27 }
 0x532   :  { %v444_v31 = vsub.f32 1.0, %v443_v25  ;;  %vm857_vm10 = vmor %vm855_vm7, %vm856_vm5  ;;  %vm860_vm13 = vcmp.eq.f32.partialorder %v859_v12, 8.507059e+37  ;;  %v2688_v12 = vld [vmem:[%s3674_s14 + $0x8] sm:$0xff] }
 0x533   :  { %v773_v52 = vsub.f32 1.0, %v772_v37  ;;  %v866_v62 = vpop.permute.xlu0 %865  ;;  %v858_v14 = vsel %vm857_vm10, %v3227_v19, %v854_v9 }
 0x534   :  { %v445_v38 = vmul.f32 %v2812_v22, %v444_v31 }
 0x535   :  { %v774_v7 = vmul.f32 %v3229_v27, %v773_v52  ;;  %v2760_v52 = vld [vmem:[%s3671_s11] ss:$0 sm:$0xff] }
 0x536   :  { %v446_v44 = vadd.f32 %v2812_v22, %v445_v38 }
 0x537   :  { %v537_v49 = vpop.permute.xlu1 %536  ;;  %v775_v13 = vadd.f32 %v3229_v27, %v774_v7 }
 0x538   :  { %557 = vmatpush.msra.mxu0 %v537_v49  ;;  %v450_v54 = vsel %vm449_vm14, %v2812_v22, %v446_v44  ;;  %vm778_vm14 = vmor %vm776_vm12, %vm777_vm11  ;;  %v783_v22 = vor.u32 1.1754944e-38, %v782_v15 }
 0x539   :  { %2455 = vmatmul.msk.f32.vlgmr.msra.gmra.mxu0 %vm249_vm8, %v535_v46  ;;  %v455_v59 = vsel %vm452_vm1, %v454_v48, %v450_v54  ;;  %v779_v20 = vsel %vm778_vm14, %v3229_v27, %v775_v13  ;;  %vm575_vm1 = vcmask 130048  }
 0x53a   :  { %728 = vmatpush.msrb.mxu0 %v708_v58  ;;  %v456_v2 = vmul.f32 %v3195_v55, %v455_v59  ;;  %v861_v55 = vand.u32 2147483648, %v3212_v6  ;;  %v629_v6 = vmul.f32 %v3181_v36, %v628_v3  ;;  %v784_v19 = vsel %vm781_vm15, %v783_v22, %v779_v20  ;;  %v321_v36 = vpop.f32.mrf.mxu2 }
 0x53b   :  { %v785_v24 = vmul.f32 %v3187_v43, %v784_v19  ;;  %v2686_v43 = vld [vmem:[%s3670_s10 + $0x8] sm:$0xff] }
 0x53c   :  { %886 = vmatpush.msra.mxu0 %v866_v62  ;;  %2452 = vmatmul.msk.f32.vlgmr.msrb.gmra.mxu2 %vm249_vm8, %v456_v2  ;;  %v862_v16 = vor.u32 1.1754944e-38, %v861_v55 }
 0x53d   :  { %807 = vmatpush.msrb.mxu2 %v787_v26  ;;  %932 = vmatpush.bf16.msrb.mxu1 %v2686_v43 }
 0x53e   :  { %v863_v33 = vsel %vm860_vm13, %v862_v16, %v858_v14  ;;  %v2687_v14 = vld [vmem:[%s3674_s14] sm:$0xff] }
 0x53f   :  { %v864_v23 = vmul.f32 %v3189_v45, %v863_v33 }
 0x541   :  { %2461 = vmatmul.msk.f32.vlgmr.msrb.gmra.mxu0 %vm249_vm8, %v705_v4 }
 0x544   :  { %2458 = vmatmul.msk.f32.vlgmr.msra.gmra.mxu2 %vm249_vm8, %v629_v6 }
 0x545   :  { %1034 = vmatpush.bf16.msra.mxu2 %v2688_v12 }
 0x549   :  { %2467 = vmatmul.msk.f32.vlgmr.msra.gmra.mxu0 %vm249_vm8, %v864_v23  ;;  %1035 = vmatpush.bf16.msra.mxu2 %v2687_v14 }
 0x54c   :  { %2464 = vmatmul.msk.f32.vlgmr.msrb.gmra.mxu2 %vm249_vm8, %v785_v24 }
 0x5b6   :  { %v559_v11 = vpop.f32.mrf.mxu0 }
 0x5be   :  { %v730_v25 = vpop.f32.mrf.mxu0 }
 0x5bf   :  { %v480_v26 = vpop.f32.mrf.mxu2  ;;  %v2725_v28 = vpack.i.bf16 %v730_v25, %v3151_v53  ;;  %v2685_v53 = vld [vmem:[%s3670_s10] sm:$0xff] }
 0x5c0   :  { %933 = vmatpush.bf16.msrb.mxu1 %v2685_v53 }
 0x5c1   :  { %2726 = vrot.lane.b32.xlu1 %v2725_v28, %s3689_s4  ;;  %s3714_s4 = sld [smem:[#allocation6_spill]] }
 0x5c6   :  { %v888_v27 = vpop.f32.mrf.mxu0 }
 0x5c7   :  { %v650_v29 = vpop.f32.mrf.mxu2  ;;  %v2735_v30 = vpack.i.bf16 %v888_v27, %v559_v11  ;;  %v2761_v27 = vld [vmem:[%s3672_s12] ss:$0 sm:$0xff] }
 0x5c9   :  { %2736 = vrot.lane.b32.xlu0 %v2735_v30, %s3687_s30 }
 0x5cf   :  { %v809_v45 = vpop.f32.mrf.mxu2 }
 0x5d0   :  { %v2730_v31 = vpack.i.bf16 %v809_v45, %v480_v26 }
 0x5d2   :  { %2731 = vrot.lane.b32.xlu2 %v2730_v31, %s3688_s23  ;;  %v2762_v31 = vld [vmem:[%s3673_s13] ss:$0 sm:$0xff] }
 0x62c   :  { %v2732_v37 = vpop.permute.xlu2 %2731 }
 0x62d   :  { %v2734_v40 = vunpack.i.h.bf16 %v2732_v37  ;;  %v2733_v41 = vunpack.i.l.bf16 %v2732_v37 }
 0x633   :  { %v2727_v32 = vpop.permute.xlu1 %2726 }
 0x634   :  { %v2729_v34 = vunpack.i.h.bf16 %v2727_v32  ;;  %v2728_v35 = vunpack.i.l.bf16 %v2727_v32 }
 0x636   :  { %v903_v38 = vsel %vm249_vm8, %v650_v29, %v2729_v34  ;;  %v574_v39 = vsel %vm249_vm8, %v321_v36, %v2728_v35 }
 0x637   :  { %v576_v47 = vsel %vm575_vm1, %v574_v39, %v2733_v41  ;;  %v904_v48 = vsel %vm575_vm1, %v903_v38, %v2734_v40  ;;  %v2696_v38 = vld [vmem:[%s3676_s16 + $0x38] sm:$0xff]  ;;  %v2695_v39 = vld [vmem:[%s3676_s16 + $0x30] sm:$0xff]  ;;  %v2694_v40 = vld [vmem:[%s3676_s16 + $0x28] sm:$0xff] }
 0x638   :  { %1149 = vmatpush.bf16.msrb.mxu3 %v2696_v38  ;;  %v2693_v41 = vld [vmem:[%s3676_s16 + $0x20] sm:$0xff] }
 0x63b   :  { %v2737_v42 = vpop.permute.xlu0 %2736 }
 0x63c   :  { %v2739_v44 = vunpack.i.h.bf16 %v2737_v42  ;;  %v2738_v46 = vunpack.i.l.bf16 %v2737_v42  ;;  %1150 = vmatpush.bf16.msrb.mxu3 %v2695_v39  ;;  %v2763_v42 = vld [vmem:[%s3675_s15] ss:$0 sm:$0xff] }
 0x63e   :  { %v905_v49 = vsel %vm577_vm2, %v904_v48, %v2739_v44  ;;  %v578_v50 = vsel %vm577_vm2, %v576_v47, %v2738_v46  ;;  %v2692_v44 = vld [vmem:[%s3676_s16 + $0x18] sm:$0xff]  ;;  %v2691_v48 = vld [vmem:[%s3676_s16 + $0x10] sm:$0xff] }
 0x63f   :  { %v910_v51 = vpack.c.bf16 %v905_v49, %v578_v50 }
 0x640   :  { %1151 = vmatpush.bf16.msrb.mxu3 %v2694_v40  ;;  %v2698_v40 = vld [vmem:[%s3701_s0 + $0x18] sm:$0xff] }
 0x641   :  { %2476 = vmatmul.msk.bf16.vlgmr.msrb.gmra.mxu1 %vm79_vm0, %v910_v51  ;;  %v2690_v51 = vld [vmem:[%s3676_s16 + $0x8] sm:$0xff]  ;;  %1261 = vmatpush.bf16.msrb.mxu0 %v2698_v40 }
 0x644   :  { %1152 = vmatpush.bf16.msrb.mxu3 %v2693_v41  ;;  %v2700_v41 = vld [vmem:[%s3702_s5 + $0x18] sm:$0xff] }
 0x645   :  { %1299 = vmatpush.bf16.msra.mxu1 %v2700_v41 }
 0x648   :  { %1153 = vmatpush.bf16.msrb.mxu3 %v2692_v44 }
 0x64c   :  { %1154 = vmatpush.bf16.msrb.mxu3 %v2691_v48  ;;  %v2699_v48 = vld [vmem:[%s3702_s5 + $0x10] sm:$0xff] }
 0x64d   :  { %1300 = vmatpush.bf16.msra.mxu1 %v2699_v48 }
 0x650   :  { %1155 = vmatpush.bf16.msrb.mxu3 %v2690_v51 }
 0x6be   :  { %v935_v54 = vpop.f32.mrf.mxu1 }
 0x6bf   :  { %v940_v18 = vadd.f32 %v935_v54, %v3028_v0 }
 0x6c1   :  { %v3304_v56 = vadd.f32 %v2760_v52, %v940_v18  ;;  %v2689_v18 = vld [vmem:[%s3676_s16] sm:$0xff] }
 0x6c2   :  { %1156 = vmatpush.bf16.msrb.mxu3 %v2689_v18 }
 0x6c3   :  { %v950_v57 = vsel %vm79_vm0, %v3304_v56, 0.0 }
 0x6c4   :  { %951 = vadd.xlane.f32.xlu1 %v950_v57 }
 0x6c6   :  { %v937_v58 = vpop.f32.mrf.mxu1 }
 0x6c7   :  { %v941_v59 = vadd.f32 %v937_v58, %v3033_v1 }
 0x6c9   :  { %v3309_v60 = vadd.f32 %v2760_v52, %v941_v59 }
 0x6cb   :  { %v953_v61 = vsel %vm79_vm0, %v3309_v60, 0.0 }
 0x6cc   :  { %954 = vadd.xlane.f32.xlu2 %v953_v61 }
 0x737   :  { %v952_v62 = vpop.xlane.xlu1 %951 }
 0x738   :  { %v956_v2 = vmul.f32 %v952_v62, %v3039_v10 }
 0x73a   :  { %v958_v0 = vsub.f32 %v3304_v56, %v956_v2 }
 0x73c   :  { %v960_v63 = vmul.f32 %v958_v0, %v958_v0 }
 0x73e   :  { %v962_v5 = vsel %vm79_vm0, %v960_v63, 0.0 }
 0x73f   :  { %963 = vadd.xlane.f32.xlu0 %v962_v5  ;;  %v955_v7 = vpop.xlane.xlu2 %954 }
 0x740   :  { %v957_v8 = vmul.f32 %v955_v7, %v3039_v10 }
 0x742   :  { %v959_v1 = vsub.f32 %v3309_v60, %v957_v8 }
 0x744   :  { %v961_v9 = vmul.f32 %v959_v1, %v959_v1 }
 0x746   :  { %v965_v55 = vsel %vm79_vm0, %v961_v9, 0.0 }
 0x747   :  { %966 = vadd.xlane.f32.xlu1 %v965_v55 }
 0x7b2   :  { %v964_v3 = vpop.xlane.xlu0 %963 }
 0x7b3   :  { %v968_v4 = vmul.f32 %v964_v3, %v3039_v10 }
 0x7b5   :  { %v970_v13 = vadd.f32 1e-05, %v968_v4 }
 0x7b7   :  { %2815 = vrsqrt.f32 %v970_v13  ;;  %vm978_vm4 = vweird.f32 %v970_v13 }
 0x7ba   :  { %v967_v15 = vpop.xlane.xlu1 %966 }
 0x7bb   :  { %v969_v16 = vmul.f32 %v967_v15, %v3039_v10 }
 0x7bd   :  { %v2816_v17 = vpop.eup %2815  ;;  %v971_v6 = vadd.f32 1e-05, %v969_v16 }
 0x7be   :  { %v973_v33 = vmul.f32 %v2816_v17, %v970_v13  ;;  %vm979_vm3 = vweird.f32 %v2816_v17 }
 0x7bf   :  { %2817 = vrsqrt.f32 %v971_v6  ;;  %vm980_vm5 = vmor %vm978_vm4, %vm979_vm3  ;;  %vm988_vm7 = vweird.f32 %v971_v6 }
 0x7c0   :  { %v974_v20 = vmul.f32 %v2816_v17, %v973_v33 }
 0x7c2   :  { %v975_v22 = vmul.f32 0.5, %v974_v20 }
 0x7c4   :  { %v976_v19 = vsub.f32 1.5, %v975_v22 }
 0x7c5   :  { %v2818_v23 = vpop.eup %2817 }
 0x7c6   :  { %v977_v24 = vmul.f32 %v2816_v17, %v976_v19  ;;  %v983_v11 = vmul.f32 %v2818_v23, %v971_v6  ;;  %vm989_vm6 = vweird.f32 %v2818_v23 }
 0x7c7   :  { %vm990_vm10 = vmor %vm988_vm7, %vm989_vm6 }
 0x7c8   :  { %v984_v36 = vmul.f32 %v2818_v23, %v983_v11  ;;  %v981_v25 = vsel %vm980_vm5, %v2816_v17, %v977_v24  ;;  %v2764_v11 = vld [vmem:[%s3677_s17] ss:$0 sm:$0xff] }
 0x7c9   :  { %v992_v29 = vmul.f32 %v981_v25, %v958_v0 }
 0x7ca   :  { %v985_v26 = vmul.f32 0.5, %v984_v36 }
 0x7cb   :  { %v997_v43 = vmul.f32 %v2761_v27, %v992_v29 }
 0x7cc   :  { %v986_v28 = vsub.f32 1.5, %v985_v26 }
 0x7cd   :  { %v1002_v34 = vadd.f32 %v2762_v31, %v997_v43 }
 0x7ce   :  { %v987_v30 = vmul.f32 %v2818_v23, %v986_v28 }
 0x7d0   :  { %v991_v45 = vsel %vm990_vm10, %v2818_v23, %v987_v30 }
 0x7d1   :  { %v993_v53 = vmul.f32 %v991_v45, %v959_v1 }
 0x7d3   :  { %v998_v32 = vmul.f32 %v2761_v27, %v993_v53 }
 0x7d5   :  { %v1003_v35 = vadd.f32 %v2762_v31, %v998_v32 }
 0x7d7   :  { %v1008_v37 = vpack.c.bf16 %v1003_v35, %v1002_v34 }
 0x7d9   :  { %2485 = vmatmul.msk.bf16.vlgmr.msra.gmra.mxu2 %vm79_vm0, %v1008_v37 }
 0x85c   :  { %v1037_v46 = vpop.f32.mrf.mxu2 }
 0x85d   :  { %v1038_v47 = vadd.f32 %v2763_v42, %v1037_v46 }
 0x85f   :  { %v2486_v49 = vmul.f32 -1.702, %v1038_v47 }
 0x861   :  { %v1046_v50 = vmul.f32 1.442695, %v2486_v49  ;;  %v2701_v49 = vld [vmem:[%s3666_s6 + $0x10] sm:$0xff] }
 0x863   :  { %2819 = vpow2.f32 %v1046_v50 }
 0x864   :  { %v1039_v52 = vpop.f32.mrf.mxu2 }
 0x865   :  { %v1040_v54 = vadd.f32 %v2763_v42, %v1039_v52  ;;  %v2702_v42 = vld [vmem:[%s3666_s6 + $0x18] sm:$0xff] }
 0x866   :  { %1335 = vmatpush.bf16.msrb.mxu2 %v2702_v42 }
 0x867   :  { %v2487_v57 = vmul.f32 -1.702, %v1040_v54 }
 0x869   :  { %v2820_v58 = vpop.eup %2819  ;;  %v1048_v59 = vmul.f32 1.442695, %v2487_v57 }
 0x86a   :  { %v1050_v61 = vadd.f32 1.0, %v2820_v58  ;;  %1336 = vmatpush.bf16.msrb.mxu2 %v2701_v49 }
 0x86b   :  { %2821 = vpow2.f32 %v1048_v59 }
 0x86c   :  { %2823 = vrcp.f32 %v1050_v61  ;;  %v1063_v55 = vand.u32 2147483648, %v1050_v61  ;;  %vm1057_vm12 = vweird.f32 %v1050_v61  ;;  %v1061_v3 = vand.u32 2147483647, %v1050_v61 }
 0x86e   :  { %v1064_v16 = vor.u32 1.1754944e-38, %v1063_v55  ;;  %vm1062_vm15 = vcmp.eq.f32.partialorder %v1061_v3, 8.507059e+37  ;;  %v2766_v3 = vld [vmem:[%s3704_s22 + $0x1] ss:$0 sm:$0xff]  ;;  %s3709_s22 = smov 120  }
 0x871   :  { %v2822_v62 = vpop.eup %2821 }
 0x872   :  { %v2824_v2 = vpop.eup %2823  ;;  %v1051_v0 = vadd.f32 1.0, %v2822_v62 }
 0x873   :  { %v1053_v63 = vmul.f32 %v2824_v2, %v1050_v61  ;;  %vm1058_vm11 = vweird.f32 %v2824_v2 }
 0x874   :  { %2825 = vrcp.f32 %v1051_v0  ;;  %vm1059_vm13 = vmor %vm1057_vm12, %vm1058_vm11  ;;  %v1078_v4 = vand.u32 2147483648, %v1051_v0  ;;  %v1076_v15 = vand.u32 2147483647, %v1051_v0  ;;  %vm1072_vm3 = vweird.f32 %v1051_v0 }
 0x875   :  { %v1054_v5 = vsub.f32 1.0, %v1053_v63 }
 0x876   :  { %v1079_v33 = vor.u32 1.1754944e-38, %v1078_v4  ;;  %vm1077_vm5 = vcmp.eq.f32.partialorder %v1076_v15, 8.507059e+37 }
 0x877   :  { %v1055_v7 = vmul.f32 %v2824_v2, %v1054_v5 }
 0x879   :  { %v1056_v1 = vadd.f32 %v2824_v2, %v1055_v7 }
 0x87a   :  { %v2826_v8 = vpop.eup %2825 }
 0x87b   :  { %v1068_v9 = vmul.f32 %v2826_v8, %v1051_v0  ;;  %v1060_v13 = vsel %vm1059_vm13, %v2824_v2, %v1056_v1  ;;  %vm1073_vm14 = vweird.f32 %v2826_v8 }
 0x87c   :  { %v1065_v6 = vsel %vm1062_vm15, %v1064_v16, %v1060_v13  ;;  %vm1074_vm4 = vmor %vm1072_vm3, %vm1073_vm14 }
 0x87d   :  { %v1069_v12 = vsub.f32 1.0, %v1068_v9  ;;  %v1082_v19 = vmul.f32 %v1065_v6, %v1038_v47  ;;  %v2697_v47 = vld [vmem:[%s3701_s0 + $0x10] sm:$0xff]  ;;  %v2768_v6 = vld [vmem:[%s3668_s8 + $0x1] ss:$0 sm:$0xff]  ;;  %s3711_s8 = smov 8  }
 0x87e   :  { %1262 = vmatpush.bf16.msrb.mxu0 %v2697_v47 }
 0x87f   :  { %v1070_v14 = vmul.f32 %v2826_v8, %v1069_v12 }
 0x881   :  { %v1071_v17 = vadd.f32 %v2826_v8, %v1070_v14 }
 0x883   :  { %v1075_v20 = vsel %vm1074_vm4, %v2826_v8, %v1071_v17  ;;  %v2765_v8 = vld [vmem:[%s3703_s29 + $0x1] ss:$0 sm:$0xff] }
 0x884   :  { %v1080_v22 = vsel %vm1077_vm5, %v1079_v33, %v1075_v20  ;;  %v2767_v17 = vld [vmem:[%s3667_s7 + $0x1] ss:$0 sm:$0xff]  ;;  %s3710_s7 = smov 112  }
 0x885   :  { %v1083_v23 = vmul.f32 %v1080_v22, %v1040_v54 }
 0x887   :  { %v1100_v24 = vpack.c.bf16 %v1083_v23, %v1082_v19 }
 0x889   :  { %1157 = vmatmul.bf16.vlgmr.msrb.gmra.mxu3 %v1100_v24  ;;  %v3421_v24 = vld [vmem:[%s3669_s9 + $0x1] ss:$0 sm:$0xff]  ;;  %s3712_s9 = smov 16  }
 0x90c   :  { %v1158_v36 = vpop.f32.mrf.mxu3 }
 0x90d   :  { %v1163_v25 = vadd.f32 %v1158_v36, %v3304_v56 }
 0x90f   :  { %v3365_v26 = vadd.f32 %v2764_v11, %v1163_v25 }
 0x911   :  { %v1175_v28 = vsel %vm79_vm0, %v3365_v26, 0.0 }
 0x912   :  { %1176 = vadd.xlane.f32.xlu2 %v1175_v28 }
 0x914   :  { %v1160_v27 = vpop.f32.mrf.mxu3 }
 0x915   :  { %v1164_v29 = vadd.f32 %v1160_v27, %v3309_v60 }
 0x917   :  { %v3370_v30 = vadd.f32 %v2764_v11, %v1164_v29 }
 0x919   :  { %v1178_v45 = vsel %vm79_vm0, %v3370_v30, 0.0 }
 0x91a   :  { %1179 = vadd.xlane.f32.xlu0 %v1178_v45 }
 0x985   :  { %v1177_v31 = vpop.xlane.xlu2 %1176 }
 0x986   :  { %v1181_v43 = vmul.f32 %v1177_v31, %v3039_v10 }
 0x988   :  { %v1183_v56 = vsub.f32 %v3365_v26, %v1181_v43 }
 0x98a   :  { %v1185_v53 = vmul.f32 %v1183_v56, %v1183_v56 }
 0x98c   :  { %v1187_v32 = vsel %vm79_vm0, %v1185_v53, 0.0 }
 0x98d   :  { %1188 = vadd.xlane.f32.xlu1 %v1187_v32  ;;  %v1180_v34 = vpop.xlane.xlu0 %1179 }
 0x98e   :  { %v1182_v35 = vmul.f32 %v1180_v34, %v3039_v10 }
 0x990   :  { %v1184_v60 = vsub.f32 %v3370_v30, %v1182_v35 }
 0x992   :  { %v1186_v37 = vmul.f32 %v1184_v60, %v1184_v60 }
 0x994   :  { %v1190_v38 = vsel %vm79_vm0, %v1186_v37, 0.0 }
 0x995   :  { %1191 = vadd.xlane.f32.xlu2 %v1190_v38 }
 0xa00   :  { %v1189_v39 = vpop.xlane.xlu1 %1188 }
 0xa01   :  { %v1193_v44 = vmul.f32 %v1189_v39, %v3039_v10 }
 0xa03   :  { %v1195_v46 = vadd.f32 1e-05, %v1193_v44 }
 0xa05   :  { %2827 = vrsqrt.f32 %v1195_v46  ;;  %vm1203_vm7 = vweird.f32 %v1195_v46 }
 0xa08   :  { %v1192_v50 = vpop.xlane.xlu2 %1191 }
 0xa09   :  { %v1194_v51 = vmul.f32 %v1192_v50, %v3039_v10 }
 0xa0b   :  { %v2828_v52 = vpop.eup %2827  ;;  %v1196_v54 = vadd.f32 1e-05, %v1194_v51 }
 0xa0c   :  { %v1198_v18 = vmul.f32 %v2828_v52, %v1195_v46  ;;  %vm1204_vm6 = vweird.f32 %v2828_v52 }
 0xa0d   :  { %2829 = vrsqrt.f32 %v1196_v54  ;;  %vm1205_vm10 = vmor %vm1203_vm7, %vm1204_vm6  ;;  %vm1213_vm12 = vweird.f32 %v1196_v54 }
 0xa0e   :  { %v1199_v57 = vmul.f32 %v2828_v52, %v1198_v18 }
 0xa10   :  { %v1200_v58 = vmul.f32 0.5, %v1199_v57 }
 0xa12   :  { %v1201_v59 = vsub.f32 1.5, %v1200_v58 }
 0xa13   :  { %v2830_v61 = vpop.eup %2829 }
 0xa14   :  { %v1202_v62 = vmul.f32 %v2828_v52, %v1201_v59  ;;  %v1208_v2 = vmul.f32 %v2830_v61, %v1196_v54  ;;  %vm1214_vm11 = vweird.f32 %v2830_v61 }
 0xa15   :  { %vm1215_vm13 = vmor %vm1213_vm12, %vm1214_vm11 }
 0xa16   :  { %v1209_v0 = vmul.f32 %v2830_v61, %v1208_v2  ;;  %v1206_v63 = vsel %vm1205_vm10, %v2828_v52, %v1202_v62 }
 0xa17   :  { %v1217_v1 = vmul.f32 %v1206_v63, %v1183_v56 }
 0xa18   :  { %v1210_v5 = vmul.f32 0.5, %v1209_v0 }
 0xa19   :  { %v1222_v12 = vmul.f32 %v2765_v8, %v1217_v1 }
 0xa1a   :  { %v1211_v7 = vsub.f32 1.5, %v1210_v5 }
 0xa1b   :  { %v1227_v14 = vadd.f32 %v2766_v3, %v1222_v12 }
 0xa1c   :  { %v1212_v9 = vmul.f32 %v2830_v61, %v1211_v7 }
 0xa1e   :  { %v1216_v55 = vsel %vm1215_vm13, %v2830_v61, %v1212_v9 }
 0xa1f   :  { %v1218_v4 = vmul.f32 %v1216_v55, %v1184_v60 }
 0xa21   :  { %v1223_v13 = vmul.f32 %v2765_v8, %v1218_v4 }
 0xa23   :  { %v1228_v15 = vadd.f32 %v2766_v3, %v1223_v13 }
 0xa25   :  { %v1229_v16 = vpack.c.bf16 %v1228_v15, %v1227_v14 }
 0xa27   :  { %2535 = vmatmul.msk.bf16.vlgmr.msrb.gmra.mxu0 %vm79_vm0, %v1229_v16  ;;  %2549 = vmatmul.msk.bf16.vlgmr.msra.gmra.mxu1 %vm79_vm0, %v1229_v16 }
 0xa28   :  { %2563 = vmatmul.msk.bf16.vlgmr.msrb.gmra.mxu2 %vm79_vm0, %v1229_v16 }
 0xaa4   :  { %v1264_v33 = vpop.f32.mrf.mxu0  ;;  %v1302_v20 = vpop.f32.mrf.mxu1 }
 0xaa5   :  { %v1265_v22 = vadd.f32 %v2767_v17, %v1264_v33  ;;  %v1303_v19 = vadd.f32 %v2768_v6, %v1302_v20 }
 0xaa7   :  { %v1269_v23 = vmul.f32 0.35355338, %v1265_v22  ;;  %1578 = vrot.lane.b32.xlu2 %v1303_v19, %s2908_s25  ;;  %1419 = vrot.lane.b32.xlu0 %v1303_v19, %s3709_s22 }
 0xaa8   :  { %2564 = vmatpush.xpose.msk.msra.mxu0 %vm249_vm8, %v1303_v19 }
 0xaa9   :  { %1417 = vrot.lane.b32.xlu1 %v1269_v23, %s3709_s22 }
 0xaab   :  { %v1338_v11 = vpop.f32.mrf.mxu2  ;;  %2565 = vmatmul.msk.f32.vlgmr.msra.gmra.mxu0 %vm249_vm8, %v1269_v23 }
 0xaac   :  { %v3426_v36 = vadd.f32 %v3421_v24, %v1338_v11  ;;  %v1304_v25 = vpop.f32.mrf.mxu1  ;;  %v1266_v45 = vpop.f32.mrf.mxu0 }
 0xaad   :  { %v3433_v28 = vadd.f32 %v2768_v6, %v1304_v25  ;;  %v1267_v39 = vadd.f32 %v2767_v17, %v1266_v45 }
 0xaae   :  { %1412 = vmatpush.msrb.mxu0 %v3426_v36 }
 0xaaf   :  { %v1270_v40 = vmul.f32 0.35355338, %v1267_v39 }
 0xab1   :  { %1576 = vrot.lane.b32.xlu1 %v1269_v23, %s2908_s25 }
 0xab9   :  { %1471 = vrot.lane.b32.xlu1 %v3426_v36, %s3709_s22 }
 0xac1   :  { %1499 = vrot.lane.b32.xlu1 %v1303_v19, %s3710_s7 }
 0xac9   :  { %1746 = vrot.lane.b32.xlu1 %v3433_v28, %s3709_s22 }
 0xad1   :  { %1497 = vrot.lane.b32.xlu1 %v1269_v23, %s3710_s7 }
 0xad9   :  { %1826 = vrot.lane.b32.xlu1 %v3433_v28, %s3710_s7 }
 0xb01   :  { %v1579_v34 = vpop.permute.xlu2 %1578 }
 0xb19   :  { %v1420_v27 = vpop.permute.xlu0 %1419 }
 0xb1a   :  { %2567 = vmatpush.xpose.msk.msrb.mxu1 %vm249_vm8, %v1420_v27 }
 0xb1b   :  { %v1418_v29 = vpop.permute.xlu1 %1417 }
 0xb1d   :  { %2568 = vmatmul.msk.f32.vlgmr.msrb.gmra.mxu1 %vm249_vm8, %v1418_v29 }
 0xb23   :  { %v3442_v31 = vpop.permute.xlu1 %1576 }
 0xb28   :  { %v1366_v43 = vpop.f32.mrf.mxu0 }
 0xb29   :  { %v1369_v56 = vsel %vm3115_vm9, %v1366_v43, -1e+09 }
 0xb2a   :  { %v1370_v53 = vsel %vm249_vm8, %v1369_v56, -inf }
 0xb2b   :  { %1371 = vmax.xlane.f32.xlu2 %v1370_v53  ;;  %v1472_v32 = vpop.permute.xlu1 %1471  ;;  %v1340_v53 = vpop.f32.mrf.mxu2 }
 0xb2c   :  { %1492 = vmatpush.msra.mxu2 %v1472_v32 }
 0xb2e   :  { %2573 = vmatpush.xpose.msk.msrb.mxu2 %vm249_vm8, %v1579_v34 }
 0xb33   :  { %v1500_v35 = vpop.permute.xlu1 %1499 }
 0xb34   :  { %2570 = vmatpush.xpose.msk.msra.mxu0 %vm249_vm8, %v1500_v35 }
 0xb3b   :  { %v1747_v58 = vpop.permute.xlu1 %1746 }
 0xb43   :  { %v1498_v1 = vpop.permute.xlu1 %1497 }
 0xb4b   :  { %v1827_v55 = vpop.permute.xlu1 %1826 }
 0xb9a   :  { %v1442_v60 = vpop.f32.mrf.mxu1 }
 0xb9b   :  { %v1445_v37 = vsel %vm3115_vm9, %v1442_v60, -1e+09 }
 0xb9c   :  { %v1446_v38 = vsel %vm249_vm8, %v1445_v37, -inf }
 0xb9d   :  { %1447 = vmax.xlane.f32.xlu2 %v1446_v38 }
 0xb9e   :  { %v1372_v41 = vpop.xlane.xlu2 %1371 }
 0xb9f   :  { %v1373_v42 = vsub.f32 %v1369_v56, %v1372_v41 }
 0xba1   :  { %v1374_v44 = vmul.f32 1.442695, %v1373_v42 }
 0xba3   :  { %2831 = vpow2.f32 %v1374_v44 }
 0xba9   :  { %v2832_v46 = vpop.eup %2831 }
 0xbaa   :  { %v1376_v47 = vsel %vm249_vm8, %v2832_v46, 0.0 }
 0xbb5   :  { %1744 = vrot.lane.b32.xlu2 %v1270_v40, %s3709_s22 }
 0xbde   :  { %1377 = vadd.xlane.f32.xlu2 %v1376_v47 }
 0xbf6   :  { %1903 = vrot.lane.b32.xlu2 %v1270_v40, %s2908_s25 }
 0xbfe   :  { %1824 = vrot.lane.b32.xlu2 %v1270_v40, %s3710_s7 }
 0xc10   :  { %v1448_v48 = vpop.xlane.xlu2 %1447 }
 0xc11   :  { %v1449_v49 = vsub.f32 %v1445_v37, %v1448_v48 }
 0xc13   :  { %v1450_v50 = vmul.f32 1.442695, %v1449_v49 }
 0xc15   :  { %2833 = vpow2.f32 %v1450_v50 }
 0xc18   :  { %v1745_v54 = vpop.permute.xlu2 %1744 }
 0xc1b   :  { %v2834_v51 = vpop.eup %2833 }
 0xc1c   :  { %v1452_v52 = vsel %vm249_vm8, %v2834_v51, 0.0 }
 0xc1d   :  { %1453 = vadd.xlane.f32.xlu0 %v1452_v52 }
 0xc31   :  { %1905 = vrot.lane.b32.xlu0 %v3433_v28, %s2908_s25 }
 0xc51   :  { %v1378_v18 = vpop.xlane.xlu2 %1377 }
 0xc52   :  { %2835 = vrcp.f32 %v1378_v18  ;;  %v1390_v62 = vand.u32 2147483648, %v1378_v18  ;;  %v1388_v0 = vand.u32 2147483647, %v1378_v18  ;;  %vm1384_vm15 = vweird.f32 %v1378_v18 }
 0xc54   :  { %v1391_v5 = vor.u32 1.1754944e-38, %v1390_v62  ;;  %vm1389_vm4 = vcmp.eq.f32.partialorder %v1388_v0, 8.507059e+37 }
 0xc58   :  { %v2836_v57 = vpop.eup %2835 }
 0xc59   :  { %v1380_v59 = vmul.f32 %v2836_v57, %v1378_v18  ;;  %vm1385_vm14 = vweird.f32 %v2836_v57  ;;  %v1904_v3 = vpop.permute.xlu2 %1903 }
 0xc5a   :  { %vm1386_vm3 = vmor %vm1384_vm15, %vm1385_vm14 }
 0xc5b   :  { %v1381_v61 = vsub.f32 1.0, %v1380_v59 }
 0xc5d   :  { %v1382_v2 = vmul.f32 %v2836_v57, %v1381_v61 }
 0xc5f   :  { %v1383_v63 = vadd.f32 %v2836_v57, %v1382_v2 }
 0xc61   :  { %v1387_v7 = vsel %vm1386_vm3, %v2836_v57, %v1383_v63  ;;  %v1825_v12 = vpop.permute.xlu2 %1824 }
 0xc62   :  { %v1392_v8 = vsel %vm1389_vm4, %v1391_v5, %v1387_v7 }
 0xc63   :  { %v1393_v9 = vmul.f32 %v2832_v46, %v1392_v8 }
 0xc65   :  { %2566 = vmatmul.msk.f32.vlgmr.msrb.gmra.mxu0 %vm249_vm8, %v1393_v9 }
 0xc66   :  { %2576 = vmatpush.xpose.msk.msrb.mxu0 %vm249_vm8, %v3433_v28 }
 0xc6d   :  { %2571 = vmatmul.msk.f32.vlgmr.msra.gmra.mxu0 %vm249_vm8, %v1498_v1 }
 0xc6e   :  { %2582 = vmatpush.xpose.msk.msra.mxu0 %vm249_vm8, %v1827_v55 }
 0xc75   :  { %2577 = vmatmul.msk.f32.vlgmr.msrb.gmra.mxu0 %vm249_vm8, %v1270_v40 }
 0xc7d   :  { %2583 = vmatmul.msk.f32.vlgmr.msra.gmra.mxu0 %vm249_vm8, %v1825_v12 }
 0xc90   :  { %v1454_v4 = vpop.xlane.xlu0 %1453 }
 0xc91   :  { %2837 = vrcp.f32 %v1454_v4  ;;  %v1466_v16 = vand.u32 2147483648, %v1454_v4  ;;  %v1464_v6 = vand.u32 2147483647, %v1454_v4  ;;  %vm1460_vm6 = vweird.f32 %v1454_v4 }
 0xc93   :  { %v1467_v20 = vor.u32 1.1754944e-38, %v1466_v16  ;;  %vm1465_vm10 = vcmp.eq.f32.partialorder %v1464_v6, 8.507059e+37 }
 0xc97   :  { %v2838_v13 = vpop.eup %2837 }
 0xc98   :  { %v1456_v14 = vmul.f32 %v2838_v13, %v1454_v4  ;;  %vm1461_vm5 = vweird.f32 %v2838_v13  ;;  %v1341_v4 = vadd.f32 %v3421_v24, %v1340_v53 }
 0xc99   :  { %vm1462_vm7 = vmor %vm1460_vm6, %vm1461_vm5 }
 0xc9a   :  { %v1457_v15 = vsub.f32 1.0, %v1456_v14 }
 0xc9c   :  { %v1458_v17 = vmul.f32 %v2838_v13, %v1457_v15 }
 0xc9e   :  { %v1459_v33 = vadd.f32 %v2838_v13, %v1458_v17 }
 0xca0   :  { %v1463_v22 = vsel %vm1462_vm7, %v2838_v13, %v1459_v33 }
 0xca1   :  { %v1468_v19 = vsel %vm1465_vm10, %v1467_v20, %v1463_v22 }
 0xca2   :  { %v1469_v23 = vmul.f32 %v2834_v51, %v1468_v19 }
 0xca3   :  { %v1906_v11 = vpop.permute.xlu0 %1905 }
 0xca4   :  { %2569 = vmatmul.msk.f32.vlgmr.msra.gmra.mxu2 %vm249_vm8, %v1469_v23 }
 0xca5   :  { %2579 = vmatpush.xpose.msk.msra.mxu2 %vm249_vm8, %v1747_v58 }
 0xcac   :  { %2574 = vmatmul.msk.f32.vlgmr.msrb.gmra.mxu2 %vm249_vm8, %v3442_v31 }
 0xcad   :  { %2585 = vmatpush.xpose.msk.msrb.mxu2 %vm249_vm8, %v1906_v11 }
 0xcb4   :  { %2580 = vmatmul.msk.f32.vlgmr.msra.gmra.mxu2 %vm249_vm8, %v1745_v54 }
 0xcbc   :  { %2586 = vmatmul.msk.f32.vlgmr.msrb.gmra.mxu2 %vm249_vm8, %v1904_v3 }
 0xce2   :  { %v3473_v25 = vpop.f32.mrf.mxu0 }
 0xcea   :  { %v1522_v28 = vpop.f32.mrf.mxu0 }
 0xceb   :  { %v1525_v27 = vsel %vm3115_vm9, %v1522_v28, -1e+09 }
 0xcec   :  { %v1526_v29 = vsel %vm249_vm8, %v1525_v27, -inf }
 0xced   :  { %1527 = vmax.xlane.f32.xlu2 %v1526_v29 }
 0xcf2   :  { %v1693_v45 = vpop.f32.mrf.mxu0 }
 0xcf3   :  { %v1696_v37 = vsel %vm3115_vm9, %v1693_v45, -1e+09 }
 0xcf4   :  { %v1697_v40 = vsel %vm249_vm8, %v1696_v37, -inf }
 0xcfa   :  { %v1849_v43 = vpop.f32.mrf.mxu0 }
 0xcfb   :  { %v1852_v31 = vsel %vm3115_vm9, %v1849_v43, -1e+09 }
 0xcfc   :  { %v1853_v56 = vsel %vm249_vm8, %v1852_v31, -inf }
 0xcfd   :  { %1854 = vmax.xlane.f32.xlu0 %v1853_v56 }
 0xd27   :  { %v3481_v32 = vpop.f32.mrf.mxu2 }
 0xd2f   :  { %v1601_v34 = vpop.f32.mrf.mxu2 }
 0xd30   :  { %v1604_v35 = vsel %vm3115_vm9, %v1601_v34, -1e+09 }
 0xd31   :  { %v1605_v60 = vsel %vm249_vm8, %v1604_v35, -inf }
 0xd32   :  { %1606 = vmax.xlane.f32.xlu1 %v1605_v60 }
 0xd37   :  { %v1769_v38 = vpop.f32.mrf.mxu2 }
 0xd38   :  { %v1772_v39 = vsel %vm3115_vm9, %v1769_v38, -1e+09 }
 0xd39   :  { %v1773_v41 = vsel %vm249_vm8, %v1772_v39, -inf }
 0xd3a   :  { %1698 = vmax.xlane.f32.xlu1 %v1697_v40  ;;  %1774 = vmax.xlane.f32.xlu0 %v1773_v41 }
 0xd3f   :  { %v1928_v49 = vpop.f32.mrf.mxu2 }
 0xd40   :  { %v1931_v50 = vsel %vm3115_vm9, %v1928_v49, -1e+09 }
 0xd41   :  { %v1932_v51 = vsel %vm249_vm8, %v1931_v50, -inf }
 0xd4e   :  { %1629 = vrot.lane.b32.xlu0 %v3426_v36, %s2908_s25 }
 0xd60   :  { %v1528_v42 = vpop.xlane.xlu2 %1527 }
 0xd61   :  { %v1529_v44 = vsub.f32 %v1525_v27, %v1528_v42 }
 0xd63   :  { %v1530_v46 = vmul.f32 1.442695, %v1529_v44 }
 0xd65   :  { %2839 = vpow2.f32 %v1530_v46 }
 0xd6b   :  { %v3494_v47 = vpop.eup %2839 }
 0xd6c   :  { %v1532_v48 = vsel %vm249_vm8, %v3494_v47, 0.0 }
 0xd6d   :  { %1533 = vadd.xlane.f32.xlu2 %v1532_v48 }
 0xd70   :  { %v1855_v52 = vpop.xlane.xlu0 %1854 }
 0xd71   :  { %v1856_v61 = vsub.f32 %v1852_v31, %v1855_v52 }
 0xd73   :  { %v1857_v0 = vmul.f32 1.442695, %v1856_v61 }
 0xd75   :  { %1933 = vmax.xlane.f32.xlu2 %v1932_v51 }
 0xd8d   :  { %1550 = vrot.lane.b32.xlu2 %v3426_v36, %s3710_s7 }
 0xda5   :  { %v1607_v54 = vpop.xlane.xlu1 %1606 }
 0xda6   :  { %v1608_v63 = vsub.f32 %v1604_v35, %v1607_v54 }
 0xda8   :  { %v1609_v8 = vmul.f32 1.442695, %v1608_v63 }
 0xdad   :  { %v1699_v18 = vpop.xlane.xlu1 %1698  ;;  %v1775_v57 = vpop.xlane.xlu0 %1774 }
 0xdae   :  { %v1700_v58 = vsub.f32 %v1696_v37, %v1699_v18  ;;  %v1776_v59 = vsub.f32 %v1772_v39, %v1775_v57 }
 0xdb0   :  { %v1701_v62 = vmul.f32 1.442695, %v1700_v58  ;;  %v1777_v2 = vmul.f32 1.442695, %v1776_v59 }
 0xdb2   :  { %2841 = vpow2.f32 %v1701_v62 }
 0xdb3   :  { %2843 = vpow2.f32 %v1777_v2 }
 0xdb4   :  { %2845 = vpow2.f32 %v1857_v0 }
 0xdb5   :  { %2847 = vpow2.f32 %v1609_v8 }
 0xdb8   :  { %v3503_v21 = vpop.eup %2841 }
 0xdb9   :  { %v3505_v5 = vpop.eup %2843  ;;  %v1703_v36 = vsel %vm249_vm8, %v3503_v21, 0.0 }
 0xdba   :  { %1704 = vadd.xlane.f32.xlu1 %v1703_v36  ;;  %v1779_v7 = vsel %vm249_vm8, %v3505_v5, 0.0  ;;  %v3511_v1 = vpop.eup %2845 }
 0xdbb   :  { %1780 = vadd.xlane.f32.xlu0 %v1779_v7  ;;  %v1859_v55 = vsel %vm249_vm8, %v3511_v1, 0.0  ;;  %v3515_v3 = vpop.eup %2847 }
 0xdbc   :  { %v1611_v12 = vsel %vm249_vm8, %v3515_v3, 0.0 }
 0xdc0   :  { %v1630_v9 = vpop.permute.xlu0 %1629 }
 0xdc1   :  { %1650 = vmatpush.msra.mxu3 %v1630_v9 }
 0xdc2   :  { %1860 = vadd.xlane.f32.xlu1 %v1859_v55 }
 0xdca   :  { %1612 = vadd.xlane.f32.xlu1 %v1611_v12 }
 0xdcf   :  { %1956 = vrot.lane.b32.xlu0 %v1341_v4, %s2908_s25  ;;  %s3713_s25 = smov 24  }
 0xde0   :  { %v1534_v13 = vpop.xlane.xlu2 %1533 }
 0xde1   :  { %2849 = vrcp.f32 %v1534_v13  ;;  %v1546_v33 = vand.u32 2147483648, %v1534_v13  ;;  %v1544_v19 = vand.u32 2147483647, %v1534_v13  ;;  %vm1540_vm11 = vweird.f32 %v1534_v13 }
 0xde3   :  { %1798 = vrot.lane.b32.xlu1 %v1341_v4, %s3709_s22  ;;  %v1547_v24 = vor.u32 1.1754944e-38, %v1546_v33  ;;  %vm1545_vm13 = vcmp.eq.f32.partialorder %v1544_v19, 8.507059e+37 }
 0xde7   :  { %v2850_v14 = vpop.eup %2849 }
 0xde8   :  { %v1536_v15 = vmul.f32 %v2850_v14, %v1534_v13  ;;  %v1934_v16 = vpop.xlane.xlu2 %1933  ;;  %vm1541_vm9 = vweird.f32 %v2850_v14 }
 0xde9   :  { %v1935_v17 = vsub.f32 %v1931_v50, %v1934_v16  ;;  %vm1542_vm12 = vmor %vm1540_vm11, %vm1541_vm9 }
 0xdea   :  { %v1537_v6 = vsub.f32 1.0, %v1536_v15 }
 0xdeb   :  { %v1936_v20 = vmul.f32 1.442695, %v1935_v17 }
 0xdec   :  { %v1538_v22 = vmul.f32 %v2850_v14, %v1537_v6 }
 0xded   :  { %2851 = vpow2.f32 %v1936_v20 }
 0xdee   :  { %v1539_v23 = vadd.f32 %v2850_v14, %v1538_v22 }
 0xdf0   :  { %v1543_v11 = vsel %vm1542_vm12, %v2850_v14, %v1539_v23  ;;  %v1551_v28 = vpop.permute.xlu2 %1550 }
 0xdf1   :  { %v1548_v27 = vsel %vm1545_vm13, %v1547_v24, %v1543_v11  ;;  %1571 = vmatpush.msra.mxu1 %v1551_v28 }
 0xdf2   :  { %v1549_v29 = vmul.f32 %v3494_v47, %v1548_v27 }
 0xdf3   :  { %1739 = vmatpush.msrb.mxu1 %v1341_v4  ;;  %v3523_v45 = vpop.eup %2851 }
 0xdf4   :  { %2572 = vmatmul.msk.f32.vlgmr.msra.gmra.mxu1 %vm249_vm8, %v1549_v29  ;;  %v1938_v43 = vsel %vm249_vm8, %v3523_v45, 0.0 }
 0xdf5   :  { %1939 = vadd.xlane.f32.xlu2 %v1938_v43 }
 0xe0d   :  { %1877 = vrot.lane.b32.xlu2 %v1341_v4, %s3710_s7 }
 0xe2d   :  { %v1705_v31 = vpop.xlane.xlu1 %1704 }
 0xe2e   :  { %2853 = vrcp.f32 %v1705_v31  ;;  %v1781_v34 = vpop.xlane.xlu0 %1780  ;;  %v1717_v37 = vand.u32 2147483648, %v1705_v31  ;;  %v1715_v39 = vand.u32 2147483647, %v1705_v31  ;;  %vm1711_vm15 = vweird.f32 %v1705_v31 }
 0xe2f   :  { %2855 = vrcp.f32 %v1781_v34  ;;  %vm1787_vm11 = vweird.f32 %v1781_v34  ;;  %v1791_v36 = vand.u32 2147483647, %v1781_v34 }
 0xe30   :  { %v1718_v41 = vor.u32 1.1754944e-38, %v1717_v37  ;;  %vm1716_vm4 = vcmp.eq.f32.partialorder %v1715_v39, 8.507059e+37 }
 0xe31   :  { %vm1792_vm13 = vcmp.eq.f32.partialorder %v1791_v36, 8.507059e+37 }
 0xe34   :  { %v2854_v56 = vpop.eup %2853 }
 0xe35   :  { %v1707_v53 = vmul.f32 %v2854_v56, %v1705_v31  ;;  %v3529_v35 = vpop.xlane.xlu1 %1860  ;;  %vm1712_vm14 = vweird.f32 %v2854_v56  ;;  %v2856_v46 = vpop.eup %2855 }
 0xe36   :  { %vm1713_vm3 = vmor %vm1711_vm15, %vm1712_vm14  ;;  %v1783_v49 = vmul.f32 %v2856_v46, %v1781_v34  ;;  %vm1788_vm10 = vweird.f32 %v2856_v46  ;;  %v1873_v6 = vand.u32 2147483648, %v3529_v35  ;;  %vm1867_vm15 = vweird.f32 %v3529_v35 }
 0xe37   :  { %v1708_v60 = vsub.f32 1.0, %v1707_v53  ;;  %vm1789_vm12 = vmor %vm1787_vm11, %vm1788_vm10  ;;  %v1871_v33 = vand.u32 2147483647, %v3529_v35 }
 0xe38   :  { %v1784_v51 = vsub.f32 1.0, %v1783_v49  ;;  %v1874_v19 = vor.u32 1.1754944e-38, %v1873_v6 }
 0xe39   :  { %v1709_v38 = vmul.f32 %v2854_v56, %v1708_v60 }
 0xe3a   :  { %v1785_v57 = vmul.f32 %v2856_v46, %v1784_v51 }
 0xe3b   :  { %v1710_v40 = vadd.f32 %v2854_v56, %v1709_v38 }
 0xe3c   :  { %v1786_v2 = vadd.f32 %v2856_v46, %v1785_v57 }
 0xe3d   :  { %v1714_v42 = vsel %vm1713_vm3, %v2854_v56, %v1710_v40  ;;  %v1613_v44 = vpop.xlane.xlu1 %1612 }
 0xe3e   :  { %v1719_v47 = vsel %vm1716_vm4, %v1718_v41, %v1714_v42  ;;  %2857 = vrcp.f32 %v1613_v44  ;;  %v1625_v18 = vand.u32 2147483648, %v1613_v44  ;;  %v1623_v59 = vand.u32 2147483647, %v1613_v44 }
 0xe3f   :  { %v1720_v48 = vmul.f32 %v3503_v21, %v1719_v47  ;;  %vm1619_vm6 = vweird.f32 %v1613_v44  ;;  %v1793_v21 = vand.u32 2147483648, %v1781_v34  ;;  %v1790_v8 = vsel %vm1789_vm12, %v2856_v46, %v1786_v2 }
 0xe40   :  { %v1626_v62 = vor.u32 1.1754944e-38, %v1625_v18  ;;  %vm1624_vm9 = vcmp.eq.f32.partialorder %v1623_v59, 8.507059e+37  ;;  %2859 = vrcp.f32 %v3529_v35  ;;  %vm1872_vm4 = vcmp.eq.f32.partialorder %v1871_v33, 8.507059e+37 }
 0xe41   :  { %2578 = vmatmul.msk.f32.vlgmr.msrb.gmra.mxu1 %vm249_vm8, %v1720_v48  ;;  %v1794_v9 = vor.u32 1.1754944e-38, %v1793_v21  ;;  %v1957_v4 = vpop.permute.xlu0 %1956 }
 0xe43   :  { %v1795_v55 = vsel %vm1792_vm13, %v1794_v9, %v1790_v8 }
 0xe44   :  { %v2858_v50 = vpop.eup %2857  ;;  %v1796_v14 = vmul.f32 %v3505_v5, %v1795_v55 }
 0xe45   :  { %v1615_v52 = vmul.f32 %v2858_v50, %v1613_v44  ;;  %vm1620_vm5 = vweird.f32 %v2858_v50 }
 0xe46   :  { %vm1621_vm7 = vmor %vm1619_vm6, %vm1620_vm5  ;;  %v2860_v13 = vpop.eup %2859 }
 0xe47   :  { %v1616_v54 = vsub.f32 1.0, %v1615_v52  ;;  %vm1868_vm14 = vweird.f32 %v2860_v13 }
 0xe48   :  { %vm1869_vm3 = vmor %vm1867_vm15, %vm1868_vm14 }
 0xe49   :  { %v1617_v58 = vmul.f32 %v2858_v50, %v1616_v54 }
 0xe4b   :  { %v1618_v61 = vadd.f32 %v2858_v50, %v1617_v58 }
 0xe4d   :  { %v1622_v0 = vsel %vm1621_vm7, %v2858_v50, %v1618_v61 }
 0xe4e   :  { %v1627_v63 = vsel %vm1624_vm9, %v1626_v62, %v1622_v0 }
 0xe4f   :  { %v1628_v7 = vmul.f32 %v3515_v3, %v1627_v63  ;;  %v1863_v3 = vmul.f32 %v2860_v13, %v3529_v35  ;;  %v2770_v63 = vld [vmem:[%s3671_s11 + $0x1] ss:$0 sm:$0xff] }
 0xe51   :  { %2575 = vmatmul.msk.f32.vlgmr.msra.gmra.mxu3 %vm249_vm8, %v1628_v7  ;;  %v1864_v15 = vsub.f32 1.0, %v1863_v3 }
 0xe53   :  { %v1865_v16 = vmul.f32 %v2860_v13, %v1864_v15 }
 0xe55   :  { %v1799_v12 = vpop.permute.xlu1 %1798  ;;  %v1866_v17 = vadd.f32 %v2860_v13, %v1865_v16 }
 0xe56   :  { %1819 = vmatpush.msrb.mxu3 %v1799_v12 }
 0xe57   :  { %v1870_v22 = vsel %vm1869_vm3, %v2860_v13, %v1866_v17 }
 0xe58   :  { %1977 = vmatpush.msra.mxu3 %v1957_v4  ;;  %v1875_v5 = vsel %vm1872_vm4, %v1874_v19, %v1870_v22  ;;  %v2706_v22 = vld [vmem:[%s3674_s14 + $0x18] sm:$0xff] }
 0xe59   :  { %2581 = vmatmul.msk.f32.vlgmr.msrb.gmra.mxu3 %vm249_vm8, %v1796_v14  ;;  %v1876_v28 = vmul.f32 %v3511_v1, %v1875_v5 }
 0xe68   :  { %v1940_v20 = vpop.xlane.xlu2 %1939 }
 0xe69   :  { %2861 = vrcp.f32 %v1940_v20  ;;  %v1952_v29 = vand.u32 2147483648, %v1940_v20  ;;  %v1950_v31 = vand.u32 2147483647, %v1940_v20  ;;  %vm1946_vm6 = vweird.f32 %v1940_v20 }
 0xe6b   :  { %v1953_v53 = vor.u32 1.1754944e-38, %v1952_v29  ;;  %vm1951_vm10 = vcmp.eq.f32.partialorder %v1950_v31, 8.507059e+37 }
 0xe6f   :  { %v2862_v23 = vpop.eup %2861 }
 0xe70   :  { %v1942_v24 = vmul.f32 %v2862_v23, %v1940_v20  ;;  %v1878_v11 = vpop.permute.xlu2 %1877  ;;  %vm1947_vm5 = vweird.f32 %v2862_v23 }
 0xe71   :  { %1898 = vmatpush.msra.mxu1 %v1878_v11  ;;  %vm1948_vm7 = vmor %vm1946_vm6, %vm1947_vm5  ;;  %v1573_v39 = vpop.f32.mrf.mxu1 }
 0xe72   :  { %v1943_v27 = vsub.f32 1.0, %v1942_v24  ;;  %2584 = vmatmul.msk.f32.vlgmr.msra.gmra.mxu1 %vm249_vm8, %v1876_v28 }
 0xe73   :  { %2131 = vmatpush.bf16.msrb.mxu1 %v2706_v22 }
 0xe74   :  { %v1944_v43 = vmul.f32 %v2862_v23, %v1943_v27 }
 0xe76   :  { %v1945_v56 = vadd.f32 %v2862_v23, %v1944_v43 }
 0xe78   :  { %v1949_v34 = vsel %vm1948_vm7, %v2862_v23, %v1945_v56  ;;  %v2705_v23 = vld [vmem:[%s3674_s14 + $0x10] sm:$0xff] }
 0xe79   :  { %v1954_v35 = vsel %vm1951_vm10, %v1953_v53, %v1949_v34  ;;  %2132 = vmatpush.bf16.msrb.mxu1 %v2705_v23 }
 0xe7a   :  { %v1955_v60 = vmul.f32 %v3523_v45, %v1954_v35  ;;  %v2704_v45 = vld [vmem:[%s3670_s10 + $0x18] sm:$0xff] }
 0xe7b   :  { %2024 = vmatpush.bf16.msrb.mxu0 %v2704_v45 }
 0xe7c   :  { %2587 = vmatmul.msk.f32.vlgmr.msra.gmra.mxu3 %vm249_vm8, %v1955_v60 }
 0xebe   :  { %v1741_v40 = vpop.f32.mrf.mxu1 }
 0xed4   :  { %v1652_v1 = vpop.f32.mrf.mxu3 }
 0xedc   :  { %v1821_v37 = vpop.f32.mrf.mxu3 }
 0xedd   :  { %v2740_v38 = vpack.i.bf16 %v1821_v37, %v3481_v32  ;;  %v2703_v32 = vld [vmem:[%s3670_s10 + $0x10] sm:$0xff] }
 0xede   :  { %2025 = vmatpush.bf16.msrb.mxu0 %v2703_v32 }
 0xedf   :  { %2741 = vrot.lane.b32.xlu0 %v2740_v38, %s3711_s8 }
 0xeef   :  { %v1900_v41 = vpop.f32.mrf.mxu1 }
 0xef0   :  { %v2745_v42 = vpack.i.bf16 %v1900_v41, %v1573_v39  ;;  %v2771_v39 = vld [vmem:[%s3672_s12 + $0x1] ss:$0 sm:$0xff] }
 0xef2   :  { %2746 = vrot.lane.b32.xlu1 %v2745_v42, %s3712_s9 }
 0xeff   :  { %v1979_v44 = vpop.f32.mrf.mxu3 }
 0xf00   :  { %v2750_v46 = vpack.i.bf16 %v1979_v44, %v1652_v1  ;;  %v2772_v44 = vld [vmem:[%s3673_s13 + $0x1] ss:$0 sm:$0xff]  ;;  %s2408_s13 = sshll.u32 %s3681_s21, 4  ;;  %s2409_s13 = int_to_ptr.hbm [resolvable:$true] %s2408_s13 }
 0xf02   :  { %2751 = vrot.lane.b32.xlu2 %v2750_v46, %s3713_s25 }
 0xf51   :  { %v2742_v47 = vpop.permute.xlu0 %2741 }
 0xf52   :  { %v2744_v48 = vunpack.i.h.bf16 %v2742_v47  ;;  %v2743_v49 = vunpack.i.l.bf16 %v2742_v47 }
 0xf54   :  { %v1667_v18 = vsel %vm249_vm8, %v3473_v25, %v2743_v49  ;;  %v1994_v57 = vsel %vm249_vm8, %v1741_v40, %v2744_v48 }
 0xf5c   :  { %v2752_v50 = vpop.permute.xlu2 %2751 }
 0xf5d   :  { %v2754_v58 = vunpack.i.h.bf16 %v2752_v50  ;;  %v2753_v59 = vunpack.i.l.bf16 %v2752_v50  ;;  %v2714_v50 = vld [vmem:[%s3676_s16 + $0x78] sm:$0xff] }
 0xf5e   :  { %2247 = vmatpush.bf16.msra.mxu2 %v2714_v50 }
 0xf64   :  { %v2747_v51 = vpop.permute.xlu1 %2746 }
 0xf65   :  { %v2749_v52 = vunpack.i.h.bf16 %v2747_v51  ;;  %v2748_v54 = vunpack.i.l.bf16 %v2747_v51  ;;  %v2713_v51 = vld [vmem:[%s3676_s16 + $0x70] sm:$0xff] }
 0xf66   :  { %2248 = vmatpush.bf16.msra.mxu2 %v2713_v51 }
 0xf67   :  { %v1995_v61 = vsel %vm575_vm1, %v1994_v57, %v2749_v52  ;;  %v1668_v62 = vsel %vm575_vm1, %v1667_v18, %v2748_v54  ;;  %v2712_v52 = vld [vmem:[%s3676_s16 + $0x68] sm:$0xff]  ;;  %v2711_v54 = vld [vmem:[%s3676_s16 + $0x60] sm:$0xff]  ;;  %v2710_v57 = vld [vmem:[%s3676_s16 + $0x58] sm:$0xff] }
 0xf68   :  { %v1669_v2 = vsel %vm577_vm2, %v1668_v62, %v2753_v59  ;;  %v1996_v0 = vsel %vm577_vm2, %v1995_v61, %v2754_v58  ;;  %v2773_v18 = vld [vmem:[%s3675_s15 + $0x1] ss:$0 sm:$0xff]  ;;  %v2709_v61 = vld [vmem:[%s3676_s16 + $0x50] sm:$0xff] }
 0xf69   :  { %v2002_v21 = vpack.c.bf16 %v1996_v0, %v1669_v2  ;;  %v2708_v0 = vld [vmem:[%s3676_s16 + $0x48] sm:$0xff] }
 0xf6a   :  { %2249 = vmatpush.bf16.msra.mxu2 %v2712_v52 }
 0xf6b   :  { %2600 = vmatmul.msk.bf16.vlgmr.msrb.gmra.mxu0 %vm79_vm0, %v2002_v21 }
 0xf6e   :  { %2250 = vmatpush.bf16.msra.mxu2 %v2711_v54 }
 0xf72   :  { %2251 = vmatpush.bf16.msra.mxu2 %v2710_v57 }
 0xf76   :  { %2252 = vmatpush.bf16.msra.mxu2 %v2709_v61 }
 0xf7a   :  { %2253 = vmatpush.bf16.msra.mxu2 %v2708_v0 }
 0xfe8   :  { %v2027_v25 = vpop.f32.mrf.mxu0 }
 0xfe9   :  { %v2032_v36 = vadd.f32 %v2027_v25, %v3365_v26  ;;  %v2707_v25 = vld [vmem:[%s3676_s16 + $0x40] sm:$0xff] }
 0xfea   :  { %2254 = vmatpush.bf16.msra.mxu2 %v2707_v25 }
 0xfeb   :  { %v3568_v7 = vadd.f32 %v2770_v63, %v2032_v36 }
 0xfed   :  { %v2045_v8 = vsel %vm79_vm0, %v3568_v7, 0.0 }
 0xfee   :  { %2046 = vadd.xlane.f32.xlu0 %v2045_v8 }
 0xff0   :  { %v2029_v9 = vpop.f32.mrf.mxu0 }
 0xff1   :  { %v2033_v55 = vadd.f32 %v2029_v9, %v3370_v30 }
 0xff3   :  { %v3573_v12 = vadd.f32 %v2770_v63, %v2033_v55 }
 0xff5   :  { %v2048_v4 = vsel %vm79_vm0, %v3573_v12, 0.0 }
 0xff6   :  { %2049 = vadd.xlane.f32.xlu1 %v2048_v4 }
0x1061   :  { %v2047_v13 = vpop.xlane.xlu0 %2046 }
0x1062   :  { %v2051_v14 = vmul.f32 %v2047_v13, %v3039_v10 }
0x1064   :  { %v2053_v26 = vsub.f32 %v3568_v7, %v2051_v14 }
0x1066   :  { %v2055_v3 = vmul.f32 %v2053_v26, %v2053_v26 }
0x1068   :  { %v2057_v15 = vsel %vm79_vm0, %v2055_v3, 0.0 }
0x1069   :  { %2058 = vadd.xlane.f32.xlu2 %v2057_v15  ;;  %v2050_v16 = vpop.xlane.xlu1 %2049 }
0x106a   :  { %v2052_v17 = vmul.f32 %v2050_v16, %v3039_v10 }
0x106c   :  { %v2054_v30 = vsub.f32 %v3573_v12, %v2052_v17 }
0x106e   :  { %v2056_v6 = vmul.f32 %v2054_v30, %v2054_v30 }
0x1070   :  { %v2060_v33 = vsel %vm79_vm0, %v2056_v6, 0.0 }
0x1071   :  { %2061 = vadd.xlane.f32.xlu0 %v2060_v33 }
0x10dc   :  { %v2059_v20 = vpop.xlane.xlu2 %2058 }
0x10dd   :  { %v2063_v19 = vmul.f32 %v2059_v20, %v3039_v10 }
0x10df   :  { %v2065_v5 = vadd.f32 1e-05, %v2063_v19 }
0x10e1   :  { %2863 = vrsqrt.f32 %v2065_v5  ;;  %vm2073_vm2 = vweird.f32 %v2065_v5 }
0x10e4   :  { %v2062_v24 = vpop.xlane.xlu0 %2061 }
0x10e5   :  { %v2064_v11 = vmul.f32 %v2062_v24, %v3039_v10 }
0x10e7   :  { %v2864_v28 = vpop.eup %2863  ;;  %v2066_v27 = vadd.f32 1e-05, %v2064_v11 }
0x10e8   :  { %v2068_v29 = vmul.f32 %v2864_v28, %v2065_v5  ;;  %vm2074_vm8 = vweird.f32 %v2864_v28 }
0x10e9   :  { %2865 = vrsqrt.f32 %v2066_v27  ;;  %vm2075_vm9 = vmor %vm2073_vm2, %vm2074_vm8  ;;  %vm2083_vm12 = vweird.f32 %v2066_v27 }
0x10ea   :  { %v2069_v43 = vmul.f32 %v2864_v28, %v2068_v29 }
0x10ec   :  { %v2070_v31 = vmul.f32 0.5, %v2069_v43 }
0x10ee   :  { %v2071_v56 = vsub.f32 1.5, %v2070_v31 }
0x10ef   :  { %v2866_v53 = vpop.eup %2865 }
0x10f0   :  { %v2072_v34 = vmul.f32 %v2864_v28, %v2071_v56  ;;  %v2078_v35 = vmul.f32 %v2866_v53, %v2066_v27  ;;  %vm2084_vm11 = vweird.f32 %v2866_v53 }
0x10f1   :  { %vm2085_vm13 = vmor %vm2083_vm12, %vm2084_vm11 }
0x10f2   :  { %v2079_v60 = vmul.f32 %v2866_v53, %v2078_v35  ;;  %v2076_v1 = vsel %vm2075_vm9, %v2864_v28, %v2072_v34  ;;  %v2774_v34 = vld [vmem:[%s3677_s17 + $0x1] ss:$0 sm:$0xff] }
0x10f3   :  { %v2087_v40 = vmul.f32 %v2076_v1, %v2053_v26 }
0x10f4   :  { %v2080_v37 = vmul.f32 0.5, %v2079_v60 }
0x10f5   :  { %v2092_v46 = vmul.f32 %v2771_v39, %v2087_v40 }
0x10f6   :  { %v2081_v38 = vsub.f32 1.5, %v2080_v37 }
0x10f7   :  { %v2097_v47 = vadd.f32 %v2772_v44, %v2092_v46 }
0x10f8   :  { %v2082_v41 = vmul.f32 %v2866_v53, %v2081_v38 }
0x10fa   :  { %v2086_v42 = vsel %vm2085_vm13, %v2866_v53, %v2082_v41 }
0x10fb   :  { %v2088_v45 = vmul.f32 %v2086_v42, %v2054_v30 }
0x10fd   :  { %v2093_v32 = vmul.f32 %v2771_v39, %v2088_v45 }
0x10ff   :  { %v2098_v48 = vadd.f32 %v2772_v44, %v2093_v32 }
0x1101   :  { %v2104_v49 = vpack.c.bf16 %v2098_v48, %v2097_v47 }
0x1103   :  { %2617 = vmatmul.msk.bf16.vlgmr.msrb.gmra.mxu1 %vm79_vm0, %v2104_v49 }
0x1180   :  { %v2134_v58 = vpop.f32.mrf.mxu1 }
0x1181   :  { %v2135_v59 = vadd.f32 %v2773_v18, %v2134_v58 }
0x1183   :  { %v2618_v62 = vmul.f32 -1.702, %v2135_v59 }
0x1185   :  { %v2143_v2 = vmul.f32 1.442695, %v2618_v62 }
0x1187   :  { %2867 = vpow2.f32 %v2143_v2 }
0x1188   :  { %v2136_v21 = vpop.f32.mrf.mxu1 }
0x1189   :  { %v2137_v63 = vadd.f32 %v2773_v18, %v2136_v21 }
0x118b   :  { %v2619_v36 = vmul.f32 -1.702, %v2137_v63 }
0x118d   :  { %v2868_v8 = vpop.eup %2867  ;;  %v2145_v9 = vmul.f32 1.442695, %v2619_v36 }
0x118e   :  { %v2147_v55 = vadd.f32 1.0, %v2868_v8 }
0x118f   :  { %2869 = vpow2.f32 %v2145_v9 }
0x1190   :  { %2871 = vrcp.f32 %v2147_v55  ;;  %v2160_v6 = vand.u32 2147483648, %v2147_v55  ;;  %vm2154_vm15 = vweird.f32 %v2147_v55  ;;  %v2158_v33 = vand.u32 2147483647, %v2147_v55 }
0x1192   :  { %v2161_v24 = vor.u32 1.1754944e-38, %v2160_v6  ;;  %vm2159_vm5 = vcmp.eq.f32.partialorder %v2158_v33, 8.507059e+37  ;;  %v2716_v6 = vld [vmem:[%s3680_s20 + $0x8] sm:$0xff]  ;;  %v2715_v33 = vld [vmem:[%s3680_s20] sm:$0xff] }
0x1195   :  { %v2870_v4 = vpop.eup %2869 }
0x1196   :  { %v2872_v13 = vpop.eup %2871  ;;  %v2148_v14 = vadd.f32 1.0, %v2870_v4 }
0x1197   :  { %v2150_v26 = vmul.f32 %v2872_v13, %v2147_v55  ;;  %vm2155_vm14 = vweird.f32 %v2872_v13 }
0x1198   :  { %2873 = vrcp.f32 %v2148_v14  ;;  %vm2156_vm3 = vmor %vm2154_vm15, %vm2155_vm14  ;;  %v2175_v22 = vand.u32 2147483648, %v2148_v14  ;;  %v2173_v23 = vand.u32 2147483647, %v2148_v14  ;;  %vm2169_vm6 = vweird.f32 %v2148_v14 }
0x1199   :  { %v2151_v3 = vsub.f32 1.0, %v2150_v26  ;;  %vm2384_vm14 = vcmask 254976  }
0x119a   :  { %v2176_v27 = vor.u32 1.1754944e-38, %v2175_v22  ;;  %vm2174_vm10 = vcmp.eq.f32.partialorder %v2173_v23, 8.507059e+37 }
0x119b   :  { %v2152_v15 = vmul.f32 %v2872_v13, %v2151_v3  ;;  %v2776_v3 = vld [vmem:[%s3679_s19] ss:$0 sm:$0xff]  ;;  %s2914_s19 = smov [#allocation2]  }
0x119c   :  { %s2406_s20 = sshll.u32 %s2914_s19, 4  ;;  %s2407_s20 = int_to_ptr.vmem [resolvable:$true] %s2406_s20 }
0x119d   :  { %v2153_v17 = vadd.f32 %v2872_v13, %v2152_v15 }
0x119e   :  { %v2874_v16 = vpop.eup %2873 }
0x119f   :  { %v2165_v30 = vmul.f32 %v2874_v16, %v2148_v14  ;;  %v2157_v19 = vsel %vm2156_vm3, %v2872_v13, %v2153_v17  ;;  %vm2170_vm4 = vweird.f32 %v2874_v16 }
0x11a0   :  { %v2162_v28 = vsel %vm2159_vm5, %v2161_v24, %v2157_v19  ;;  %vm2171_vm7 = vmor %vm2169_vm6, %vm2170_vm4 }
0x11a1   :  { %v2166_v20 = vsub.f32 1.0, %v2165_v30  ;;  %v2179_v31 = vmul.f32 %v2162_v28, %v2135_v59  ;;  %v2326_v30 = vld [vmem:[%s3714_s4] sm:$0x3] }
0x11a3   :  { %v2167_v5 = vmul.f32 %v2874_v16, %v2166_v20 }
0x11a5   :  { %v2168_v11 = vadd.f32 %v2874_v16, %v2167_v5 }
0x11a7   :  { %v2172_v29 = vsel %vm2171_vm7, %v2874_v16, %v2168_v11 }
0x11a8   :  { %v2177_v43 = vsel %vm2174_vm10, %v2176_v27, %v2172_v29 }
0x11a9   :  { %v2180_v56 = vmul.f32 %v2177_v43, %v2137_v63 }
0x11ab   :  { %v2198_v53 = vpack.c.bf16 %v2180_v56, %v2179_v31 }
0x11ad   :  { %2255 = vmatmul.bf16.vlgmr.msra.gmra.mxu2 %v2198_v53 }
0x1230   :  { %v2256_v35 = vpop.f32.mrf.mxu2 }
0x1231   :  { %v2261_v60 = vadd.f32 %v2256_v35, %v3568_v7 }
0x1233   :  { %v2268_v1 = vadd.f32 %v2774_v34, %v2261_v60 }
0x1235   :  { %v2272_v37 = vsel %vm79_vm0, %v2268_v1, 0.0 }
0x1236   :  { %2273 = vadd.xlane.f32.xlu2 %v2272_v37 }
0x1238   :  { %v2258_v38 = vpop.f32.mrf.mxu2 }
0x1239   :  { %v2262_v39 = vadd.f32 %v2258_v38, %v3573_v12 }
0x123b   :  { %v2269_v40 = vadd.f32 %v2774_v34, %v2262_v39 }
0x123d   :  { %v2275_v41 = vsel %vm79_vm0, %v2269_v40, 0.0 }
0x123e   :  { %2276 = vadd.xlane.f32.xlu1 %v2275_v41 }
0x12a9   :  { %v2274_v42 = vpop.xlane.xlu2 %2273 }
0x12aa   :  { %v2278_v44 = vmul.f32 %v2274_v42, %v3039_v10 }
0x12ac   :  { %v2280_v46 = vsub.f32 %v2268_v1, %v2278_v44 }
0x12ae   :  { %v2282_v45 = vmul.f32 %v2280_v46, %v2280_v46 }
0x12b0   :  { %v2284_v32 = vsel %vm79_vm0, %v2282_v45, 0.0 }
0x12b1   :  { %2285 = vadd.xlane.f32.xlu1 %v2284_v32  ;;  %v2277_v7 = vpop.xlane.xlu1 %2276 }
0x12b2   :  { %v2279_v47 = vmul.f32 %v2277_v7, %v3039_v10 }
0x12b4   :  { %v2281_v48 = vsub.f32 %v2269_v40, %v2279_v47 }
0x12b6   :  { %v2283_v49 = vmul.f32 %v2281_v48, %v2281_v48 }
0x12b8   :  { %v2287_v50 = vsel %vm79_vm0, %v2283_v49, 0.0 }
0x12b9   :  { %2288 = vadd.xlane.f32.xlu0 %v2287_v50 }
0x1324   :  { %v2286_v12 = vpop.xlane.xlu1 %2285 }
0x1325   :  { %v2290_v51 = vmul.f32 %v2286_v12, %v3039_v10 }
0x1327   :  { %v2292_v52 = vadd.f32 1e-05, %v2290_v51 }
0x1329   :  { %2875 = vrsqrt.f32 %v2292_v52  ;;  %vm2300_vm2 = vweird.f32 %v2292_v52 }
0x132c   :  { %v2289_v54 = vpop.xlane.xlu0 %2288 }
0x132d   :  { %v2291_v18 = vmul.f32 %v2289_v54, %v3039_v10  ;;  %v2775_v10 = vld [vmem:[%s3678_s18] ss:$0 sm:$0xff] }
0x132f   :  { %v2876_v57 = vpop.eup %2875  ;;  %v2293_v58 = vadd.f32 1e-05, %v2291_v18 }
0x1330   :  { %v2295_v59 = vmul.f32 %v2876_v57, %v2292_v52  ;;  %vm2301_vm8 = vweird.f32 %v2876_v57 }
0x1331   :  { %2877 = vrsqrt.f32 %v2293_v58  ;;  %vm2302_vm9 = vmor %vm2300_vm2, %vm2301_vm8  ;;  %vm2310_vm12 = vweird.f32 %v2293_v58 }
0x1332   :  { %v2296_v61 = vmul.f32 %v2876_v57, %v2295_v59 }
0x1334   :  { %v2297_v62 = vmul.f32 0.5, %v2296_v61 }
0x1336   :  { %v2298_v2 = vsub.f32 1.5, %v2297_v62 }
0x1337   :  { %v2878_v0 = vpop.eup %2877 }
0x1338   :  { %v2305_v21 = vmul.f32 %v2878_v0, %v2293_v58  ;;  %v2299_v63 = vmul.f32 %v2876_v57, %v2298_v2  ;;  %vm2311_vm11 = vweird.f32 %v2878_v0 }
0x1339   :  { %vm2312_vm13 = vmor %vm2310_vm12, %vm2311_vm11 }
0x133a   :  { %v2306_v25 = vmul.f32 %v2878_v0, %v2305_v21  ;;  %v2303_v8 = vsel %vm2302_vm9, %v2876_v57, %v2299_v63 }
0x133b   :  { %v2314_v4 = vmul.f32 %v2303_v8, %v2280_v46 }
0x133c   :  { %v2307_v36 = vmul.f32 0.5, %v2306_v25 }
0x133d   :  { %v2319_v15 = vmul.f32 %v2775_v10, %v2314_v4 }
0x133e   :  { %v2308_v9 = vsub.f32 1.5, %v2307_v36 }
0x133f   :  { %v2324_v17 = vadd.f32 %v2776_v3, %v2319_v15 }
0x1340   :  { %v2309_v55 = vmul.f32 %v2878_v0, %v2308_v9 }
0x1342   :  { %v2313_v13 = vsel %vm2312_vm13, %v2878_v0, %v2309_v55 }
0x1343   :  { %v2315_v14 = vmul.f32 %v2313_v13, %v2281_v48 }
0x1345   :  { %v2320_v26 = vmul.f32 %v2775_v10, %v2315_v14 }
0x1347   :  { %v2325_v16 = vadd.f32 %v2776_v3, %v2320_v26 }
0x1349   :  { %2344 = vmatpush.msrb.mxu3 %v2325_v16 }
0x134b   :  { %2345 = vmatpush.msrb.mxu3 %v2324_v17 }
0x134c   :  { %2669 = vmatmul.msk.f32.vlgmr.msrb.gmra.mxu3 %vm575_vm1, %v2326_v30 }
0x134d   :  { %2376 = vmatpush.bf16.msra.mxu3 %v2716_v6 }
0x1351   :  { %2377 = vmatpush.bf16.msra.mxu3 %v2715_v33 }
0x13cf   :  { %v2347_v20 = vpop.f32.mrf.mxu3 }
0x13d0   :  { %v2354_v22 = vpack.c.bf16 %v2347_v20, %v2347_v20 }
0x13d2   :  { %2678 = vmatmul.msk.bf16.vlgmr.msra.gmra.mxu3 %vm79_vm0, %v2354_v22 }
0x1455   :  { %v2379_v19 = vpop.f32.mrf.mxu3 }
0x1456   :  { %v2383_v5 = vmul.f32 %v2379_v19, %v2379_v19 }
0x1458   :  { %v2385_v23 = vsel %vm2384_vm14, %v2383_v5, 0.0 }
0x1459   :  { %2386 = vadd.xlane.f32.xlu2 %v2385_v23 }
0x145d   :  { %v2381_v24 = vpop.f32.mrf.mxu3 }
0x14cc   :  { %v2387_v11 = vpop.xlane.xlu2 %2386 }
0x14cd   :  { %v2388_v28 = vmax.f32 %v2387_v11, 1e-12 }
0x14cf   :  { %2879 = vrsqrt.f32 %v2388_v28  ;;  %vm2395_vm15 = vweird.f32 %v2388_v28 }
0x14d5   :  { %v2880_v27 = vpop.eup %2879 }
0x14d6   :  { %v2390_v29 = vmul.f32 %v2880_v27, %v2388_v28  ;;  %vm2396_vm1 = vweird.f32 %v2880_v27 }
0x14d7   :  { %vm2397_vm0 = vmor %vm2395_vm15, %vm2396_vm1 }
0x14d8   :  { %v2391_v43 = vmul.f32 %v2880_v27, %v2390_v29 }
0x14da   :  { %v2392_v31 = vmul.f32 0.5, %v2391_v43 }
0x14dc   :  { %v2393_v56 = vsub.f32 1.5, %v2392_v31 }
0x14de   :  { %v2394_v53 = vmul.f32 %v2880_v27, %v2393_v56 }
0x14e0   :  { %v2398_v34 = vsel %vm2397_vm0, %v2880_v27, %v2394_v53 }
0x14e1   :  { %v2399_v35 = vmul.f32 %v2398_v34, %v2379_v19 }
0x14e3   :  { %2400 = vst.msk [vmem:[#allocation2] sm:$0x3] %vm2384_vm14, %v2399_v35 }
0x14e4   :  { %2411 = dma.vmem_to_hbm [thread:$0]  %s2407_s20, 32, %s2409_s13, [#allocation3]  }
0x14e5   :  { %2905 = dma.done.wait [#allocation3], 32  }
0x14e6   :  { %2906 = vsyncadd [#allocation3], 4294967264 }
0x14e7   :  { %2416 = vsyncpa [#allocation3], 1 }

</bundles_post_ra>
